<compile_context>
chip_gen: v7x
topology: tpu7x:2x2x1
jax: 0.10.0
libtpu: 0.0.40
codegen_flags: <defaults>
</compile_context>

<pallas_src>
import numpy as np

import jax
import jax.numpy as jnp
from jax import lax
from jax.experimental import pallas as pl
from jax.experimental.pallas import tpu as pltpu


# ---------------------------------------------------------------------------
# Fused kernel
# ---------------------------------------------------------------------------
_W_KEYS = ("u1row", "u2rep", "selU3", "rt", "be", "ve",          # temporal attention
           "w1row", "r", "selC", "w2", "selW3", "bsT", "vsT",     # spatial attention
           "chebT", "theta_kron",                                 # graph conv
           "w_stack", "bias_full", "ln_pool", "gamma_t", "beta_t")  # convs + LN


def _softmax_axis0(m):
    m = m - jnp.max(m, axis=0, keepdims=True)
    e = jnp.exp(m)
    return e * pl.reciprocal(jnp.sum(e, axis=0, keepdims=True), approx=True)


def _softmax_last(m):
    m = m - jnp.max(m, axis=-1, keepdims=True)
    e = jnp.exp(m)
    return e * pl.reciprocal(jnp.sum(e, axis=-1, keepdims=True), approx=True)


def _block_compute(x_flat, w, k_order, bt, n):
    """One ASTGCN block on a (Bt*N, T*C) channel-last activation -> (Bt*N, Tout*Ft)."""
    f32 = jnp.float32
    q_parts = [[] for _ in range(k_order)]
    for b in range(bt):
        xb = x_flat[b * n:(b + 1) * n, :]                                    # (N, T*C)

        # ---- temporal attention E (T,T); softmax over axis 0 (torch dim=1) ----
        a_row = jnp.dot(w["u1row"][...], xb, preferred_element_type=f32)     # (1, T*C)
        lhs_t = jnp.dot(w["rt"][...] * a_row, w["u2rep"][...],
                        preferred_element_type=f32)                          # (T, N)
        rhs_t = jnp.dot(xb, w["selU3"][...], preferred_element_type=f32)     # (N, T)
        prod_t = jnp.dot(lhs_t, rhs_t, preferred_element_type=f32)           # (T, T)
        e = jnp.dot(w["ve"][...], jax.nn.sigmoid(prod_t + w["be"][...]),
                    preferred_element_type=f32)
        e_att = _softmax_axis0(e)                                            # (T, T)

        # ---- spatial attention, built directly as S^T (x_TAt folded in) ----
        w1e = jnp.sum(e_att * w["w1row"][...], axis=1, keepdims=True)        # (T, 1)
        w1e_rep = jnp.dot(w["r"][...], w1e, preferred_element_type=f32)      # (T*C, 1)
        lhs1 = jnp.dot(xb, w["selC"][...] * w1e_rep,
                       preferred_element_type=f32)                           # (N, C)
        lhs_s = jnp.dot(lhs1, w["w2"][...], preferred_element_type=f32)      # (N, T)
        rhs3 = jnp.dot(xb, w["selW3"][...], preferred_element_type=f32)      # (N, T)
        rhs_s = jnp.dot(rhs3, e_att, preferred_element_type=f32)             # (N, T)
        prod_sT = lax.dot_general(rhs_s, lhs_s, (((1,), (1,)), ((), ())),
                                  preferred_element_type=f32)                # (N, N)
        s_matT = jnp.dot(jax.nn.sigmoid(prod_sT + w["bsT"][...]), w["vsT"][...],
                         preferred_element_type=f32)                         # = S^T
        s_attT = _softmax_last(s_matT)                                       # (N, N)

        # ---- per-k (T_k * S)^T @ x (all T at once), row-stacked across Bt ----
        for k in range(k_order):
            a_kT = w["chebT"][k] * s_attT
            q_parts[k].append(jnp.dot(a_kT, xb, preferred_element_type=f32))  # (N, T*C)

    # ---- batched stages: every matmul below has Bt*N rows of MXU work ----
    acc = None
    for k in range(k_order):
        qk = q_parts[k][0] if bt == 1 else jnp.concatenate(q_parts[k], axis=0)
        term = jnp.dot(qk, w["theta_kron"][k], preferred_element_type=f32)   # (Bt*N, T*Fc)
        acc = term if acc is None else acc + term
    sg = jnp.maximum(acc, 0.0)                                               # relu'd gcn

    # fused (1,3)/stride time conv + (1,1)/stride residual conv (stacked weight)
    hin = jnp.concatenate([sg, x_flat], axis=-1)                             # (Bt*N, T*Fc+T*C)
    h = jnp.maximum(jnp.dot(hin, w["w_stack"][...], preferred_element_type=f32)
                    + w["bias_full"][...], 0.0)                              # (Bt*N, Tout*Ft)

    # LayerNorm over the Ft channels via block-diagonal averaging matmul
    mu = jnp.dot(h, w["ln_pool"][...], preferred_element_type=f32)
    d = h - mu
    var = jnp.dot(d * d, w["ln_pool"][...], preferred_element_type=f32)
    return d * lax.rsqrt(var + 1e-5) * w["gamma_t"][...] + w["beta_t"][...]


def _make_fused_kernel(k_orders, bt, n):
    nblocks = len(k_orders)
    nw = len(_W_KEYS)

    def kernel(x_ref, *refs):
        f32 = jnp.float32
        out_ref = refs[-1]
        wrefs = refs[:-1]
        xs = [x_ref[b].astype(f32) for b in range(bt)]
        x = xs[0] if bt == 1 else jnp.concatenate(xs, axis=0)       # (Bt*N, T0*C0)
        for bi in range(nblocks):
            w = dict(zip(_W_KEYS, wrefs[bi * nw:(bi + 1) * nw]))
            x = _block_compute(x, w, k_orders[bi], bt, n)
        wf_ref = wrefs[nblocks * nw]
        bf_ref = wrefs[nblocks * nw + 1]
        y = jnp.dot(x, wf_ref[...], preferred_element_type=f32) + bf_ref[...]
        for b in range(bt):                                         # (Bt, N, P) store
            out_ref[b] = y[b * n:(b + 1) * n, :].astype(out_ref.dtype)

    return kernel


def _const_spec(a):
    nd = a.ndim
    return pl.BlockSpec(a.shape, lambda g, _nd=nd: (0,) * _nd)


def astgcn_submodule_forward(x_in, prep, batch_tile=2):
    # x_in: (B, T_in, N, F_in); the torch forward's permute(0,2,3,1) yields the per
    # block (B, N, F, T) view; the kernel uses the flat channel-last (B, N, T*C) view.
    x4 = jnp.transpose(x_in, (0, 2, 1, 3))                     # (B, N, T, C)
    bsz, n, t, c = x4.shape
    xf = x4.reshape(bsz, n, t * c).astype(jnp.bfloat16)
    bt = batch_tile if bsz % batch_tile == 0 else 1

    args = [xf]
    k_orders = []
    for bp in prep["blocks"]:
        k_orders.append(bp["K"])
        args += [bp[k] for k in _W_KEYS]
    args += [prep["final_Wf"], prep["final_bf"]]
    p_dim = prep["final_Wf"].shape[1]

    in_specs = ([pl.BlockSpec((bt, n, t * c), lambda g: (g, 0, 0))]
                + [_const_spec(a) for a in args[1:]])

    # explicit scoped-VMEM limit: double-buffered operands + headroom, clamped so it
    # stays within physical VMEM on every chip (v7x has 64 MiB/TC).
    vmem = sum(2 * int(np.prod(a.shape)) * a.dtype.itemsize for a in args) + (4 << 20)
    vmem = int(min(max(vmem, 16 << 20), 56 << 20))

    out = pl.pallas_call(
        _make_fused_kernel(tuple(k_orders), bt, n),
        grid=(bsz // bt,),
        in_specs=in_specs,
        out_specs=pl.BlockSpec((bt, n, p_dim), lambda g: (g, 0, 0)),
        out_shape=jax.ShapeDtypeStruct((bsz, n, p_dim), jnp.float32),
        compiler_params=pltpu.CompilerParams(
            dimension_semantics=("parallel",),
            vmem_limit_bytes=vmem),
    )(*args)
    return jnp.transpose(out, (0, 2, 1))                       # (B, num_for_predict, N)


# ---------------------------------------------------------------------------
# One-time parameter preparation (all weight re-layouts hoisted out of forward)
# ---------------------------------------------------------------------------
def _time_conv_weight(wtime, t_in, stride):
    # Conv2d(Fc -> Ft, kernel (1,3), stride (1,s), padding (0,1)) folded into a
    # (T*Fc, T_out*Ft) matmul weight acting on the time-major flat graph-conv output.
    ft, fc, _, ktap = wtime.shape
    t_out = (t_in - 1) // stride + 1
    sel = np.zeros((t_in, t_out, ktap), np.float32)
    for to in range(t_out):
        for j in range(ktap):
            ti = to * stride - 1 + j
            if 0 <= ti < t_in:
                sel[ti, to, j] = 1.0
    w = jnp.einsum("abj,fcj->acbf", jnp.asarray(sel), wtime[:, :, 0, :])
    return w.reshape(t_in * fc, t_out * ft)


def _res_conv_weight(wres, t_in, stride):
    # Conv2d(C -> Ft, kernel (1,1), stride (1,s)) folded into (T*C, T_out*Ft).
    ft, c = wres.shape[0], wres.shape[1]
    t_out = (t_in - 1) // stride + 1
    sel = np.zeros((t_in, t_out), np.float32)
    for to in range(t_out):
        sel[to * stride, to] = 1.0
    w = jnp.einsum("ab,fc->acbf", jnp.asarray(sel), wres[:, :, 0, 0])
    return w.reshape(t_in * c, t_out * ft)


def prepare_params(params):
    """One-time re-layout of torch-shaped parameters into kernel-ready weights."""
    bf16, f32 = jnp.bfloat16, jnp.float32
    blocks = []
    for p in params["blocks"]:
        t = p["Ve"].shape[0]
        c = p["U2"].shape[0]
        n = p["Vs"].shape[0]
        k_order = p["theta"].shape[0]
        ft = p["Wtime"].shape[0]
        s = p["stride"]
        t_out = (t - 1) // s + 1
        eye_t = jnp.eye(t, dtype=f32)
        wt_full = _time_conv_weight(p["Wtime"], t, s)                 # (T*Fc, Tout*Ft)
        wr_full = _res_conv_weight(p["Wres"], t, s)                   # (T*C,  Tout*Ft)
        theta_kron = jnp.stack(
            [jnp.kron(eye_t, p["theta"][k]) for k in range(k_order)])  # (K,T*C,T*Fc)
        ln_pool = jnp.asarray(np.kron(np.eye(t_out, dtype=np.float32),
                                      np.full((ft, ft), 1.0 / ft, np.float32)))
        blocks.append({
            "K": k_order,
            # temporal attention
            "u1row": p["U1"].reshape(1, n).astype(f32),
            "u2rep": jnp.tile(p["U2"], (t, 1)).astype(bf16),           # (T*C, N)
            "selU3": jnp.kron(eye_t, p["U3"].reshape(c, 1)).astype(f32),   # (T*C, T)
            "rt": jnp.kron(eye_t, jnp.ones((1, c), f32)).astype(bf16),     # (T, T*C)
            "be": p["be"].reshape(t, t).astype(f32),
            "ve": p["Ve"].astype(bf16),
            # spatial attention
            "w1row": p["W1"].reshape(1, t).astype(f32),
            "r": jnp.kron(eye_t, jnp.ones((c, 1), f32)).astype(bf16),      # (T*C, T)
            "selC": jnp.tile(jnp.eye(c, dtype=f32), (t, 1)).astype(bf16),  # (T*C, C)
            "w2": p["W2"].astype(bf16),
            "selW3": jnp.kron(eye_t, p["W3"].reshape(c, 1)).astype(f32),   # (T*C, T)
            "bsT": jnp.transpose(p["bs"].reshape(n, n)).astype(bf16),
            "vsT": jnp.transpose(p["Vs"]).astype(bf16),
            # graph conv
            "chebT": jnp.transpose(p["cheb"], (0, 2, 1)).astype(bf16),
            "theta_kron": theta_kron.astype(bf16),
            # fused time + residual conv, LayerNorm
            "w_stack": jnp.concatenate([wt_full, wr_full], axis=0).astype(bf16),
            "bias_full": jnp.tile(p["btime"] + p["bres"],
                                  t_out).reshape(1, t_out * ft).astype(f32),
            "ln_pool": ln_pool.astype(bf16),
            "gamma_t": jnp.tile(p["gamma"], t_out).reshape(1, t_out * ft).astype(f32),
            "beta_t": jnp.tile(p["beta"], t_out).reshape(1, t_out * ft).astype(f32),
        })
    fw, fb = params["final_W"], params["final_b"]
    p_dim, t_fin, _, ft_fin = fw.shape
    wf = jnp.transpose(fw[:, :, 0, :], (1, 2, 0)).reshape(t_fin * ft_fin, p_dim)
    return {"blocks": blocks,
            "final_Wf": wf.astype(bf16),
            "final_bf": fb.reshape(1, p_dim).astype(f32)}


# ---------------------------------------------------------------------------
# Pure-JAX reference (literal translation of the torch forward) for verification
# ---------------------------------------------------------------------------
def _ref_temporal_att(x, p):
    lhs = jnp.matmul(jnp.matmul(jnp.transpose(x, (0, 3, 2, 1)), p["U1"]), p["U2"])
    rhs = jnp.matmul(p["U3"], x)
    e = jnp.matmul(p["Ve"], jax.nn.sigmoid(jnp.matmul(lhs, rhs) + p["be"]))
    return jax.nn.softmax(e, axis=1)


def _ref_spatial_att(x, p):
    lhs = jnp.matmul(jnp.matmul(x, p["W1"]), p["W2"])
    rhs = jnp.swapaxes(jnp.matmul(p["W3"], x), -1, -2)
    s = jnp.matmul(p["Vs"], jax.nn.sigmoid(jnp.matmul(lhs, rhs) + p["bs"]))
    return jax.nn.softmax(s, axis=1)


def _ref_cheb(x, s_att, p):
    bsz, n, c, t = x.shape
    fc = p["theta"].shape[-1]
    outs = []
    for ts in range(t):
        gs = x[:, :, :, ts]
        out = jnp.zeros((bsz, n, fc), x.dtype)
        for k in range(p["cheb"].shape[0]):
            tk_at = p["cheb"][k] * s_att
            out = out + jnp.matmul(jnp.matmul(jnp.transpose(tk_at, (0, 2, 1)), gs),
                                   p["theta"][k])
        outs.append(out[..., None])
    return jax.nn.relu(jnp.concatenate(outs, axis=-1))


def _ref_block(x, p):
    bsz, n, c, t = x.shape
    s = p["stride"]
    t_at = _ref_temporal_att(x, p)
    x_tat = jnp.matmul(x.reshape(bsz, -1, t), t_at).reshape(bsz, n, c, t)
    s_at = _ref_spatial_att(x_tat, p)
    sg = _ref_cheb(x, s_at, p)
    dn = ("NCHW", "OIHW", "NCHW")
    tco = lax.conv_general_dilated(jnp.transpose(sg, (0, 2, 1, 3)), p["Wtime"],
                                   (1, s), [(0, 0), (1, 1)], dimension_numbers=dn)
    tco = tco + p["btime"][None, :, None, None]
    rco = lax.conv_general_dilated(jnp.transpose(x, (0, 2, 1, 3)), p["Wres"],
                                   (1, s), [(0, 0), (0, 0)], dimension_numbers=dn)
    rco = rco + p["bres"][None, :, None, None]
    h = jnp.transpose(jax.nn.relu(rco + tco), (0, 3, 2, 1))
    mu = jnp.mean(h, axis=-1, keepdims=True)
    var = jnp.mean((h - mu) ** 2, axis=-1, keepdims=True)
    ln = (h - mu) / jnp.sqrt(var + 1e-5) * p["gamma"] + p["beta"]
    return jnp.transpose(ln, (0, 2, 3, 1))


def ref_forward(x_in, params):
    x = jnp.transpose(x_in, (0, 2, 3, 1))
    for p in params["blocks"]:
        x = _ref_block(x, p)
    dn = ("NCHW", "OIHW", "NCHW")
    out = lax.conv_general_dilated(jnp.transpose(x, (0, 3, 1, 2)), params["final_W"],
                                   (1, 1), [(0, 0), (0, 0)], dimension_numbers=dn)
    out = out + params["final_b"][None, :, None, None]
    out = jnp.transpose(out[:, :, :, -1], (0, 2, 1))
    return jnp.swapaxes(out, 1, 2)


# ---------------------------------------------------------------------------
# Deterministic parameter construction (shapes from the module __init__)
# ---------------------------------------------------------------------------
def make_params(key, *, nb_block, in_channels, K, nb_chev_filter, nb_time_filter,
                time_strides, num_for_predict, len_input, num_of_vertices):
    n, t, c, s = num_of_vertices, len_input, in_channels, time_strides
    blocks = []
    for _ in range(nb_block):
        key, *ks = jax.random.split(key, 17)
        r = lambda k, shape, scale=0.1: scale * jax.random.normal(k, shape, jnp.float32)
        blocks.append({
            "U1": r(ks[0], (n,)), "U2": r(ks[1], (c, n)), "U3": r(ks[2], (c,)),
            "be": r(ks[3], (1, t, t)), "Ve": r(ks[4], (t, t)),
            "W1": r(ks[5], (t,)), "W2": r(ks[6], (c, t)), "W3": r(ks[7], (c,)),
            "bs": r(ks[8], (1, n, n)), "Vs": r(ks[9], (n, n)),
            "cheb": r(ks[10], (K, n, n), 0.3),
            "theta": r(ks[11], (K, c, nb_chev_filter)),
            "Wtime": r(ks[12], (nb_time_filter, nb_chev_filter, 1, 3)),
            "btime": r(ks[13], (nb_time_filter,), 0.05),
            "Wres": r(ks[14], (nb_time_filter, c, 1, 1)),
            "bres": r(ks[15], (nb_time_filter,), 0.05),
            "gamma": jnp.ones((nb_time_filter,), jnp.float32),
            "beta": jnp.zeros((nb_time_filter,), jnp.float32),
            "stride": s,
        })
        c, t, s = nb_time_filter, (t - 1) // s + 1, 1
    key, k1, k2 = jax.random.split(key, 3)
    final_w = 0.1 * jax.random.normal(k1, (num_for_predict, len_input // time_strides,
                                           1, nb_time_filter), jnp.float32)
    final_b = 0.05 * jax.random.normal(k2, (num_for_predict,), jnp.float32)
    return {"blocks": blocks, "final_W": final_w, "final_b": final_b}


if __name__ == "__main__":
    B, N, F_in, T_in = 4, 16, 4, 8
    K, nb_chev_filter, nb_time_filter = 3, 32, 32
    time_strides, nb_block, num_for_predict = 2, 2, 4

    root = jax.random.PRNGKey(0)
    k_param, k_x = jax.random.split(root)
    params = make_params(k_param, nb_block=nb_block, in_channels=F_in, K=K,
                         nb_chev_filter=nb_chev_filter, nb_time_filter=nb_time_filter,
                         time_strides=time_strides, num_for_predict=num_for_predict,
                         len_input=T_in, num_of_vertices=N)
    prep = prepare_params(params)          # one-time kernel-ready weight layouts

    # runtime input layout (see header): (B, T_in, N, F_in)
    x_in = jax.random.normal(k_x, (B, T_in, N, F_in), jnp.float32)

    fwd = jax.jit(lambda xx: astgcn_submodule_forward(xx, prep, batch_tile=2))
    out = jax.block_until_ready(fwd(x_in))
    assert out.shape == (B, num_for_predict, N), out.shape

    # verification against a literal pure-JAX translation run at high precision
    with jax.default_matmul_precision("highest"):
        ref = jax.block_until_ready(ref_forward(x_in, params))
    scale = float(jnp.max(jnp.abs(ref)))
    max_err = float(jnp.max(jnp.abs(out - ref)))
    assert max_err <= 5e-2 * max(1.0, scale), (max_err, scale)
    print("KERNEL_OK")
</pallas_src>

<mosaic_0001>
module attributes {stable_mosaic.version = 11 : i64} {
  func.func @kernel(%arg0: i32, %arg1: memref<2x16x32xbf16, #tpu.memory_space<vmem>>, %arg2: memref<1x16xf32, #tpu.memory_space<vmem>>, %arg3: memref<32x16xbf16, #tpu.memory_space<vmem>>, %arg4: memref<32x8xf32, #tpu.memory_space<vmem>>, %arg5: memref<8x32xbf16, #tpu.memory_space<vmem>>, %arg6: memref<8x8xf32, #tpu.memory_space<vmem>>, %arg7: memref<8x8xbf16, #tpu.memory_space<vmem>>, %arg8: memref<1x8xf32, #tpu.memory_space<vmem>>, %arg9: memref<32x8xbf16, #tpu.memory_space<vmem>>, %arg10: memref<32x4xbf16, #tpu.memory_space<vmem>>, %arg11: memref<4x8xbf16, #tpu.memory_space<vmem>>, %arg12: memref<32x8xf32, #tpu.memory_space<vmem>>, %arg13: memref<16x16xbf16, #tpu.memory_space<vmem>>, %arg14: memref<16x16xbf16, #tpu.memory_space<vmem>>, %arg15: memref<3x16x16xbf16, #tpu.memory_space<vmem>>, %arg16: memref<3x32x256xbf16, #tpu.memory_space<vmem>>, %arg17: memref<288x128xbf16, #tpu.memory_space<vmem>>, %arg18: memref<1x128xf32, #tpu.memory_space<vmem>>, %arg19: memref<128x128xbf16, #tpu.memory_space<vmem>>, %arg20: memref<1x128xf32, #tpu.memory_space<vmem>>, %arg21: memref<1x128xf32, #tpu.memory_space<vmem>>, %arg22: memref<1x16xf32, #tpu.memory_space<vmem>>, %arg23: memref<128x16xbf16, #tpu.memory_space<vmem>>, %arg24: memref<128x4xf32, #tpu.memory_space<vmem>>, %arg25: memref<4x128xbf16, #tpu.memory_space<vmem>>, %arg26: memref<4x4xf32, #tpu.memory_space<vmem>>, %arg27: memref<4x4xbf16, #tpu.memory_space<vmem>>, %arg28: memref<1x4xf32, #tpu.memory_space<vmem>>, %arg29: memref<128x4xbf16, #tpu.memory_space<vmem>>, %arg30: memref<128x32xbf16, #tpu.memory_space<vmem>>, %arg31: memref<32x4xbf16, #tpu.memory_space<vmem>>, %arg32: memref<128x4xf32, #tpu.memory_space<vmem>>, %arg33: memref<16x16xbf16, #tpu.memory_space<vmem>>, %arg34: memref<16x16xbf16, #tpu.memory_space<vmem>>, %arg35: memref<3x16x16xbf16, #tpu.memory_space<vmem>>, %arg36: memref<3x128x128xbf16, #tpu.memory_space<vmem>>, %arg37: memref<256x128xbf16, #tpu.memory_space<vmem>>, %arg38: memref<1x128xf32, #tpu.memory_space<vmem>>, %arg39: memref<128x128xbf16, #tpu.memory_space<vmem>>, %arg40: memref<1x128xf32, #tpu.memory_space<vmem>>, %arg41: memref<1x128xf32, #tpu.memory_space<vmem>>, %arg42: memref<128x4xbf16, #tpu.memory_space<vmem>>, %arg43: memref<1x4xf32, #tpu.memory_space<vmem>>, %arg44: memref<2x16x4xf32, #tpu.memory_space<vmem>>) attributes {dimension_semantics = [#tpu.dimension_semantics<parallel>], iteration_bounds = array<i64: 2>, scalar_prefetch = 0 : i64, scratch_operands = 0 : i64, tpu.core_type = #tpu.core_type<tc>, window_params = [{transform_indices = @transform_0, window_bounds = array<i64: 2, 16, 32>}, {pipeline_mode = #tpu.pipeline_mode<synchronous>, transform_indices = @transform_1, window_bounds = array<i64: 1, 16>}, {pipeline_mode = #tpu.pipeline_mode<synchronous>, transform_indices = @transform_2, window_bounds = array<i64: 32, 16>}, {pipeline_mode = #tpu.pipeline_mode<synchronous>, transform_indices = @transform_3, window_bounds = array<i64: 32, 8>}, {pipeline_mode = #tpu.pipeline_mode<synchronous>, transform_indices = @transform_4, window_bounds = array<i64: 8, 32>}, {pipeline_mode = #tpu.pipeline_mode<synchronous>, transform_indices = @transform_5, window_bounds = array<i64: 8, 8>}, {pipeline_mode = #tpu.pipeline_mode<synchronous>, transform_indices = @transform_6, window_bounds = array<i64: 8, 8>}, {pipeline_mode = #tpu.pipeline_mode<synchronous>, transform_indices = @transform_7, window_bounds = array<i64: 1, 8>}, {pipeline_mode = #tpu.pipeline_mode<synchronous>, transform_indices = @transform_8, window_bounds = array<i64: 32, 8>}, {pipeline_mode = #tpu.pipeline_mode<synchronous>, transform_indices = @transform_9, window_bounds = array<i64: 32, 4>}, {pipeline_mode = #tpu.pipeline_mode<synchronous>, transform_indices = @transform_10, window_bounds = array<i64: 4, 8>}, {pipeline_mode = #tpu.pipeline_mode<synchronous>, transform_indices = @transform_11, window_bounds = array<i64: 32, 8>}, {pipeline_mode = #tpu.pipeline_mode<synchronous>, transform_indices = @transform_12, window_bounds = array<i64: 16, 16>}, {pipeline_mode = #tpu.pipeline_mode<synchronous>, transform_indices = @transform_13, window_bounds = array<i64: 16, 16>}, {pipeline_mode = #tpu.pipeline_mode<synchronous>, transform_indices = @transform_14, window_bounds = array<i64: 3, 16, 16>}, {pipeline_mode = #tpu.pipeline_mode<synchronous>, transform_indices = @transform_15, window_bounds = array<i64: 3, 32, 256>}, {pipeline_mode = #tpu.pipeline_mode<synchronous>, transform_indices = @transform_16, window_bounds = array<i64: 288, 128>}, {pipeline_mode = #tpu.pipeline_mode<synchronous>, transform_indices = @transform_17, window_bounds = array<i64: 1, 128>}, {pipeline_mode = #tpu.pipeline_mode<synchronous>, transform_indices = @transform_18, window_bounds = array<i64: 128, 128>}, {pipeline_mode = #tpu.pipeline_mode<synchronous>, transform_indices = @transform_19, window_bounds = array<i64: 1, 128>}, {pipeline_mode = #tpu.pipeline_mode<synchronous>, transform_indices = @transform_20, window_bounds = array<i64: 1, 128>}, {pipeline_mode = #tpu.pipeline_mode<synchronous>, transform_indices = @transform_21, window_bounds = array<i64: 1, 16>}, {pipeline_mode = #tpu.pipeline_mode<synchronous>, transform_indices = @transform_22, window_bounds = array<i64: 128, 16>}, {pipeline_mode = #tpu.pipeline_mode<synchronous>, transform_indices = @transform_23, window_bounds = array<i64: 128, 4>}, {pipeline_mode = #tpu.pipeline_mode<synchronous>, transform_indices = @transform_24, window_bounds = array<i64: 4, 128>}, {pipeline_mode = #tpu.pipeline_mode<synchronous>, transform_indices = @transform_25, window_bounds = array<i64: 4, 4>}, {pipeline_mode = #tpu.pipeline_mode<synchronous>, transform_indices = @transform_26, window_bounds = array<i64: 4, 4>}, {pipeline_mode = #tpu.pipeline_mode<synchronous>, transform_indices = @transform_27, window_bounds = array<i64: 1, 4>}, {pipeline_mode = #tpu.pipeline_mode<synchronous>, transform_indices = @transform_28, window_bounds = array<i64: 128, 4>}, {pipeline_mode = #tpu.pipeline_mode<synchronous>, transform_indices = @transform_29, window_bounds = array<i64: 128, 32>}, {pipeline_mode = #tpu.pipeline_mode<synchronous>, transform_indices = @transform_30, window_bounds = array<i64: 32, 4>}, {pipeline_mode = #tpu.pipeline_mode<synchronous>, transform_indices = @transform_31, window_bounds = array<i64: 128, 4>}, {pipeline_mode = #tpu.pipeline_mode<synchronous>, transform_indices = @transform_32, window_bounds = array<i64: 16, 16>}, {pipeline_mode = #tpu.pipeline_mode<synchronous>, transform_indices = @transform_33, window_bounds = array<i64: 16, 16>}, {pipeline_mode = #tpu.pipeline_mode<synchronous>, transform_indices = @transform_34, window_bounds = array<i64: 3, 16, 16>}, {pipeline_mode = #tpu.pipeline_mode<synchronous>, transform_indices = @transform_35, window_bounds = array<i64: 3, 128, 128>}, {pipeline_mode = #tpu.pipeline_mode<synchronous>, transform_indices = @transform_36, window_bounds = array<i64: 256, 128>}, {pipeline_mode = #tpu.pipeline_mode<synchronous>, transform_indices = @transform_37, window_bounds = array<i64: 1, 128>}, {pipeline_mode = #tpu.pipeline_mode<synchronous>, transform_indices = @transform_38, window_bounds = array<i64: 128, 128>}, {pipeline_mode = #tpu.pipeline_mode<synchronous>, transform_indices = @transform_39, window_bounds = array<i64: 1, 128>}, {pipeline_mode = #tpu.pipeline_mode<synchronous>, transform_indices = @transform_40, window_bounds = array<i64: 1, 128>}, {pipeline_mode = #tpu.pipeline_mode<synchronous>, transform_indices = @transform_41, window_bounds = array<i64: 128, 4>}, {pipeline_mode = #tpu.pipeline_mode<synchronous>, transform_indices = @transform_42, window_bounds = array<i64: 1, 4>}, {transform_indices = @transform_43, window_bounds = array<i64: 2, 16, 4>}]} {
    %c0 = arith.constant 0 : index
    %c0_0 = arith.constant 0 : index
    %c0_1 = arith.constant 0 : index
    %0 = vector.load %arg1[%c0, %c0_0, %c0_1] : memref<2x16x32xbf16, #tpu.memory_space<vmem>>, vector<1x16x32xbf16>
    %1 = vector.shape_cast %0 : vector<1x16x32xbf16> to vector<16x32xbf16>
    %2 = arith.extf %1 : vector<16x32xbf16> to vector<16x32xf32>
    %c1 = arith.constant 1 : index
    %c0_2 = arith.constant 0 : index
    %c0_3 = arith.constant 0 : index
    %3 = vector.load %arg1[%c1, %c0_2, %c0_3] : memref<2x16x32xbf16, #tpu.memory_space<vmem>>, vector<1x16x32xbf16>
    %4 = vector.shape_cast %3 : vector<1x16x32xbf16> to vector<16x32xbf16>
    %5 = arith.extf %4 : vector<16x32xbf16> to vector<16x32xf32>
    %6 = tpu.concatenate %2, %5 in 0 : vector<16x32xf32>, vector<16x32xf32> -> vector<32x32xf32>
    %7 = vector.extract_strided_slice %6 {offsets = [0, 0], sizes = [16, 32], strides = [1, 1]} : vector<32x32xf32> to vector<16x32xf32>
    %c0_4 = arith.constant 0 : index
    %c0_5 = arith.constant 0 : index
    %8 = vector.load %arg2[%c0_4, %c0_5] : memref<1x16xf32, #tpu.memory_space<vmem>>, vector<1x16xf32>
    %cst = arith.constant dense<0.000000e+00> : vector<1x32xf32>
    %9 = tpu.matmul %8, %7, %cst {dimension_numbers = #tpu.dot_dimension_numbers<[1], [0], [0], [1], [0, 0, 1, 1], [], []>} : vector<1x16xf32>, vector<16x32xf32>, vector<1x32xf32> -> vector<1x32xf32>
    %c0_6 = arith.constant 0 : index
    %c0_7 = arith.constant 0 : index
    %10 = vector.load %arg5[%c0_6, %c0_7] : memref<8x32xbf16, #tpu.memory_space<vmem>>, vector<8x32xbf16>
    %11 = arith.extf %10 : vector<8x32xbf16> to vector<8x32xf32>
    %12 = vector.broadcast %9 : vector<1x32xf32> to vector<8x32xf32>
    %13 = arith.mulf %11, %12 : vector<8x32xf32>
    %c0_8 = arith.constant 0 : index
    %c0_9 = arith.constant 0 : index
    %14 = vector.load %arg3[%c0_8, %c0_9] : memref<32x16xbf16, #tpu.memory_space<vmem>>, vector<32x16xbf16>
    %cst_10 = arith.constant dense<0.000000e+00> : vector<8x16xf32>
    %15 = tpu.matmul %13, %14, %cst_10 {dimension_numbers = #tpu.dot_dimension_numbers<[1], [0], [0], [1], [0, 0, 1, 1], [], []>} : vector<8x32xf32>, vector<32x16xbf16>, vector<8x16xf32> -> vector<8x16xf32>
    %c0_11 = arith.constant 0 : index
    %c0_12 = arith.constant 0 : index
    %16 = vector.load %arg4[%c0_11, %c0_12] : memref<32x8xf32, #tpu.memory_space<vmem>>, vector<32x8xf32>
    %cst_13 = arith.constant dense<0.000000e+00> : vector<16x8xf32>
    %17 = tpu.matmul %7, %16, %cst_13 {dimension_numbers = #tpu.dot_dimension_numbers<[1], [0], [0], [1], [0, 0, 1, 1], [], []>} : vector<16x32xf32>, vector<32x8xf32>, vector<16x8xf32> -> vector<16x8xf32>
    %cst_14 = arith.constant dense<0.000000e+00> : vector<8x8xf32>
    %18 = tpu.matmul %15, %17, %cst_14 {dimension_numbers = #tpu.dot_dimension_numbers<[1], [0], [0], [1], [0, 0, 1, 1], [], []>} : vector<8x16xf32>, vector<16x8xf32>, vector<8x8xf32> -> vector<8x8xf32>
    %c0_15 = arith.constant 0 : index
    %c0_16 = arith.constant 0 : index
    %19 = vector.load %arg7[%c0_15, %c0_16] : memref<8x8xbf16, #tpu.memory_space<vmem>>, vector<8x8xbf16>
    %c0_17 = arith.constant 0 : index
    %c0_18 = arith.constant 0 : index
    %20 = vector.load %arg6[%c0_17, %c0_18] : memref<8x8xf32, #tpu.memory_space<vmem>>, vector<8x8xf32>
    %21 = arith.addf %18, %20 : vector<8x8xf32>
    %22 = arith.negf %21 : vector<8x8xf32>
    %23 = math.exp %22 : vector<8x8xf32>
    %cst_19 = arith.constant 1.000000e+00 : f32
    %24 = vector.broadcast %cst_19 : f32 to vector<8x8xf32>
    %25 = arith.addf %24, %23 : vector<8x8xf32>
    %26 = arith.divf %24, %25 : vector<8x8xf32>
    %cst_20 = arith.constant dense<0.000000e+00> : vector<8x8xf32>
    %27 = tpu.matmul %19, %26, %cst_20 {dimension_numbers = #tpu.dot_dimension_numbers<[1], [0], [0], [1], [0, 0, 1, 1], [], []>} : vector<8x8xbf16>, vector<8x8xf32>, vector<8x8xf32> -> vector<8x8xf32>
    %cst_21 = arith.constant dense<0xFF800000> : vector<8xf32>
    %28 = vector.multi_reduction <maximumf>, %27, %cst_21 [0] : vector<8x8xf32> to vector<8xf32>
    %29 = vector.shape_cast %28 : vector<8xf32> to vector<1x8xf32>
    %30 = vector.broadcast %29 : vector<1x8xf32> to vector<8x8xf32>
    %31 = arith.subf %27, %30 : vector<8x8xf32>
    %32 = math.exp %31 : vector<8x8xf32>
    %cst_22 = arith.constant dense<0.000000e+00> : vector<8xf32>
    %33 = vector.multi_reduction <add>, %32, %cst_22 [0] : vector<8x8xf32> to vector<8xf32>
    %34 = vector.shape_cast %33 : vector<8xf32> to vector<1x8xf32>
    %35 = tpu.reciprocal %34 {approx = true} : vector<1x8xf32> -> vector<1x8xf32>
    %36 = vector.broadcast %35 : vector<1x8xf32> to vector<8x8xf32>
    %37 = arith.mulf %32, %36 : vector<8x8xf32>
    %c0_23 = arith.constant 0 : index
    %c0_24 = arith.constant 0 : index
    %38 = vector.load %arg8[%c0_23, %c0_24] : memref<1x8xf32, #tpu.memory_space<vmem>>, vector<1x8xf32>
    %39 = vector.broadcast %38 : vector<1x8xf32> to vector<8x8xf32>
    %40 = arith.mulf %37, %39 : vector<8x8xf32>
    %cst_25 = arith.constant dense<0.000000e+00> : vector<8xf32>
    %41 = vector.multi_reduction <add>, %40, %cst_25 [1] : vector<8x8xf32> to vector<8xf32>
    %42 = vector.shape_cast %41 : vector<8xf32> to vector<8x1xf32>
    %c0_26 = arith.constant 0 : index
    %c0_27 = arith.constant 0 : index
    %43 = vector.load %arg9[%c0_26, %c0_27] : memref<32x8xbf16, #tpu.memory_space<vmem>>, vector<32x8xbf16>
    %cst_28 = arith.constant dense<0.000000e+00> : vector<32x1xf32>
    %44 = tpu.matmul %43, %42, %cst_28 {dimension_numbers = #tpu.dot_dimension_numbers<[1], [0], [0], [1], [0, 0, 1, 1], [], []>} : vector<32x8xbf16>, vector<8x1xf32>, vector<32x1xf32> -> vector<32x1xf32>
    %c0_29 = arith.constant 0 : index
    %c0_30 = arith.constant 0 : index
    %45 = vector.load %arg10[%c0_29, %c0_30] : memref<32x4xbf16, #tpu.memory_space<vmem>>, vector<32x4xbf16>
    %46 = arith.extf %45 : vector<32x4xbf16> to vector<32x4xf32>
    %47 = vector.broadcast %44 : vector<32x1xf32> to vector<32x4xf32>
    %48 = arith.mulf %46, %47 : vector<32x4xf32>
    %cst_31 = arith.constant dense<0.000000e+00> : vector<16x4xf32>
    %49 = tpu.matmul %7, %48, %cst_31 {dimension_numbers = #tpu.dot_dimension_numbers<[1], [0], [0], [1], [0, 0, 1, 1], [], []>} : vector<16x32xf32>, vector<32x4xf32>, vector<16x4xf32> -> vector<16x4xf32>
    %c0_32 = arith.constant 0 : index
    %c0_33 = arith.constant 0 : index
    %50 = vector.load %arg11[%c0_32, %c0_33] : memref<4x8xbf16, #tpu.memory_space<vmem>>, vector<4x8xbf16>
    %cst_34 = arith.constant dense<0.000000e+00> : vector<16x8xf32>
    %51 = tpu.matmul %49, %50, %cst_34 {dimension_numbers = #tpu.dot_dimension_numbers<[1], [0], [0], [1], [0, 0, 1, 1], [], []>} : vector<16x4xf32>, vector<4x8xbf16>, vector<16x8xf32> -> vector<16x8xf32>
    %c0_35 = arith.constant 0 : index
    %c0_36 = arith.constant 0 : index
    %52 = vector.load %arg12[%c0_35, %c0_36] : memref<32x8xf32, #tpu.memory_space<vmem>>, vector<32x8xf32>
    %cst_37 = arith.constant dense<0.000000e+00> : vector<16x8xf32>
    %53 = tpu.matmul %7, %52, %cst_37 {dimension_numbers = #tpu.dot_dimension_numbers<[1], [0], [0], [1], [0, 0, 1, 1], [], []>} : vector<16x32xf32>, vector<32x8xf32>, vector<16x8xf32> -> vector<16x8xf32>
    %cst_38 = arith.constant dense<0.000000e+00> : vector<16x8xf32>
    %54 = tpu.matmul %53, %37, %cst_38 {dimension_numbers = #tpu.dot_dimension_numbers<[1], [0], [0], [1], [0, 0, 1, 1], [], []>} : vector<16x8xf32>, vector<8x8xf32>, vector<16x8xf32> -> vector<16x8xf32>
    %cst_39 = arith.constant dense<0.000000e+00> : vector<16x16xf32>
    %55 = tpu.matmul %54, %51, %cst_39 {dimension_numbers = #tpu.dot_dimension_numbers<[1], [1], [0], [0], [0, 0, 1, 0], [], []>} : vector<16x8xf32>, vector<16x8xf32>, vector<16x16xf32> -> vector<16x16xf32>
    %c0_40 = arith.constant 0 : index
    %c0_41 = arith.constant 0 : index
    %56 = vector.load %arg13[%c0_40, %c0_41] : memref<16x16xbf16, #tpu.memory_space<vmem>>, vector<16x16xbf16>
    %57 = arith.extf %56 : vector<16x16xbf16> to vector<16x16xf32>
    %58 = arith.addf %55, %57 : vector<16x16xf32>
    %59 = arith.negf %58 : vector<16x16xf32>
    %60 = math.exp %59 : vector<16x16xf32>
    %cst_42 = arith.constant 1.000000e+00 : f32
    %61 = vector.broadcast %cst_42 : f32 to vector<16x16xf32>
    %62 = arith.addf %61, %60 : vector<16x16xf32>
    %63 = arith.divf %61, %62 : vector<16x16xf32>
    %c0_43 = arith.constant 0 : index
    %c0_44 = arith.constant 0 : index
    %64 = vector.load %arg14[%c0_43, %c0_44] : memref<16x16xbf16, #tpu.memory_space<vmem>>, vector<16x16xbf16>
    %cst_45 = arith.constant dense<0.000000e+00> : vector<16x16xf32>
    %65 = tpu.matmul %63, %64, %cst_45 {dimension_numbers = #tpu.dot_dimension_numbers<[1], [0], [0], [1], [0, 0, 1, 1], [], []>} : vector<16x16xf32>, vector<16x16xbf16>, vector<16x16xf32> -> vector<16x16xf32>
    %cst_46 = arith.constant dense<0xFF800000> : vector<16xf32>
    %66 = vector.multi_reduction <maximumf>, %65, %cst_46 [1] : vector<16x16xf32> to vector<16xf32>
    %67 = vector.shape_cast %66 : vector<16xf32> to vector<16x1xf32>
    %68 = vector.broadcast %67 : vector<16x1xf32> to vector<16x16xf32>
    %69 = arith.subf %65, %68 : vector<16x16xf32>
    %70 = math.exp %69 : vector<16x16xf32>
    %cst_47 = arith.constant dense<0.000000e+00> : vector<16xf32>
    %71 = vector.multi_reduction <add>, %70, %cst_47 [1] : vector<16x16xf32> to vector<16xf32>
    %72 = vector.shape_cast %71 : vector<16xf32> to vector<16x1xf32>
    %73 = tpu.reciprocal %72 {approx = true} : vector<16x1xf32> -> vector<16x1xf32>
    %74 = vector.broadcast %73 : vector<16x1xf32> to vector<16x16xf32>
    %75 = arith.mulf %70, %74 : vector<16x16xf32>
    %c0_48 = arith.constant 0 : index
    %c0_49 = arith.constant 0 : index
    %c0_50 = arith.constant 0 : index
    %76 = vector.load %arg15[%c0_48, %c0_49, %c0_50] : memref<3x16x16xbf16, #tpu.memory_space<vmem>>, vector<1x16x16xbf16>
    %77 = vector.shape_cast %76 : vector<1x16x16xbf16> to vector<16x16xbf16>
    %78 = arith.extf %77 : vector<16x16xbf16> to vector<16x16xf32>
    %79 = arith.mulf %78, %75 : vector<16x16xf32>
    %cst_51 = arith.constant dense<0.000000e+00> : vector<16x32xf32>
    %80 = tpu.matmul %79, %7, %cst_51 {dimension_numbers = #tpu.dot_dimension_numbers<[1], [0], [0], [1], [0, 0, 1, 1], [], []>} : vector<16x16xf32>, vector<16x32xf32>, vector<16x32xf32> -> vector<16x32xf32>
    %c1_52 = arith.constant 1 : index
    %c0_53 = arith.constant 0 : index
    %c0_54 = arith.constant 0 : index
    %81 = vector.load %arg15[%c1_52, %c0_53, %c0_54] : memref<3x16x16xbf16, #tpu.memory_space<vmem>>, vector<1x16x16xbf16>
    %82 = vector.shape_cast %81 : vector<1x16x16xbf16> to vector<16x16xbf16>
    %83 = arith.extf %82 : vector<16x16xbf16> to vector<16x16xf32>
    %84 = arith.mulf %83, %75 : vector<16x16xf32>
    %cst_55 = arith.constant dense<0.000000e+00> : vector<16x32xf32>
    %85 = tpu.matmul %84, %7, %cst_55 {dimension_numbers = #tpu.dot_dimension_numbers<[1], [0], [0], [1], [0, 0, 1, 1], [], []>} : vector<16x16xf32>, vector<16x32xf32>, vector<16x32xf32> -> vector<16x32xf32>
    %c2 = arith.constant 2 : index
    %c0_56 = arith.constant 0 : index
    %c0_57 = arith.constant 0 : index
    %86 = vector.load %arg15[%c2, %c0_56, %c0_57] : memref<3x16x16xbf16, #tpu.memory_space<vmem>>, vector<1x16x16xbf16>
    %87 = vector.shape_cast %86 : vector<1x16x16xbf16> to vector<16x16xbf16>
    %88 = arith.extf %87 : vector<16x16xbf16> to vector<16x16xf32>
    %89 = arith.mulf %88, %75 : vector<16x16xf32>
    %cst_58 = arith.constant dense<0.000000e+00> : vector<16x32xf32>
    %90 = tpu.matmul %89, %7, %cst_58 {dimension_numbers = #tpu.dot_dimension_numbers<[1], [0], [0], [1], [0, 0, 1, 1], [], []>} : vector<16x16xf32>, vector<16x32xf32>, vector<16x32xf32> -> vector<16x32xf32>
    %91 = vector.extract_strided_slice %6 {offsets = [16, 0], sizes = [16, 32], strides = [1, 1]} : vector<32x32xf32> to vector<16x32xf32>
    %c0_59 = arith.constant 0 : index
    %c0_60 = arith.constant 0 : index
    %92 = vector.load %arg2[%c0_59, %c0_60] : memref<1x16xf32, #tpu.memory_space<vmem>>, vector<1x16xf32>
    %cst_61 = arith.constant dense<0.000000e+00> : vector<1x32xf32>
    %93 = tpu.matmul %92, %91, %cst_61 {dimension_numbers = #tpu.dot_dimension_numbers<[1], [0], [0], [1], [0, 0, 1, 1], [], []>} : vector<1x16xf32>, vector<16x32xf32>, vector<1x32xf32> -> vector<1x32xf32>
    %c0_62 = arith.constant 0 : index
    %c0_63 = arith.constant 0 : index
    %94 = vector.load %arg5[%c0_62, %c0_63] : memref<8x32xbf16, #tpu.memory_space<vmem>>, vector<8x32xbf16>
    %95 = arith.extf %94 : vector<8x32xbf16> to vector<8x32xf32>
    %96 = vector.broadcast %93 : vector<1x32xf32> to vector<8x32xf32>
    %97 = arith.mulf %95, %96 : vector<8x32xf32>
    %c0_64 = arith.constant 0 : index
    %c0_65 = arith.constant 0 : index
    %98 = vector.load %arg3[%c0_64, %c0_65] : memref<32x16xbf16, #tpu.memory_space<vmem>>, vector<32x16xbf16>
    %cst_66 = arith.constant dense<0.000000e+00> : vector<8x16xf32>
    %99 = tpu.matmul %97, %98, %cst_66 {dimension_numbers = #tpu.dot_dimension_numbers<[1], [0], [0], [1], [0, 0, 1, 1], [], []>} : vector<8x32xf32>, vector<32x16xbf16>, vector<8x16xf32> -> vector<8x16xf32>
    %c0_67 = arith.constant 0 : index
    %c0_68 = arith.constant 0 : index
    %100 = vector.load %arg4[%c0_67, %c0_68] : memref<32x8xf32, #tpu.memory_space<vmem>>, vector<32x8xf32>
    %cst_69 = arith.constant dense<0.000000e+00> : vector<16x8xf32>
    %101 = tpu.matmul %91, %100, %cst_69 {dimension_numbers = #tpu.dot_dimension_numbers<[1], [0], [0], [1], [0, 0, 1, 1], [], []>} : vector<16x32xf32>, vector<32x8xf32>, vector<16x8xf32> -> vector<16x8xf32>
    %cst_70 = arith.constant dense<0.000000e+00> : vector<8x8xf32>
    %102 = tpu.matmul %99, %101, %cst_70 {dimension_numbers = #tpu.dot_dimension_numbers<[1], [0], [0], [1], [0, 0, 1, 1], [], []>} : vector<8x16xf32>, vector<16x8xf32>, vector<8x8xf32> -> vector<8x8xf32>
    %c0_71 = arith.constant 0 : index
    %c0_72 = arith.constant 0 : index
    %103 = vector.load %arg7[%c0_71, %c0_72] : memref<8x8xbf16, #tpu.memory_space<vmem>>, vector<8x8xbf16>
    %c0_73 = arith.constant 0 : index
    %c0_74 = arith.constant 0 : index
    %104 = vector.load %arg6[%c0_73, %c0_74] : memref<8x8xf32, #tpu.memory_space<vmem>>, vector<8x8xf32>
    %105 = arith.addf %102, %104 : vector<8x8xf32>
    %106 = arith.negf %105 : vector<8x8xf32>
    %107 = math.exp %106 : vector<8x8xf32>
    %cst_75 = arith.constant 1.000000e+00 : f32
    %108 = vector.broadcast %cst_75 : f32 to vector<8x8xf32>
    %109 = arith.addf %108, %107 : vector<8x8xf32>
    %110 = arith.divf %108, %109 : vector<8x8xf32>
    %cst_76 = arith.constant dense<0.000000e+00> : vector<8x8xf32>
    %111 = tpu.matmul %103, %110, %cst_76 {dimension_numbers = #tpu.dot_dimension_numbers<[1], [0], [0], [1], [0, 0, 1, 1], [], []>} : vector<8x8xbf16>, vector<8x8xf32>, vector<8x8xf32> -> vector<8x8xf32>
    %cst_77 = arith.constant dense<0xFF800000> : vector<8xf32>
    %112 = vector.multi_reduction <maximumf>, %111, %cst_77 [0] : vector<8x8xf32> to vector<8xf32>
    %113 = vector.shape_cast %112 : vector<8xf32> to vector<1x8xf32>
    %114 = vector.broadcast %113 : vector<1x8xf32> to vector<8x8xf32>
    %115 = arith.subf %111, %114 : vector<8x8xf32>
    %116 = math.exp %115 : vector<8x8xf32>
    %cst_78 = arith.constant dense<0.000000e+00> : vector<8xf32>
    %117 = vector.multi_reduction <add>, %116, %cst_78 [0] : vector<8x8xf32> to vector<8xf32>
    %118 = vector.shape_cast %117 : vector<8xf32> to vector<1x8xf32>
    %119 = tpu.reciprocal %118 {approx = true} : vector<1x8xf32> -> vector<1x8xf32>
    %120 = vector.broadcast %119 : vector<1x8xf32> to vector<8x8xf32>
    %121 = arith.mulf %116, %120 : vector<8x8xf32>
    %c0_79 = arith.constant 0 : index
    %c0_80 = arith.constant 0 : index
    %122 = vector.load %arg8[%c0_79, %c0_80] : memref<1x8xf32, #tpu.memory_space<vmem>>, vector<1x8xf32>
    %123 = vector.broadcast %122 : vector<1x8xf32> to vector<8x8xf32>
    %124 = arith.mulf %121, %123 : vector<8x8xf32>
    %cst_81 = arith.constant dense<0.000000e+00> : vector<8xf32>
    %125 = vector.multi_reduction <add>, %124, %cst_81 [1] : vector<8x8xf32> to vector<8xf32>
    %126 = vector.shape_cast %125 : vector<8xf32> to vector<8x1xf32>
    %c0_82 = arith.constant 0 : index
    %c0_83 = arith.constant 0 : index
    %127 = vector.load %arg9[%c0_82, %c0_83] : memref<32x8xbf16, #tpu.memory_space<vmem>>, vector<32x8xbf16>
    %cst_84 = arith.constant dense<0.000000e+00> : vector<32x1xf32>
    %128 = tpu.matmul %127, %126, %cst_84 {dimension_numbers = #tpu.dot_dimension_numbers<[1], [0], [0], [1], [0, 0, 1, 1], [], []>} : vector<32x8xbf16>, vector<8x1xf32>, vector<32x1xf32> -> vector<32x1xf32>
    %c0_85 = arith.constant 0 : index
    %c0_86 = arith.constant 0 : index
    %129 = vector.load %arg10[%c0_85, %c0_86] : memref<32x4xbf16, #tpu.memory_space<vmem>>, vector<32x4xbf16>
    %130 = arith.extf %129 : vector<32x4xbf16> to vector<32x4xf32>
    %131 = vector.broadcast %128 : vector<32x1xf32> to vector<32x4xf32>
    %132 = arith.mulf %130, %131 : vector<32x4xf32>
    %cst_87 = arith.constant dense<0.000000e+00> : vector<16x4xf32>
    %133 = tpu.matmul %91, %132, %cst_87 {dimension_numbers = #tpu.dot_dimension_numbers<[1], [0], [0], [1], [0, 0, 1, 1], [], []>} : vector<16x32xf32>, vector<32x4xf32>, vector<16x4xf32> -> vector<16x4xf32>
    %c0_88 = arith.constant 0 : index
    %c0_89 = arith.constant 0 : index
    %134 = vector.load %arg11[%c0_88, %c0_89] : memref<4x8xbf16, #tpu.memory_space<vmem>>, vector<4x8xbf16>
    %cst_90 = arith.constant dense<0.000000e+00> : vector<16x8xf32>
    %135 = tpu.matmul %133, %134, %cst_90 {dimension_numbers = #tpu.dot_dimension_numbers<[1], [0], [0], [1], [0, 0, 1, 1], [], []>} : vector<16x4xf32>, vector<4x8xbf16>, vector<16x8xf32> -> vector<16x8xf32>
    %c0_91 = arith.constant 0 : index
    %c0_92 = arith.constant 0 : index
    %136 = vector.load %arg12[%c0_91, %c0_92] : memref<32x8xf32, #tpu.memory_space<vmem>>, vector<32x8xf32>
    %cst_93 = arith.constant dense<0.000000e+00> : vector<16x8xf32>
    %137 = tpu.matmul %91, %136, %cst_93 {dimension_numbers = #tpu.dot_dimension_numbers<[1], [0], [0], [1], [0, 0, 1, 1], [], []>} : vector<16x32xf32>, vector<32x8xf32>, vector<16x8xf32> -> vector<16x8xf32>
    %cst_94 = arith.constant dense<0.000000e+00> : vector<16x8xf32>
    %138 = tpu.matmul %137, %121, %cst_94 {dimension_numbers = #tpu.dot_dimension_numbers<[1], [0], [0], [1], [0, 0, 1, 1], [], []>} : vector<16x8xf32>, vector<8x8xf32>, vector<16x8xf32> -> vector<16x8xf32>
    %cst_95 = arith.constant dense<0.000000e+00> : vector<16x16xf32>
    %139 = tpu.matmul %138, %135, %cst_95 {dimension_numbers = #tpu.dot_dimension_numbers<[1], [1], [0], [0], [0, 0, 1, 0], [], []>} : vector<16x8xf32>, vector<16x8xf32>, vector<16x16xf32> -> vector<16x16xf32>
    %c0_96 = arith.constant 0 : index
    %c0_97 = arith.constant 0 : index
    %140 = vector.load %arg13[%c0_96, %c0_97] : memref<16x16xbf16, #tpu.memory_space<vmem>>, vector<16x16xbf16>
    %141 = arith.extf %140 : vector<16x16xbf16> to vector<16x16xf32>
    %142 = arith.addf %139, %141 : vector<16x16xf32>
    %143 = arith.negf %142 : vector<16x16xf32>
    %144 = math.exp %143 : vector<16x16xf32>
    %cst_98 = arith.constant 1.000000e+00 : f32
    %145 = vector.broadcast %cst_98 : f32 to vector<16x16xf32>
    %146 = arith.addf %145, %144 : vector<16x16xf32>
    %147 = arith.divf %145, %146 : vector<16x16xf32>
    %c0_99 = arith.constant 0 : index
    %c0_100 = arith.constant 0 : index
    %148 = vector.load %arg14[%c0_99, %c0_100] : memref<16x16xbf16, #tpu.memory_space<vmem>>, vector<16x16xbf16>
    %cst_101 = arith.constant dense<0.000000e+00> : vector<16x16xf32>
    %149 = tpu.matmul %147, %148, %cst_101 {dimension_numbers = #tpu.dot_dimension_numbers<[1], [0], [0], [1], [0, 0, 1, 1], [], []>} : vector<16x16xf32>, vector<16x16xbf16>, vector<16x16xf32> -> vector<16x16xf32>
    %cst_102 = arith.constant dense<0xFF800000> : vector<16xf32>
    %150 = vector.multi_reduction <maximumf>, %149, %cst_102 [1] : vector<16x16xf32> to vector<16xf32>
    %151 = vector.shape_cast %150 : vector<16xf32> to vector<16x1xf32>
    %152 = vector.broadcast %151 : vector<16x1xf32> to vector<16x16xf32>
    %153 = arith.subf %149, %152 : vector<16x16xf32>
    %154 = math.exp %153 : vector<16x16xf32>
    %cst_103 = arith.constant dense<0.000000e+00> : vector<16xf32>
    %155 = vector.multi_reduction <add>, %154, %cst_103 [1] : vector<16x16xf32> to vector<16xf32>
    %156 = vector.shape_cast %155 : vector<16xf32> to vector<16x1xf32>
    %157 = tpu.reciprocal %156 {approx = true} : vector<16x1xf32> -> vector<16x1xf32>
    %158 = vector.broadcast %157 : vector<16x1xf32> to vector<16x16xf32>
    %159 = arith.mulf %154, %158 : vector<16x16xf32>
    %c0_104 = arith.constant 0 : index
    %c0_105 = arith.constant 0 : index
    %c0_106 = arith.constant 0 : index
    %160 = vector.load %arg15[%c0_104, %c0_105, %c0_106] : memref<3x16x16xbf16, #tpu.memory_space<vmem>>, vector<1x16x16xbf16>
    %161 = vector.shape_cast %160 : vector<1x16x16xbf16> to vector<16x16xbf16>
    %162 = arith.extf %161 : vector<16x16xbf16> to vector<16x16xf32>
    %163 = arith.mulf %162, %159 : vector<16x16xf32>
    %cst_107 = arith.constant dense<0.000000e+00> : vector<16x32xf32>
    %164 = tpu.matmul %163, %91, %cst_107 {dimension_numbers = #tpu.dot_dimension_numbers<[1], [0], [0], [1], [0, 0, 1, 1], [], []>} : vector<16x16xf32>, vector<16x32xf32>, vector<16x32xf32> -> vector<16x32xf32>
    %c1_108 = arith.constant 1 : index
    %c0_109 = arith.constant 0 : index
    %c0_110 = arith.constant 0 : index
    %165 = vector.load %arg15[%c1_108, %c0_109, %c0_110] : memref<3x16x16xbf16, #tpu.memory_space<vmem>>, vector<1x16x16xbf16>
    %166 = vector.shape_cast %165 : vector<1x16x16xbf16> to vector<16x16xbf16>
    %167 = arith.extf %166 : vector<16x16xbf16> to vector<16x16xf32>
    %168 = arith.mulf %167, %159 : vector<16x16xf32>
    %cst_111 = arith.constant dense<0.000000e+00> : vector<16x32xf32>
    %169 = tpu.matmul %168, %91, %cst_111 {dimension_numbers = #tpu.dot_dimension_numbers<[1], [0], [0], [1], [0, 0, 1, 1], [], []>} : vector<16x16xf32>, vector<16x32xf32>, vector<16x32xf32> -> vector<16x32xf32>
    %c2_112 = arith.constant 2 : index
    %c0_113 = arith.constant 0 : index
    %c0_114 = arith.constant 0 : index
    %170 = vector.load %arg15[%c2_112, %c0_113, %c0_114] : memref<3x16x16xbf16, #tpu.memory_space<vmem>>, vector<1x16x16xbf16>
    %171 = vector.shape_cast %170 : vector<1x16x16xbf16> to vector<16x16xbf16>
    %172 = arith.extf %171 : vector<16x16xbf16> to vector<16x16xf32>
    %173 = arith.mulf %172, %159 : vector<16x16xf32>
    %cst_115 = arith.constant dense<0.000000e+00> : vector<16x32xf32>
    %174 = tpu.matmul %173, %91, %cst_115 {dimension_numbers = #tpu.dot_dimension_numbers<[1], [0], [0], [1], [0, 0, 1, 1], [], []>} : vector<16x16xf32>, vector<16x32xf32>, vector<16x32xf32> -> vector<16x32xf32>
    %175 = tpu.concatenate %80, %164 in 0 : vector<16x32xf32>, vector<16x32xf32> -> vector<32x32xf32>
    %c0_116 = arith.constant 0 : index
    %c0_117 = arith.constant 0 : index
    %c0_118 = arith.constant 0 : index
    %176 = vector.load %arg16[%c0_116, %c0_117, %c0_118] : memref<3x32x256xbf16, #tpu.memory_space<vmem>>, vector<1x32x256xbf16>
    %177 = vector.shape_cast %176 : vector<1x32x256xbf16> to vector<32x256xbf16>
    %cst_119 = arith.constant dense<0.000000e+00> : vector<32x256xf32>
    %178 = tpu.matmul %175, %177, %cst_119 {dimension_numbers = #tpu.dot_dimension_numbers<[1], [0], [0], [1], [0, 0, 1, 1], [], []>} : vector<32x32xf32>, vector<32x256xbf16>, vector<32x256xf32> -> vector<32x256xf32>
    %179 = tpu.concatenate %85, %169 in 0 : vector<16x32xf32>, vector<16x32xf32> -> vector<32x32xf32>
    %c1_120 = arith.constant 1 : index
    %c0_121 = arith.constant 0 : index
    %c0_122 = arith.constant 0 : index
    %180 = vector.load %arg16[%c1_120, %c0_121, %c0_122] : memref<3x32x256xbf16, #tpu.memory_space<vmem>>, vector<1x32x256xbf16>
    %181 = vector.shape_cast %180 : vector<1x32x256xbf16> to vector<32x256xbf16>
    %cst_123 = arith.constant dense<0.000000e+00> : vector<32x256xf32>
    %182 = tpu.matmul %179, %181, %cst_123 {dimension_numbers = #tpu.dot_dimension_numbers<[1], [0], [0], [1], [0, 0, 1, 1], [], []>} : vector<32x32xf32>, vector<32x256xbf16>, vector<32x256xf32> -> vector<32x256xf32>
    %183 = arith.addf %178, %182 : vector<32x256xf32>
    %184 = tpu.concatenate %90, %174 in 0 : vector<16x32xf32>, vector<16x32xf32> -> vector<32x32xf32>
    %c2_124 = arith.constant 2 : index
    %c0_125 = arith.constant 0 : index
    %c0_126 = arith.constant 0 : index
    %185 = vector.load %arg16[%c2_124, %c0_125, %c0_126] : memref<3x32x256xbf16, #tpu.memory_space<vmem>>, vector<1x32x256xbf16>
    %186 = vector.shape_cast %185 : vector<1x32x256xbf16> to vector<32x256xbf16>
    %cst_127 = arith.constant dense<0.000000e+00> : vector<32x256xf32>
    %187 = tpu.matmul %184, %186, %cst_127 {dimension_numbers = #tpu.dot_dimension_numbers<[1], [0], [0], [1], [0, 0, 1, 1], [], []>} : vector<32x32xf32>, vector<32x256xbf16>, vector<32x256xf32> -> vector<32x256xf32>
    %188 = arith.addf %183, %187 : vector<32x256xf32>
    %cst_128 = arith.constant 0.000000e+00 : f32
    %189 = vector.broadcast %cst_128 : f32 to vector<32x256xf32>
    %190 = arith.maximumf %188, %189 : vector<32x256xf32>
    %191 = tpu.concatenate %190, %6 in 1 : vector<32x256xf32>, vector<32x32xf32> -> vector<32x288xf32>
    %c0_129 = arith.constant 0 : index
    %c0_130 = arith.constant 0 : index
    %192 = vector.load %arg17[%c0_129, %c0_130] : memref<288x128xbf16, #tpu.memory_space<vmem>>, vector<288x128xbf16>
    %cst_131 = arith.constant dense<0.000000e+00> : vector<32x128xf32>
    %193 = tpu.matmul %191, %192, %cst_131 {dimension_numbers = #tpu.dot_dimension_numbers<[1], [0], [0], [1], [0, 0, 1, 1], [], []>} : vector<32x288xf32>, vector<288x128xbf16>, vector<32x128xf32> -> vector<32x128xf32>
    %c0_132 = arith.constant 0 : index
    %c0_133 = arith.constant 0 : index
    %194 = vector.load %arg18[%c0_132, %c0_133] : memref<1x128xf32, #tpu.memory_space<vmem>>, vector<1x128xf32>
    %195 = vector.broadcast %194 : vector<1x128xf32> to vector<32x128xf32>
    %196 = arith.addf %193, %195 : vector<32x128xf32>
    %cst_134 = arith.constant 0.000000e+00 : f32
    %197 = vector.broadcast %cst_134 : f32 to vector<32x128xf32>
    %198 = arith.maximumf %196, %197 : vector<32x128xf32>
    %c0_135 = arith.constant 0 : index
    %c0_136 = arith.constant 0 : index
    %199 = vector.load %arg19[%c0_135, %c0_136] : memref<128x128xbf16, #tpu.memory_space<vmem>>, vector<128x128xbf16>
    %cst_137 = arith.constant dense<0.000000e+00> : vector<32x128xf32>
    %200 = tpu.matmul %198, %199, %cst_137 {dimension_numbers = #tpu.dot_dimension_numbers<[1], [0], [0], [1], [0, 0, 1, 1], [], []>} : vector<32x128xf32>, vector<128x128xbf16>, vector<32x128xf32> -> vector<32x128xf32>
    %201 = arith.subf %198, %200 : vector<32x128xf32>
    %202 = arith.mulf %201, %201 : vector<32x128xf32>
    %c0_138 = arith.constant 0 : index
    %c0_139 = arith.constant 0 : index
    %203 = vector.load %arg19[%c0_138, %c0_139] : memref<128x128xbf16, #tpu.memory_space<vmem>>, vector<128x128xbf16>
    %cst_140 = arith.constant dense<0.000000e+00> : vector<32x128xf32>
    %204 = tpu.matmul %202, %203, %cst_140 {dimension_numbers = #tpu.dot_dimension_numbers<[1], [0], [0], [1], [0, 0, 1, 1], [], []>} : vector<32x128xf32>, vector<128x128xbf16>, vector<32x128xf32> -> vector<32x128xf32>
    %cst_141 = arith.constant 9.99999974E-6 : f32
    %205 = vector.broadcast %cst_141 : f32 to vector<32x128xf32>
    %206 = arith.addf %204, %205 : vector<32x128xf32>
    %207 = math.rsqrt %206 : vector<32x128xf32>
    %208 = arith.mulf %201, %207 : vector<32x128xf32>
    %c0_142 = arith.constant 0 : index
    %c0_143 = arith.constant 0 : index
    %209 = vector.load %arg20[%c0_142, %c0_143] : memref<1x128xf32, #tpu.memory_space<vmem>>, vector<1x128xf32>
    %210 = vector.broadcast %209 : vector<1x128xf32> to vector<32x128xf32>
    %211 = arith.mulf %208, %210 : vector<32x128xf32>
    %c0_144 = arith.constant 0 : index
    %c0_145 = arith.constant 0 : index
    %212 = vector.load %arg21[%c0_144, %c0_145] : memref<1x128xf32, #tpu.memory_space<vmem>>, vector<1x128xf32>
    %213 = vector.broadcast %212 : vector<1x128xf32> to vector<32x128xf32>
    %214 = arith.addf %211, %213 : vector<32x128xf32>
    %215 = vector.extract_strided_slice %214 {offsets = [0, 0], sizes = [16, 128], strides = [1, 1]} : vector<32x128xf32> to vector<16x128xf32>
    %c0_146 = arith.constant 0 : index
    %c0_147 = arith.constant 0 : index
    %216 = vector.load %arg22[%c0_146, %c0_147] : memref<1x16xf32, #tpu.memory_space<vmem>>, vector<1x16xf32>
    %cst_148 = arith.constant dense<0.000000e+00> : vector<1x128xf32>
    %217 = tpu.matmul %216, %215, %cst_148 {dimension_numbers = #tpu.dot_dimension_numbers<[1], [0], [0], [1], [0, 0, 1, 1], [], []>} : vector<1x16xf32>, vector<16x128xf32>, vector<1x128xf32> -> vector<1x128xf32>
    %c0_149 = arith.constant 0 : index
    %c0_150 = arith.constant 0 : index
    %218 = vector.load %arg25[%c0_149, %c0_150] : memref<4x128xbf16, #tpu.memory_space<vmem>>, vector<4x128xbf16>
    %219 = arith.extf %218 : vector<4x128xbf16> to vector<4x128xf32>
    %220 = vector.broadcast %217 : vector<1x128xf32> to vector<4x128xf32>
    %221 = arith.mulf %219, %220 : vector<4x128xf32>
    %c0_151 = arith.constant 0 : index
    %c0_152 = arith.constant 0 : index
    %222 = vector.load %arg23[%c0_151, %c0_152] : memref<128x16xbf16, #tpu.memory_space<vmem>>, vector<128x16xbf16>
    %cst_153 = arith.constant dense<0.000000e+00> : vector<4x16xf32>
    %223 = tpu.matmul %221, %222, %cst_153 {dimension_numbers = #tpu.dot_dimension_numbers<[1], [0], [0], [1], [0, 0, 1, 1], [], []>} : vector<4x128xf32>, vector<128x16xbf16>, vector<4x16xf32> -> vector<4x16xf32>
    %c0_154 = arith.constant 0 : index
    %c0_155 = arith.constant 0 : index
    %224 = vector.load %arg24[%c0_154, %c0_155] : memref<128x4xf32, #tpu.memory_space<vmem>>, vector<128x4xf32>
    %cst_156 = arith.constant dense<0.000000e+00> : vector<16x4xf32>
    %225 = tpu.matmul %215, %224, %cst_156 {dimension_numbers = #tpu.dot_dimension_numbers<[1], [0], [0], [1], [0, 0, 1, 1], [], []>} : vector<16x128xf32>, vector<128x4xf32>, vector<16x4xf32> -> vector<16x4xf32>
    %cst_157 = arith.constant dense<0.000000e+00> : vector<4x4xf32>
    %226 = tpu.matmul %223, %225, %cst_157 {dimension_numbers = #tpu.dot_dimension_numbers<[1], [0], [0], [1], [0, 0, 1, 1], [], []>} : vector<4x16xf32>, vector<16x4xf32>, vector<4x4xf32> -> vector<4x4xf32>
    %c0_158 = arith.constant 0 : index
    %c0_159 = arith.constant 0 : index
    %227 = vector.load %arg27[%c0_158, %c0_159] : memref<4x4xbf16, #tpu.memory_space<vmem>>, vector<4x4xbf16>
    %c0_160 = arith.constant 0 : index
    %c0_161 = arith.constant 0 : index
    %228 = vector.load %arg26[%c0_160, %c0_161] : memref<4x4xf32, #tpu.memory_space<vmem>>, vector<4x4xf32>
    %229 = arith.addf %226, %228 : vector<4x4xf32>
    %230 = arith.negf %229 : vector<4x4xf32>
    %231 = math.exp %230 : vector<4x4xf32>
    %cst_162 = arith.constant 1.000000e+00 : f32
    %232 = vector.broadcast %cst_162 : f32 to vector<4x4xf32>
    %233 = arith.addf %232, %231 : vector<4x4xf32>
    %234 = arith.divf %232, %233 : vector<4x4xf32>
    %cst_163 = arith.constant dense<0.000000e+00> : vector<4x4xf32>
    %235 = tpu.matmul %227, %234, %cst_163 {dimension_numbers = #tpu.dot_dimension_numbers<[1], [0], [0], [1], [0, 0, 1, 1], [], []>} : vector<4x4xbf16>, vector<4x4xf32>, vector<4x4xf32> -> vector<4x4xf32>
    %cst_164 = arith.constant dense<0xFF800000> : vector<4xf32>
    %236 = vector.multi_reduction <maximumf>, %235, %cst_164 [0] : vector<4x4xf32> to vector<4xf32>
    %237 = vector.shape_cast %236 : vector<4xf32> to vector<1x4xf32>
    %238 = vector.broadcast %237 : vector<1x4xf32> to vector<4x4xf32>
    %239 = arith.subf %235, %238 : vector<4x4xf32>
    %240 = math.exp %239 : vector<4x4xf32>
    %cst_165 = arith.constant dense<0.000000e+00> : vector<4xf32>
    %241 = vector.multi_reduction <add>, %240, %cst_165 [0] : vector<4x4xf32> to vector<4xf32>
    %242 = vector.shape_cast %241 : vector<4xf32> to vector<1x4xf32>
    %243 = tpu.reciprocal %242 {approx = true} : vector<1x4xf32> -> vector<1x4xf32>
    %244 = vector.broadcast %243 : vector<1x4xf32> to vector<4x4xf32>
    %245 = arith.mulf %240, %244 : vector<4x4xf32>
    %c0_166 = arith.constant 0 : index
    %c0_167 = arith.constant 0 : index
    %246 = vector.load %arg28[%c0_166, %c0_167] : memref<1x4xf32, #tpu.memory_space<vmem>>, vector<1x4xf32>
    %247 = vector.broadcast %246 : vector<1x4xf32> to vector<4x4xf32>
    %248 = arith.mulf %245, %247 : vector<4x4xf32>
    %cst_168 = arith.constant dense<0.000000e+00> : vector<4xf32>
    %249 = vector.multi_reduction <add>, %248, %cst_168 [1] : vector<4x4xf32> to vector<4xf32>
    %250 = vector.shape_cast %249 : vector<4xf32> to vector<4x1xf32>
    %c0_169 = arith.constant 0 : index
    %c0_170 = arith.constant 0 : index
    %251 = vector.load %arg29[%c0_169, %c0_170] : memref<128x4xbf16, #tpu.memory_space<vmem>>, vector<128x4xbf16>
    %cst_171 = arith.constant dense<0.000000e+00> : vector<128x1xf32>
    %252 = tpu.matmul %251, %250, %cst_171 {dimension_numbers = #tpu.dot_dimension_numbers<[1], [0], [0], [1], [0, 0, 1, 1], [], []>} : vector<128x4xbf16>, vector<4x1xf32>, vector<128x1xf32> -> vector<128x1xf32>
    %c0_172 = arith.constant 0 : index
    %c0_173 = arith.constant 0 : index
    %253 = vector.load %arg30[%c0_172, %c0_173] : memref<128x32xbf16, #tpu.memory_space<vmem>>, vector<128x32xbf16>
    %254 = arith.extf %253 : vector<128x32xbf16> to vector<128x32xf32>
    %255 = vector.broadcast %252 : vector<128x1xf32> to vector<128x32xf32>
    %256 = arith.mulf %254, %255 : vector<128x32xf32>
    %cst_174 = arith.constant dense<0.000000e+00> : vector<16x32xf32>
    %257 = tpu.matmul %215, %256, %cst_174 {dimension_numbers = #tpu.dot_dimension_numbers<[1], [0], [0], [1], [0, 0, 1, 1], [], []>} : vector<16x128xf32>, vector<128x32xf32>, vector<16x32xf32> -> vector<16x32xf32>
    %c0_175 = arith.constant 0 : index
    %c0_176 = arith.constant 0 : index
    %258 = vector.load %arg31[%c0_175, %c0_176] : memref<32x4xbf16, #tpu.memory_space<vmem>>, vector<32x4xbf16>
    %cst_177 = arith.constant dense<0.000000e+00> : vector<16x4xf32>
    %259 = tpu.matmul %257, %258, %cst_177 {dimension_numbers = #tpu.dot_dimension_numbers<[1], [0], [0], [1], [0, 0, 1, 1], [], []>} : vector<16x32xf32>, vector<32x4xbf16>, vector<16x4xf32> -> vector<16x4xf32>
    %c0_178 = arith.constant 0 : index
    %c0_179 = arith.constant 0 : index
    %260 = vector.load %arg32[%c0_178, %c0_179] : memref<128x4xf32, #tpu.memory_space<vmem>>, vector<128x4xf32>
    %cst_180 = arith.constant dense<0.000000e+00> : vector<16x4xf32>
    %261 = tpu.matmul %215, %260, %cst_180 {dimension_numbers = #tpu.dot_dimension_numbers<[1], [0], [0], [1], [0, 0, 1, 1], [], []>} : vector<16x128xf32>, vector<128x4xf32>, vector<16x4xf32> -> vector<16x4xf32>
    %cst_181 = arith.constant dense<0.000000e+00> : vector<16x4xf32>
    %262 = tpu.matmul %261, %245, %cst_181 {dimension_numbers = #tpu.dot_dimension_numbers<[1], [0], [0], [1], [0, 0, 1, 1], [], []>} : vector<16x4xf32>, vector<4x4xf32>, vector<16x4xf32> -> vector<16x4xf32>
    %cst_182 = arith.constant dense<0.000000e+00> : vector<16x16xf32>
    %263 = tpu.matmul %262, %259, %cst_182 {dimension_numbers = #tpu.dot_dimension_numbers<[1], [1], [0], [0], [0, 0, 1, 0], [], []>} : vector<16x4xf32>, vector<16x4xf32>, vector<16x16xf32> -> vector<16x16xf32>
    %c0_183 = arith.constant 0 : index
    %c0_184 = arith.constant 0 : index
    %264 = vector.load %arg33[%c0_183, %c0_184] : memref<16x16xbf16, #tpu.memory_space<vmem>>, vector<16x16xbf16>
    %265 = arith.extf %264 : vector<16x16xbf16> to vector<16x16xf32>
    %266 = arith.addf %263, %265 : vector<16x16xf32>
    %267 = arith.negf %266 : vector<16x16xf32>
    %268 = math.exp %267 : vector<16x16xf32>
    %cst_185 = arith.constant 1.000000e+00 : f32
    %269 = vector.broadcast %cst_185 : f32 to vector<16x16xf32>
    %270 = arith.addf %269, %268 : vector<16x16xf32>
    %271 = arith.divf %269, %270 : vector<16x16xf32>
    %c0_186 = arith.constant 0 : index
    %c0_187 = arith.constant 0 : index
    %272 = vector.load %arg34[%c0_186, %c0_187] : memref<16x16xbf16, #tpu.memory_space<vmem>>, vector<16x16xbf16>
    %cst_188 = arith.constant dense<0.000000e+00> : vector<16x16xf32>
    %273 = tpu.matmul %271, %272, %cst_188 {dimension_numbers = #tpu.dot_dimension_numbers<[1], [0], [0], [1], [0, 0, 1, 1], [], []>} : vector<16x16xf32>, vector<16x16xbf16>, vector<16x16xf32> -> vector<16x16xf32>
    %cst_189 = arith.constant dense<0xFF800000> : vector<16xf32>
    %274 = vector.multi_reduction <maximumf>, %273, %cst_189 [1] : vector<16x16xf32> to vector<16xf32>
    %275 = vector.shape_cast %274 : vector<16xf32> to vector<16x1xf32>
    %276 = vector.broadcast %275 : vector<16x1xf32> to vector<16x16xf32>
    %277 = arith.subf %273, %276 : vector<16x16xf32>
    %278 = math.exp %277 : vector<16x16xf32>
    %cst_190 = arith.constant dense<0.000000e+00> : vector<16xf32>
    %279 = vector.multi_reduction <add>, %278, %cst_190 [1] : vector<16x16xf32> to vector<16xf32>
    %280 = vector.shape_cast %279 : vector<16xf32> to vector<16x1xf32>
    %281 = tpu.reciprocal %280 {approx = true} : vector<16x1xf32> -> vector<16x1xf32>
    %282 = vector.broadcast %281 : vector<16x1xf32> to vector<16x16xf32>
    %283 = arith.mulf %278, %282 : vector<16x16xf32>
    %c0_191 = arith.constant 0 : index
    %c0_192 = arith.constant 0 : index
    %c0_193 = arith.constant 0 : index
    %284 = vector.load %arg35[%c0_191, %c0_192, %c0_193] : memref<3x16x16xbf16, #tpu.memory_space<vmem>>, vector<1x16x16xbf16>
    %285 = vector.shape_cast %284 : vector<1x16x16xbf16> to vector<16x16xbf16>
    %286 = arith.extf %285 : vector<16x16xbf16> to vector<16x16xf32>
    %287 = arith.mulf %286, %283 : vector<16x16xf32>
    %cst_194 = arith.constant dense<0.000000e+00> : vector<16x128xf32>
    %288 = tpu.matmul %287, %215, %cst_194 {dimension_numbers = #tpu.dot_dimension_numbers<[1], [0], [0], [1], [0, 0, 1, 1], [], []>} : vector<16x16xf32>, vector<16x128xf32>, vector<16x128xf32> -> vector<16x128xf32>
    %c1_195 = arith.constant 1 : index
    %c0_196 = arith.constant 0 : index
    %c0_197 = arith.constant 0 : index
    %289 = vector.load %arg35[%c1_195, %c0_196, %c0_197] : memref<3x16x16xbf16, #tpu.memory_space<vmem>>, vector<1x16x16xbf16>
    %290 = vector.shape_cast %289 : vector<1x16x16xbf16> to vector<16x16xbf16>
    %291 = arith.extf %290 : vector<16x16xbf16> to vector<16x16xf32>
    %292 = arith.mulf %291, %283 : vector<16x16xf32>
    %cst_198 = arith.constant dense<0.000000e+00> : vector<16x128xf32>
    %293 = tpu.matmul %292, %215, %cst_198 {dimension_numbers = #tpu.dot_dimension_numbers<[1], [0], [0], [1], [0, 0, 1, 1], [], []>} : vector<16x16xf32>, vector<16x128xf32>, vector<16x128xf32> -> vector<16x128xf32>
    %c2_199 = arith.constant 2 : index
    %c0_200 = arith.constant 0 : index
    %c0_201 = arith.constant 0 : index
    %294 = vector.load %arg35[%c2_199, %c0_200, %c0_201] : memref<3x16x16xbf16, #tpu.memory_space<vmem>>, vector<1x16x16xbf16>
    %295 = vector.shape_cast %294 : vector<1x16x16xbf16> to vector<16x16xbf16>
    %296 = arith.extf %295 : vector<16x16xbf16> to vector<16x16xf32>
    %297 = arith.mulf %296, %283 : vector<16x16xf32>
    %cst_202 = arith.constant dense<0.000000e+00> : vector<16x128xf32>
    %298 = tpu.matmul %297, %215, %cst_202 {dimension_numbers = #tpu.dot_dimension_numbers<[1], [0], [0], [1], [0, 0, 1, 1], [], []>} : vector<16x16xf32>, vector<16x128xf32>, vector<16x128xf32> -> vector<16x128xf32>
    %299 = vector.extract_strided_slice %214 {offsets = [16, 0], sizes = [16, 128], strides = [1, 1]} : vector<32x128xf32> to vector<16x128xf32>
    %c0_203 = arith.constant 0 : index
    %c0_204 = arith.constant 0 : index
    %300 = vector.load %arg22[%c0_203, %c0_204] : memref<1x16xf32, #tpu.memory_space<vmem>>, vector<1x16xf32>
    %cst_205 = arith.constant dense<0.000000e+00> : vector<1x128xf32>
    %301 = tpu.matmul %300, %299, %cst_205 {dimension_numbers = #tpu.dot_dimension_numbers<[1], [0], [0], [1], [0, 0, 1, 1], [], []>} : vector<1x16xf32>, vector<16x128xf32>, vector<1x128xf32> -> vector<1x128xf32>
    %c0_206 = arith.constant 0 : index
    %c0_207 = arith.constant 0 : index
    %302 = vector.load %arg25[%c0_206, %c0_207] : memref<4x128xbf16, #tpu.memory_space<vmem>>, vector<4x128xbf16>
    %303 = arith.extf %302 : vector<4x128xbf16> to vector<4x128xf32>
    %304 = vector.broadcast %301 : vector<1x128xf32> to vector<4x128xf32>
    %305 = arith.mulf %303, %304 : vector<4x128xf32>
    %c0_208 = arith.constant 0 : index
    %c0_209 = arith.constant 0 : index
    %306 = vector.load %arg23[%c0_208, %c0_209] : memref<128x16xbf16, #tpu.memory_space<vmem>>, vector<128x16xbf16>
    %cst_210 = arith.constant dense<0.000000e+00> : vector<4x16xf32>
    %307 = tpu.matmul %305, %306, %cst_210 {dimension_numbers = #tpu.dot_dimension_numbers<[1], [0], [0], [1], [0, 0, 1, 1], [], []>} : vector<4x128xf32>, vector<128x16xbf16>, vector<4x16xf32> -> vector<4x16xf32>
    %c0_211 = arith.constant 0 : index
    %c0_212 = arith.constant 0 : index
    %308 = vector.load %arg24[%c0_211, %c0_212] : memref<128x4xf32, #tpu.memory_space<vmem>>, vector<128x4xf32>
    %cst_213 = arith.constant dense<0.000000e+00> : vector<16x4xf32>
    %309 = tpu.matmul %299, %308, %cst_213 {dimension_numbers = #tpu.dot_dimension_numbers<[1], [0], [0], [1], [0, 0, 1, 1], [], []>} : vector<16x128xf32>, vector<128x4xf32>, vector<16x4xf32> -> vector<16x4xf32>
    %cst_214 = arith.constant dense<0.000000e+00> : vector<4x4xf32>
    %310 = tpu.matmul %307, %309, %cst_214 {dimension_numbers = #tpu.dot_dimension_numbers<[1], [0], [0], [1], [0, 0, 1, 1], [], []>} : vector<4x16xf32>, vector<16x4xf32>, vector<4x4xf32> -> vector<4x4xf32>
    %c0_215 = arith.constant 0 : index
    %c0_216 = arith.constant 0 : index
    %311 = vector.load %arg27[%c0_215, %c0_216] : memref<4x4xbf16, #tpu.memory_space<vmem>>, vector<4x4xbf16>
    %c0_217 = arith.constant 0 : index
    %c0_218 = arith.constant 0 : index
    %312 = vector.load %arg26[%c0_217, %c0_218] : memref<4x4xf32, #tpu.memory_space<vmem>>, vector<4x4xf32>
    %313 = arith.addf %310, %312 : vector<4x4xf32>
    %314 = arith.negf %313 : vector<4x4xf32>
    %315 = math.exp %314 : vector<4x4xf32>
    %cst_219 = arith.constant 1.000000e+00 : f32
    %316 = vector.broadcast %cst_219 : f32 to vector<4x4xf32>
    %317 = arith.addf %316, %315 : vector<4x4xf32>
    %318 = arith.divf %316, %317 : vector<4x4xf32>
    %cst_220 = arith.constant dense<0.000000e+00> : vector<4x4xf32>
    %319 = tpu.matmul %311, %318, %cst_220 {dimension_numbers = #tpu.dot_dimension_numbers<[1], [0], [0], [1], [0, 0, 1, 1], [], []>} : vector<4x4xbf16>, vector<4x4xf32>, vector<4x4xf32> -> vector<4x4xf32>
    %cst_221 = arith.constant dense<0xFF800000> : vector<4xf32>
    %320 = vector.multi_reduction <maximumf>, %319, %cst_221 [0] : vector<4x4xf32> to vector<4xf32>
    %321 = vector.shape_cast %320 : vector<4xf32> to vector<1x4xf32>
    %322 = vector.broadcast %321 : vector<1x4xf32> to vector<4x4xf32>
    %323 = arith.subf %319, %322 : vector<4x4xf32>
    %324 = math.exp %323 : vector<4x4xf32>
    %cst_222 = arith.constant dense<0.000000e+00> : vector<4xf32>
    %325 = vector.multi_reduction <add>, %324, %cst_222 [0] : vector<4x4xf32> to vector<4xf32>
    %326 = vector.shape_cast %325 : vector<4xf32> to vector<1x4xf32>
    %327 = tpu.reciprocal %326 {approx = true} : vector<1x4xf32> -> vector<1x4xf32>
    %328 = vector.broadcast %327 : vector<1x4xf32> to vector<4x4xf32>
    %329 = arith.mulf %324, %328 : vector<4x4xf32>
    %c0_223 = arith.constant 0 : index
    %c0_224 = arith.constant 0 : index
    %330 = vector.load %arg28[%c0_223, %c0_224] : memref<1x4xf32, #tpu.memory_space<vmem>>, vector<1x4xf32>
    %331 = vector.broadcast %330 : vector<1x4xf32> to vector<4x4xf32>
    %332 = arith.mulf %329, %331 : vector<4x4xf32>
    %cst_225 = arith.constant dense<0.000000e+00> : vector<4xf32>
    %333 = vector.multi_reduction <add>, %332, %cst_225 [1] : vector<4x4xf32> to vector<4xf32>
    %334 = vector.shape_cast %333 : vector<4xf32> to vector<4x1xf32>
    %c0_226 = arith.constant 0 : index
    %c0_227 = arith.constant 0 : index
    %335 = vector.load %arg29[%c0_226, %c0_227] : memref<128x4xbf16, #tpu.memory_space<vmem>>, vector<128x4xbf16>
    %cst_228 = arith.constant dense<0.000000e+00> : vector<128x1xf32>
    %336 = tpu.matmul %335, %334, %cst_228 {dimension_numbers = #tpu.dot_dimension_numbers<[1], [0], [0], [1], [0, 0, 1, 1], [], []>} : vector<128x4xbf16>, vector<4x1xf32>, vector<128x1xf32> -> vector<128x1xf32>
    %c0_229 = arith.constant 0 : index
    %c0_230 = arith.constant 0 : index
    %337 = vector.load %arg30[%c0_229, %c0_230] : memref<128x32xbf16, #tpu.memory_space<vmem>>, vector<128x32xbf16>
    %338 = arith.extf %337 : vector<128x32xbf16> to vector<128x32xf32>
    %339 = vector.broadcast %336 : vector<128x1xf32> to vector<128x32xf32>
    %340 = arith.mulf %338, %339 : vector<128x32xf32>
    %cst_231 = arith.constant dense<0.000000e+00> : vector<16x32xf32>
    %341 = tpu.matmul %299, %340, %cst_231 {dimension_numbers = #tpu.dot_dimension_numbers<[1], [0], [0], [1], [0, 0, 1, 1], [], []>} : vector<16x128xf32>, vector<128x32xf32>, vector<16x32xf32> -> vector<16x32xf32>
    %c0_232 = arith.constant 0 : index
    %c0_233 = arith.constant 0 : index
    %342 = vector.load %arg31[%c0_232, %c0_233] : memref<32x4xbf16, #tpu.memory_space<vmem>>, vector<32x4xbf16>
    %cst_234 = arith.constant dense<0.000000e+00> : vector<16x4xf32>
    %343 = tpu.matmul %341, %342, %cst_234 {dimension_numbers = #tpu.dot_dimension_numbers<[1], [0], [0], [1], [0, 0, 1, 1], [], []>} : vector<16x32xf32>, vector<32x4xbf16>, vector<16x4xf32> -> vector<16x4xf32>
    %c0_235 = arith.constant 0 : index
    %c0_236 = arith.constant 0 : index
    %344 = vector.load %arg32[%c0_235, %c0_236] : memref<128x4xf32, #tpu.memory_space<vmem>>, vector<128x4xf32>
    %cst_237 = arith.constant dense<0.000000e+00> : vector<16x4xf32>
    %345 = tpu.matmul %299, %344, %cst_237 {dimension_numbers = #tpu.dot_dimension_numbers<[1], [0], [0], [1], [0, 0, 1, 1], [], []>} : vector<16x128xf32>, vector<128x4xf32>, vector<16x4xf32> -> vector<16x4xf32>
    %cst_238 = arith.constant dense<0.000000e+00> : vector<16x4xf32>
    %346 = tpu.matmul %345, %329, %cst_238 {dimension_numbers = #tpu.dot_dimension_numbers<[1], [0], [0], [1], [0, 0, 1, 1], [], []>} : vector<16x4xf32>, vector<4x4xf32>, vector<16x4xf32> -> vector<16x4xf32>
    %cst_239 = arith.constant dense<0.000000e+00> : vector<16x16xf32>
    %347 = tpu.matmul %346, %343, %cst_239 {dimension_numbers = #tpu.dot_dimension_numbers<[1], [1], [0], [0], [0, 0, 1, 0], [], []>} : vector<16x4xf32>, vector<16x4xf32>, vector<16x16xf32> -> vector<16x16xf32>
    %c0_240 = arith.constant 0 : index
    %c0_241 = arith.constant 0 : index
    %348 = vector.load %arg33[%c0_240, %c0_241] : memref<16x16xbf16, #tpu.memory_space<vmem>>, vector<16x16xbf16>
    %349 = arith.extf %348 : vector<16x16xbf16> to vector<16x16xf32>
    %350 = arith.addf %347, %349 : vector<16x16xf32>
    %351 = arith.negf %350 : vector<16x16xf32>
    %352 = math.exp %351 : vector<16x16xf32>
    %cst_242 = arith.constant 1.000000e+00 : f32
    %353 = vector.broadcast %cst_242 : f32 to vector<16x16xf32>
    %354 = arith.addf %353, %352 : vector<16x16xf32>
    %355 = arith.divf %353, %354 : vector<16x16xf32>
    %c0_243 = arith.constant 0 : index
    %c0_244 = arith.constant 0 : index
    %356 = vector.load %arg34[%c0_243, %c0_244] : memref<16x16xbf16, #tpu.memory_space<vmem>>, vector<16x16xbf16>
    %cst_245 = arith.constant dense<0.000000e+00> : vector<16x16xf32>
    %357 = tpu.matmul %355, %356, %cst_245 {dimension_numbers = #tpu.dot_dimension_numbers<[1], [0], [0], [1], [0, 0, 1, 1], [], []>} : vector<16x16xf32>, vector<16x16xbf16>, vector<16x16xf32> -> vector<16x16xf32>
    %cst_246 = arith.constant dense<0xFF800000> : vector<16xf32>
    %358 = vector.multi_reduction <maximumf>, %357, %cst_246 [1] : vector<16x16xf32> to vector<16xf32>
    %359 = vector.shape_cast %358 : vector<16xf32> to vector<16x1xf32>
    %360 = vector.broadcast %359 : vector<16x1xf32> to vector<16x16xf32>
    %361 = arith.subf %357, %360 : vector<16x16xf32>
    %362 = math.exp %361 : vector<16x16xf32>
    %cst_247 = arith.constant dense<0.000000e+00> : vector<16xf32>
    %363 = vector.multi_reduction <add>, %362, %cst_247 [1] : vector<16x16xf32> to vector<16xf32>
    %364 = vector.shape_cast %363 : vector<16xf32> to vector<16x1xf32>
    %365 = tpu.reciprocal %364 {approx = true} : vector<16x1xf32> -> vector<16x1xf32>
    %366 = vector.broadcast %365 : vector<16x1xf32> to vector<16x16xf32>
    %367 = arith.mulf %362, %366 : vector<16x16xf32>
    %c0_248 = arith.constant 0 : index
    %c0_249 = arith.constant 0 : index
    %c0_250 = arith.constant 0 : index
    %368 = vector.load %arg35[%c0_248, %c0_249, %c0_250] : memref<3x16x16xbf16, #tpu.memory_space<vmem>>, vector<1x16x16xbf16>
    %369 = vector.shape_cast %368 : vector<1x16x16xbf16> to vector<16x16xbf16>
    %370 = arith.extf %369 : vector<16x16xbf16> to vector<16x16xf32>
    %371 = arith.mulf %370, %367 : vector<16x16xf32>
    %cst_251 = arith.constant dense<0.000000e+00> : vector<16x128xf32>
    %372 = tpu.matmul %371, %299, %cst_251 {dimension_numbers = #tpu.dot_dimension_numbers<[1], [0], [0], [1], [0, 0, 1, 1], [], []>} : vector<16x16xf32>, vector<16x128xf32>, vector<16x128xf32> -> vector<16x128xf32>
    %c1_252 = arith.constant 1 : index
    %c0_253 = arith.constant 0 : index
    %c0_254 = arith.constant 0 : index
    %373 = vector.load %arg35[%c1_252, %c0_253, %c0_254] : memref<3x16x16xbf16, #tpu.memory_space<vmem>>, vector<1x16x16xbf16>
    %374 = vector.shape_cast %373 : vector<1x16x16xbf16> to vector<16x16xbf16>
    %375 = arith.extf %374 : vector<16x16xbf16> to vector<16x16xf32>
    %376 = arith.mulf %375, %367 : vector<16x16xf32>
    %cst_255 = arith.constant dense<0.000000e+00> : vector<16x128xf32>
    %377 = tpu.matmul %376, %299, %cst_255 {dimension_numbers = #tpu.dot_dimension_numbers<[1], [0], [0], [1], [0, 0, 1, 1], [], []>} : vector<16x16xf32>, vector<16x128xf32>, vector<16x128xf32> -> vector<16x128xf32>
    %c2_256 = arith.constant 2 : index
    %c0_257 = arith.constant 0 : index
    %c0_258 = arith.constant 0 : index
    %378 = vector.load %arg35[%c2_256, %c0_257, %c0_258] : memref<3x16x16xbf16, #tpu.memory_space<vmem>>, vector<1x16x16xbf16>
    %379 = vector.shape_cast %378 : vector<1x16x16xbf16> to vector<16x16xbf16>
    %380 = arith.extf %379 : vector<16x16xbf16> to vector<16x16xf32>
    %381 = arith.mulf %380, %367 : vector<16x16xf32>
    %cst_259 = arith.constant dense<0.000000e+00> : vector<16x128xf32>
    %382 = tpu.matmul %381, %299, %cst_259 {dimension_numbers = #tpu.dot_dimension_numbers<[1], [0], [0], [1], [0, 0, 1, 1], [], []>} : vector<16x16xf32>, vector<16x128xf32>, vector<16x128xf32> -> vector<16x128xf32>
    %383 = tpu.concatenate %288, %372 in 0 : vector<16x128xf32>, vector<16x128xf32> -> vector<32x128xf32>
    %c0_260 = arith.constant 0 : index
    %c0_261 = arith.constant 0 : index
    %c0_262 = arith.constant 0 : index
    %384 = vector.load %arg36[%c0_260, %c0_261, %c0_262] : memref<3x128x128xbf16, #tpu.memory_space<vmem>>, vector<1x128x128xbf16>
    %385 = vector.shape_cast %384 : vector<1x128x128xbf16> to vector<128x128xbf16>
    %cst_263 = arith.constant dense<0.000000e+00> : vector<32x128xf32>
    %386 = tpu.matmul %383, %385, %cst_263 {dimension_numbers = #tpu.dot_dimension_numbers<[1], [0], [0], [1], [0, 0, 1, 1], [], []>} : vector<32x128xf32>, vector<128x128xbf16>, vector<32x128xf32> -> vector<32x128xf32>
    %387 = tpu.concatenate %293, %377 in 0 : vector<16x128xf32>, vector<16x128xf32> -> vector<32x128xf32>
    %c1_264 = arith.constant 1 : index
    %c0_265 = arith.constant 0 : index
    %c0_266 = arith.constant 0 : index
    %388 = vector.load %arg36[%c1_264, %c0_265, %c0_266] : memref<3x128x128xbf16, #tpu.memory_space<vmem>>, vector<1x128x128xbf16>
    %389 = vector.shape_cast %388 : vector<1x128x128xbf16> to vector<128x128xbf16>
    %cst_267 = arith.constant dense<0.000000e+00> : vector<32x128xf32>
    %390 = tpu.matmul %387, %389, %cst_267 {dimension_numbers = #tpu.dot_dimension_numbers<[1], [0], [0], [1], [0, 0, 1, 1], [], []>} : vector<32x128xf32>, vector<128x128xbf16>, vector<32x128xf32> -> vector<32x128xf32>
    %391 = arith.addf %386, %390 : vector<32x128xf32>
    %392 = tpu.concatenate %298, %382 in 0 : vector<16x128xf32>, vector<16x128xf32> -> vector<32x128xf32>
    %c2_268 = arith.constant 2 : index
    %c0_269 = arith.constant 0 : index
    %c0_270 = arith.constant 0 : index
    %393 = vector.load %arg36[%c2_268, %c0_269, %c0_270] : memref<3x128x128xbf16, #tpu.memory_space<vmem>>, vector<1x128x128xbf16>
    %394 = vector.shape_cast %393 : vector<1x128x128xbf16> to vector<128x128xbf16>
    %cst_271 = arith.constant dense<0.000000e+00> : vector<32x128xf32>
    %395 = tpu.matmul %392, %394, %cst_271 {dimension_numbers = #tpu.dot_dimension_numbers<[1], [0], [0], [1], [0, 0, 1, 1], [], []>} : vector<32x128xf32>, vector<128x128xbf16>, vector<32x128xf32> -> vector<32x128xf32>
    %396 = arith.addf %391, %395 : vector<32x128xf32>
    %cst_272 = arith.constant 0.000000e+00 : f32
    %397 = vector.broadcast %cst_272 : f32 to vector<32x128xf32>
    %398 = arith.maximumf %396, %397 : vector<32x128xf32>
    %399 = tpu.concatenate %398, %214 in 1 : vector<32x128xf32>, vector<32x128xf32> -> vector<32x256xf32>
    %c0_273 = arith.constant 0 : index
    %c0_274 = arith.constant 0 : index
    %400 = vector.load %arg37[%c0_273, %c0_274] : memref<256x128xbf16, #tpu.memory_space<vmem>>, vector<256x128xbf16>
    %cst_275 = arith.constant dense<0.000000e+00> : vector<32x128xf32>
    %401 = tpu.matmul %399, %400, %cst_275 {dimension_numbers = #tpu.dot_dimension_numbers<[1], [0], [0], [1], [0, 0, 1, 1], [], []>} : vector<32x256xf32>, vector<256x128xbf16>, vector<32x128xf32> -> vector<32x128xf32>
    %c0_276 = arith.constant 0 : index
    %c0_277 = arith.constant 0 : index
    %402 = vector.load %arg38[%c0_276, %c0_277] : memref<1x128xf32, #tpu.memory_space<vmem>>, vector<1x128xf32>
    %403 = vector.broadcast %402 : vector<1x128xf32> to vector<32x128xf32>
    %404 = arith.addf %401, %403 : vector<32x128xf32>
    %cst_278 = arith.constant 0.000000e+00 : f32
    %405 = vector.broadcast %cst_278 : f32 to vector<32x128xf32>
    %406 = arith.maximumf %404, %405 : vector<32x128xf32>
    %c0_279 = arith.constant 0 : index
    %c0_280 = arith.constant 0 : index
    %407 = vector.load %arg39[%c0_279, %c0_280] : memref<128x128xbf16, #tpu.memory_space<vmem>>, vector<128x128xbf16>
    %cst_281 = arith.constant dense<0.000000e+00> : vector<32x128xf32>
    %408 = tpu.matmul %406, %407, %cst_281 {dimension_numbers = #tpu.dot_dimension_numbers<[1], [0], [0], [1], [0, 0, 1, 1], [], []>} : vector<32x128xf32>, vector<128x128xbf16>, vector<32x128xf32> -> vector<32x128xf32>
    %409 = arith.subf %406, %408 : vector<32x128xf32>
    %410 = arith.mulf %409, %409 : vector<32x128xf32>
    %c0_282 = arith.constant 0 : index
    %c0_283 = arith.constant 0 : index
    %411 = vector.load %arg39[%c0_282, %c0_283] : memref<128x128xbf16, #tpu.memory_space<vmem>>, vector<128x128xbf16>
    %cst_284 = arith.constant dense<0.000000e+00> : vector<32x128xf32>
    %412 = tpu.matmul %410, %411, %cst_284 {dimension_numbers = #tpu.dot_dimension_numbers<[1], [0], [0], [1], [0, 0, 1, 1], [], []>} : vector<32x128xf32>, vector<128x128xbf16>, vector<32x128xf32> -> vector<32x128xf32>
    %cst_285 = arith.constant 9.99999974E-6 : f32
    %413 = vector.broadcast %cst_285 : f32 to vector<32x128xf32>
    %414 = arith.addf %412, %413 : vector<32x128xf32>
    %415 = math.rsqrt %414 : vector<32x128xf32>
    %416 = arith.mulf %409, %415 : vector<32x128xf32>
    %c0_286 = arith.constant 0 : index
    %c0_287 = arith.constant 0 : index
    %417 = vector.load %arg40[%c0_286, %c0_287] : memref<1x128xf32, #tpu.memory_space<vmem>>, vector<1x128xf32>
    %418 = vector.broadcast %417 : vector<1x128xf32> to vector<32x128xf32>
    %419 = arith.mulf %416, %418 : vector<32x128xf32>
    %c0_288 = arith.constant 0 : index
    %c0_289 = arith.constant 0 : index
    %420 = vector.load %arg41[%c0_288, %c0_289] : memref<1x128xf32, #tpu.memory_space<vmem>>, vector<1x128xf32>
    %421 = vector.broadcast %420 : vector<1x128xf32> to vector<32x128xf32>
    %422 = arith.addf %419, %421 : vector<32x128xf32>
    %c0_290 = arith.constant 0 : index
    %c0_291 = arith.constant 0 : index
    %423 = vector.load %arg42[%c0_290, %c0_291] : memref<128x4xbf16, #tpu.memory_space<vmem>>, vector<128x4xbf16>
    %cst_292 = arith.constant dense<0.000000e+00> : vector<32x4xf32>
    %424 = tpu.matmul %422, %423, %cst_292 {dimension_numbers = #tpu.dot_dimension_numbers<[1], [0], [0], [1], [0, 0, 1, 1], [], []>} : vector<32x128xf32>, vector<128x4xbf16>, vector<32x4xf32> -> vector<32x4xf32>
    %c0_293 = arith.constant 0 : index
    %c0_294 = arith.constant 0 : index
    %425 = vector.load %arg43[%c0_293, %c0_294] : memref<1x4xf32, #tpu.memory_space<vmem>>, vector<1x4xf32>
    %426 = vector.broadcast %425 : vector<1x4xf32> to vector<32x4xf32>
    %427 = arith.addf %424, %426 : vector<32x4xf32>
    %428 = vector.extract_strided_slice %427 {offsets = [0, 0], sizes = [16, 4], strides = [1, 1]} : vector<32x4xf32> to vector<16x4xf32>
    %c0_295 = arith.constant 0 : index
    %c0_296 = arith.constant 0 : index
    %c0_297 = arith.constant 0 : index
    %429 = vector.load %arg44[%c0_295, %c0_296, %c0_297] : memref<2x16x4xf32, #tpu.memory_space<vmem>>, vector<1x16x4xf32>
    %430 = vector.shape_cast %429 : vector<1x16x4xf32> to vector<16x4xf32>
    %431 = vector.shape_cast %428 : vector<16x4xf32> to vector<1x16x4xf32>
    tpu.vector_store %arg44[%c0_295, %c0_296, %c0_297], %431 {strides = array<i32>} : memref<2x16x4xf32, #tpu.memory_space<vmem>>, vector<1x16x4xf32>,
    %432 = vector.extract_strided_slice %427 {offsets = [16, 0], sizes = [16, 4], strides = [1, 1]} : vector<32x4xf32> to vector<16x4xf32>
    %c1_298 = arith.constant 1 : index
    %c0_299 = arith.constant 0 : index
    %c0_300 = arith.constant 0 : index
    %433 = vector.load %arg44[%c1_298, %c0_299, %c0_300] : memref<2x16x4xf32, #tpu.memory_space<vmem>>, vector<1x16x4xf32>
    %434 = vector.shape_cast %433 : vector<1x16x4xf32> to vector<16x4xf32>
    %435 = vector.shape_cast %432 : vector<16x4xf32> to vector<1x16x4xf32>
    tpu.vector_store %arg44[%c1_298, %c0_299, %c0_300], %435 {strides = array<i32>} : memref<2x16x4xf32, #tpu.memory_space<vmem>>, vector<1x16x4xf32>,
    return
  }
  func.func @transform_0(%arg0: i32) -> (i32, i32, i32) {
    %c0_i32 = arith.constant 0 : i32
    %c0_i32_0 = arith.constant 0 : i32
    %c0_i32_1 = arith.constant 0 : i32
    return %arg0, %c0_i32, %c0_i32_0 : i32, i32, i32
  }
  func.func @transform_1(%arg0: i32) -> (i32, i32) {
    %c0_i32 = arith.constant 0 : i32
    %c0_i32_0 = arith.constant 0 : i32
    %c0_i32_1 = arith.constant 0 : i32
    return %c0_i32, %c0_i32_0 : i32, i32
  }
  func.func @transform_2(%arg0: i32) -> (i32, i32) {
    %c0_i32 = arith.constant 0 : i32
    %c0_i32_0 = arith.constant 0 : i32
    %c0_i32_1 = arith.constant 0 : i32
    return %c0_i32, %c0_i32_0 : i32, i32
  }
  func.func @transform_3(%arg0: i32) -> (i32, i32) {
    %c0_i32 = arith.constant 0 : i32
    %c0_i32_0 = arith.constant 0 : i32
    %c0_i32_1 = arith.constant 0 : i32
    return %c0_i32, %c0_i32_0 : i32, i32
  }
  func.func @transform_4(%arg0: i32) -> (i32, i32) {
    %c0_i32 = arith.constant 0 : i32
    %c0_i32_0 = arith.constant 0 : i32
    %c0_i32_1 = arith.constant 0 : i32
    return %c0_i32, %c0_i32_0 : i32, i32
  }
  func.func @transform_5(%arg0: i32) -> (i32, i32) {
    %c0_i32 = arith.constant 0 : i32
    %c0_i32_0 = arith.constant 0 : i32
    %c0_i32_1 = arith.constant 0 : i32
    return %c0_i32, %c0_i32_0 : i32, i32
  }
  func.func @transform_6(%arg0: i32) -> (i32, i32) {
    %c0_i32 = arith.constant 0 : i32
    %c0_i32_0 = arith.constant 0 : i32
    %c0_i32_1 = arith.constant 0 : i32
    return %c0_i32, %c0_i32_0 : i32, i32
  }
  func.func @transform_7(%arg0: i32) -> (i32, i32) {
    %c0_i32 = arith.constant 0 : i32
    %c0_i32_0 = arith.constant 0 : i32
    %c0_i32_1 = arith.constant 0 : i32
    return %c0_i32, %c0_i32_0 : i32, i32
  }
  func.func @transform_8(%arg0: i32) -> (i32, i32) {
    %c0_i32 = arith.constant 0 : i32
    %c0_i32_0 = arith.constant 0 : i32
    %c0_i32_1 = arith.constant 0 : i32
    return %c0_i32, %c0_i32_0 : i32, i32
  }
  func.func @transform_9(%arg0: i32) -> (i32, i32) {
    %c0_i32 = arith.constant 0 : i32
    %c0_i32_0 = arith.constant 0 : i32
    %c0_i32_1 = arith.constant 0 : i32
    return %c0_i32, %c0_i32_0 : i32, i32
  }
  func.func @transform_10(%arg0: i32) -> (i32, i32) {
    %c0_i32 = arith.constant 0 : i32
    %c0_i32_0 = arith.constant 0 : i32
    %c0_i32_1 = arith.constant 0 : i32
    return %c0_i32, %c0_i32_0 : i32, i32
  }
  func.func @transform_11(%arg0: i32) -> (i32, i32) {
    %c0_i32 = arith.constant 0 : i32
    %c0_i32_0 = arith.constant 0 : i32
    %c0_i32_1 = arith.constant 0 : i32
    return %c0_i32, %c0_i32_0 : i32, i32
  }
  func.func @transform_12(%arg0: i32) -> (i32, i32) {
    %c0_i32 = arith.constant 0 : i32
    %c0_i32_0 = arith.constant 0 : i32
    %c0_i32_1 = arith.constant 0 : i32
    return %c0_i32, %c0_i32_0 : i32, i32
  }
  func.func @transform_13(%arg0: i32) -> (i32, i32) {
    %c0_i32 = arith.constant 0 : i32
    %c0_i32_0 = arith.constant 0 : i32
    %c0_i32_1 = arith.constant 0 : i32
    return %c0_i32, %c0_i32_0 : i32, i32
  }
  func.func @transform_14(%arg0: i32) -> (i32, i32, i32) {
    %c0_i32 = arith.constant 0 : i32
    %c0_i32_0 = arith.constant 0 : i32
    %c0_i32_1 = arith.constant 0 : i32
    %c0_i32_2 = arith.constant 0 : i32
    return %c0_i32, %c0_i32_0, %c0_i32_1 : i32, i32, i32
  }
  func.func @transform_15(%arg0: i32) -> (i32, i32, i32) {
    %c0_i32 = arith.constant 0 : i32
    %c0_i32_0 = arith.constant 0 : i32
    %c0_i32_1 = arith.constant 0 : i32
    %c0_i32_2 = arith.constant 0 : i32
    return %c0_i32, %c0_i32_0, %c0_i32_1 : i32, i32, i32
  }
  func.func @transform_16(%arg0: i32) -> (i32, i32) {
    %c0_i32 = arith.constant 0 : i32
    %c0_i32_0 = arith.constant 0 : i32
    %c0_i32_1 = arith.constant 0 : i32
    return %c0_i32, %c0_i32_0 : i32, i32
  }
  func.func @transform_17(%arg0: i32) -> (i32, i32) {
    %c0_i32 = arith.constant 0 : i32
    %c0_i32_0 = arith.constant 0 : i32
    %c0_i32_1 = arith.constant 0 : i32
    return %c0_i32, %c0_i32_0 : i32, i32
  }
  func.func @transform_18(%arg0: i32) -> (i32, i32) {
    %c0_i32 = arith.constant 0 : i32
    %c0_i32_0 = arith.constant 0 : i32
    %c0_i32_1 = arith.constant 0 : i32
    return %c0_i32, %c0_i32_0 : i32, i32
  }
  func.func @transform_19(%arg0: i32) -> (i32, i32) {
    %c0_i32 = arith.constant 0 : i32
    %c0_i32_0 = arith.constant 0 : i32
    %c0_i32_1 = arith.constant 0 : i32
    return %c0_i32, %c0_i32_0 : i32, i32
  }
  func.func @transform_20(%arg0: i32) -> (i32, i32) {
    %c0_i32 = arith.constant 0 : i32
    %c0_i32_0 = arith.constant 0 : i32
    %c0_i32_1 = arith.constant 0 : i32
    return %c0_i32, %c0_i32_0 : i32, i32
  }
  func.func @transform_21(%arg0: i32) -> (i32, i32) {
    %c0_i32 = arith.constant 0 : i32
    %c0_i32_0 = arith.constant 0 : i32
    %c0_i32_1 = arith.constant 0 : i32
    return %c0_i32, %c0_i32_0 : i32, i32
  }
  func.func @transform_22(%arg0: i32) -> (i32, i32) {
    %c0_i32 = arith.constant 0 : i32
    %c0_i32_0 = arith.constant 0 : i32
    %c0_i32_1 = arith.constant 0 : i32
    return %c0_i32, %c0_i32_0 : i32, i32
  }
  func.func @transform_23(%arg0: i32) -> (i32, i32) {
    %c0_i32 = arith.constant 0 : i32
    %c0_i32_0 = arith.constant 0 : i32
    %c0_i32_1 = arith.constant 0 : i32
    return %c0_i32, %c0_i32_0 : i32, i32
  }
  func.func @transform_24(%arg0: i32) -> (i32, i32) {
    %c0_i32 = arith.constant 0 : i32
    %c0_i32_0 = arith.constant 0 : i32
    %c0_i32_1 = arith.constant 0 : i32
    return %c0_i32, %c0_i32_0 : i32, i32
  }
  func.func @transform_25(%arg0: i32) -> (i32, i32) {
    %c0_i32 = arith.constant 0 : i32
    %c0_i32_0 = arith.constant 0 : i32
    %c0_i32_1 = arith.constant 0 : i32
    return %c0_i32, %c0_i32_0 : i32, i32
  }
  func.func @transform_26(%arg0: i32) -> (i32, i32) {
    %c0_i32 = arith.constant 0 : i32
    %c0_i32_0 = arith.constant 0 : i32
    %c0_i32_1 = arith.constant 0 : i32
    return %c0_i32, %c0_i32_0 : i32, i32
  }
  func.func @transform_27(%arg0: i32) -> (i32, i32) {
    %c0_i32 = arith.constant 0 : i32
    %c0_i32_0 = arith.constant 0 : i32
    %c0_i32_1 = arith.constant 0 : i32
    return %c0_i32, %c0_i32_0 : i32, i32
  }
  func.func @transform_28(%arg0: i32) -> (i32, i32) {
    %c0_i32 = arith.constant 0 : i32
    %c0_i32_0 = arith.constant 0 : i32
    %c0_i32_1 = arith.constant 0 : i32
    return %c0_i32, %c0_i32_0 : i32, i32
  }
  func.func @transform_29(%arg0: i32) -> (i32, i32) {
    %c0_i32 = arith.constant 0 : i32
    %c0_i32_0 = arith.constant 0 : i32
    %c0_i32_1 = arith.constant 0 : i32
    return %c0_i32, %c0_i32_0 : i32, i32
  }
  func.func @transform_30(%arg0: i32) -> (i32, i32) {
    %c0_i32 = arith.constant 0 : i32
    %c0_i32_0 = arith.constant 0 : i32
    %c0_i32_1 = arith.constant 0 : i32
    return %c0_i32, %c0_i32_0 : i32, i32
  }
  func.func @transform_31(%arg0: i32) -> (i32, i32) {
    %c0_i32 = arith.constant 0 : i32
    %c0_i32_0 = arith.constant 0 : i32
    %c0_i32_1 = arith.constant 0 : i32
    return %c0_i32, %c0_i32_0 : i32, i32
  }
  func.func @transform_32(%arg0: i32) -> (i32, i32) {
    %c0_i32 = arith.constant 0 : i32
    %c0_i32_0 = arith.constant 0 : i32
    %c0_i32_1 = arith.constant 0 : i32
    return %c0_i32, %c0_i32_0 : i32, i32
  }
  func.func @transform_33(%arg0: i32) -> (i32, i32) {
    %c0_i32 = arith.constant 0 : i32
    %c0_i32_0 = arith.constant 0 : i32
    %c0_i32_1 = arith.constant 0 : i32
    return %c0_i32, %c0_i32_0 : i32, i32
  }
  func.func @transform_34(%arg0: i32) -> (i32, i32, i32) {
    %c0_i32 = arith.constant 0 : i32
    %c0_i32_0 = arith.constant 0 : i32
    %c0_i32_1 = arith.constant 0 : i32
    %c0_i32_2 = arith.constant 0 : i32
    return %c0_i32, %c0_i32_0, %c0_i32_1 : i32, i32, i32
  }
  func.func @transform_35(%arg0: i32) -> (i32, i32, i32) {
    %c0_i32 = arith.constant 0 : i32
    %c0_i32_0 = arith.constant 0 : i32
    %c0_i32_1 = arith.constant 0 : i32
    %c0_i32_2 = arith.constant 0 : i32
    return %c0_i32, %c0_i32_0, %c0_i32_1 : i32, i32, i32
  }
  func.func @transform_36(%arg0: i32) -> (i32, i32) {
    %c0_i32 = arith.constant 0 : i32
    %c0_i32_0 = arith.constant 0 : i32
    %c0_i32_1 = arith.constant 0 : i32
    return %c0_i32, %c0_i32_0 : i32, i32
  }
  func.func @transform_37(%arg0: i32) -> (i32, i32) {
    %c0_i32 = arith.constant 0 : i32
    %c0_i32_0 = arith.constant 0 : i32
    %c0_i32_1 = arith.constant 0 : i32
    return %c0_i32, %c0_i32_0 : i32, i32
  }
  func.func @transform_38(%arg0: i32) -> (i32, i32) {
    %c0_i32 = arith.constant 0 : i32
    %c0_i32_0 = arith.constant 0 : i32
    %c0_i32_1 = arith.constant 0 : i32
    return %c0_i32, %c0_i32_0 : i32, i32
  }
  func.func @transform_39(%arg0: i32) -> (i32, i32) {
    %c0_i32 = arith.constant 0 : i32
    %c0_i32_0 = arith.constant 0 : i32
    %c0_i32_1 = arith.constant 0 : i32
    return %c0_i32, %c0_i32_0 : i32, i32
  }
  func.func @transform_40(%arg0: i32) -> (i32, i32) {
    %c0_i32 = arith.constant 0 : i32
    %c0_i32_0 = arith.constant 0 : i32
    %c0_i32_1 = arith.constant 0 : i32
    return %c0_i32, %c0_i32_0 : i32, i32
  }
  func.func @transform_41(%arg0: i32) -> (i32, i32) {
    %c0_i32 = arith.constant 0 : i32
    %c0_i32_0 = arith.constant 0 : i32
    %c0_i32_1 = arith.constant 0 : i32
    return %c0_i32, %c0_i32_0 : i32, i32
  }
  func.func @transform_42(%arg0: i32) -> (i32, i32) {
    %c0_i32 = arith.constant 0 : i32
    %c0_i32_0 = arith.constant 0 : i32
    %c0_i32_1 = arith.constant 0 : i32
    return %c0_i32, %c0_i32_0 : i32, i32
  }
  func.func @transform_43(%arg0: i32) -> (i32, i32, i32) {
    %c0_i32 = arith.constant 0 : i32
    %c0_i32_0 = arith.constant 0 : i32
    %c0_i32_1 = arith.constant 0 : i32
    return %arg0, %c0_i32, %c0_i32_0 : i32, i32, i32
  }
}

</mosaic_0001>

<bundles_post_ra>
// kernel: _lambda_.1
= control target key start
LH: loop header
LB: loop body
LE: loop exit
PB: predicated region body
PF: predicated region fallthrough
CT: control target
= control target key end

     0   :  { %s12797_s6 = smov 1   ;;  %s12798_s10 = smov 2   ;;  %s14663_s0 = inlined_call_operand.smem [shape: u32[44], index: -1, kind: input, shape index: {}] }
   0x1   :  { %s12887_s5 = sld [smem:[%s14663_s0]]   ;;  %s12799_s14 = smov 3  }
   0x2   :  { %s12892_s9 = sld [smem:[%s14663_s0 + %s12797_s6]]   ;;  %s12800_s18 = smov 4  }
   0x3   :  { %s12897_s13 = sld [smem:[%s14663_s0 + %s12798_s10]]   ;;  %s12801_s22 = smov 5  }
   0x4   :  { %s12902_s17 = sld [smem:[%s14663_s0 + %s12799_s14]]   ;;  %s12802_s26 = smov 6  }
   0x5   :  { %s12907_s21 = sld [smem:[%s14663_s0 + %s12800_s18]]   ;;  %s12803_s30 = smov 7  }
   0x6   :  { %s12912_s25 = sld [smem:[%s14663_s0 + %s12801_s22]]   ;;  %s12804_s4 = smov 8  }
   0x7   :  { %14740 = sst [smem:[#allocation65_spill]] %s12887_s5  ;;  %s12805_s10 = smov 9  }
   0x8   :  { %14741 = sst [smem:[#allocation66_spill]] %s12892_s9  ;;  %s12806_s15 = smov 10  }
   0x9   :  { %14742 = sst [smem:[#allocation67_spill]] %s12897_s13  ;;  %s12807_s20 = smov 11  }
   0xa   :  { %14743 = sst [smem:[#allocation68_spill]] %s12902_s17  ;;  %s12809_s1 = smov 13  }
   0xb   :  { %s12917_s29 = sld [smem:[%s14663_s0 + %s12802_s26]]   ;;  %s12808_s26 = smov 12  }
   0xc   :  { %14744 = sst [smem:[#allocation69_spill]] %s12912_s25  ;;  %s12810_s7 = smov 14  }
   0xd   :  { %s12922_s3 = sld [smem:[%s14663_s0 + %s12803_s30]]   ;;  %s12812_s22 = smov 16  }
   0xe   :  { %s12927_s8 = sld [smem:[%s14663_s0 + %s12804_s4]]   ;;  %s12813_s28 = smov 17  }
   0xf   :  { %s12932_s14 = sld [smem:[%s14663_s0 + %s12805_s10]]  }
  0x10   :  { %s12937_s19 = sld [smem:[%s14663_s0 + %s12806_s15]]   ;;  %s12811_s15 = smov 15  }
  0x11   :  { %s12942_s24 = sld [smem:[%s14663_s0 + %s12807_s20]]  }
  0x12   :  { %s12947_s30 = sld [smem:[%s14663_s0 + %s12808_s26]]  }
  0x13   :  { %14745 = sst [smem:[#allocation70_spill]] %s12922_s3 }
  0x14   :  { %14746 = sst [smem:[#allocation71_spill]] %s12927_s8 }
  0x15   :  { %14747 = sst [smem:[#allocation72_spill]] %s12932_s14 }
  0x16   :  { %s12952_s6 = sld [smem:[%s14663_s0 + %s12809_s1]]  }
  0x17   :  { %14748 = sst [smem:[#allocation73_spill]] %s12942_s24 }
  0x18   :  { %s12957_s12 = sld [smem:[%s14663_s0 + %s12810_s7]]   ;;  %s12814_s7 = smov 18  }
  0x19   :  { %s12962_s20 = sld [smem:[%s14663_s0 + %s12811_s15]]   ;;  %s12815_s15 = smov 19  }
  0x1a   :  { %s12967_s27 = sld [smem:[%s14663_s0 + %s12812_s22]]   ;;  %s12816_s22 = smov 20  }
  0x1b   :  { %s12972_s4 = sld [smem:[%s14663_s0 + %s12813_s28]]   ;;  %s12817_s28 = smov 21  }
  0x1c   :  { %14749 = sst [smem:[#allocation74_spill]] %s12952_s6 }
  0x1d   :  { %s12977_s5 = sld [smem:[%s14663_s0 + %s12814_s7]]   ;;  %s12818_s7 = smov 22  }
  0x1e   :  { %14750 = sst [smem:[#allocation75_spill]] %s12957_s12 }
  0x1f   :  { %14751 = sst [smem:[#allocation76_spill]] %s12962_s20 }
  0x20   :  { %14752 = sst [smem:[#allocation77_spill]] %s12967_s27 }
  0x21   :  { %14753 = sst [smem:[#allocation78_spill]] %s12972_s4 }
  0x22   :  { %s12982_s20 = sld [smem:[%s14663_s0 + %s12815_s15]]   ;;  %s12819_s15 = smov 23  }
  0x23   :  { %14754 = sst [smem:[#allocation79_spill]] %s12977_s5 }
  0x24   :  { %s12987_s27 = sld [smem:[%s14663_s0 + %s12816_s22]]   ;;  %s12820_s22 = smov 24  }
  0x25   :  { %s12992_s4 = sld [smem:[%s14663_s0 + %s12817_s28]]   ;;  %s12821_s28 = smov 25  }
  0x26   :  { %s12997_s5 = sld [smem:[%s14663_s0 + %s12818_s7]]   ;;  %s12822_s7 = smov 26  }
  0x27   :  { %s13012_s6 = sld [smem:[%s14663_s0 + %s12821_s28]]   ;;  %s12825_s28 = smov 29  }
  0x28   :  { %14755 = sst [smem:[#allocation80_spill]] %s12982_s20 }
  0x29   :  { %s13002_s20 = sld [smem:[%s14663_s0 + %s12819_s15]]   ;;  %s12823_s15 = smov 27  }
  0x2a   :  { %14756 = sst [smem:[#allocation81_spill]] %s12987_s27 }
  0x2b   :  { %14757 = sst [smem:[#allocation82_spill]] %s12992_s4 }
  0x2c   :  { %14758 = sst [smem:[#allocation83_spill]] %s12997_s5 }
  0x2d   :  { %s13007_s27 = sld [smem:[%s14663_s0 + %s12820_s22]]   ;;  %s12824_s22 = smov 28  }
  0x2e   :  { %14760 = sst [smem:[#allocation85_spill]] %s13012_s6 }
  0x2f   :  { %s13017_s5 = sld [smem:[%s14663_s0 + %s12822_s7]]   ;;  %s12826_s7 = smov 30  }
  0x30   :  { %s13022_s24 = sld [smem:[%s14663_s0 + %s12823_s15]]   ;;  %s12827_s15 = smov 31  }
  0x31   :  { %s13032_s14 = sld [smem:[%s14663_s0 + %s12825_s28]]   ;;  %s12829_s28 = smov 33  }
  0x32   :  { %s13042_s3 = sld [smem:[%s14663_s0 + %s12827_s15]]   ;;  %s12831_s15 = smov 35  }
  0x33   :  { %14759 = sst [smem:[#allocation84_spill]] %s13007_s27 }
  0x34   :  { %s13027_s27 = sld [smem:[%s14663_s0 + %s12824_s22]]   ;;  %s12828_s22 = smov 32  }
  0x35   :  { %14761 = sst [smem:[#allocation86_spill]] %s13017_s5 }
  0x36   :  { %s13037_s5 = sld [smem:[%s14663_s0 + %s12826_s7]]   ;;  %s12830_s7 = smov 34  }
  0x37   :  { %14763 = sst [smem:[#allocation88_spill]] %s13032_s14 }
  0x38   :  { %14765 = sst [smem:[#allocation90_spill]] %s13042_s3 }
  0x39   :  { %s13052_s25 = sld [smem:[%s14663_s0 + %s12829_s28]]   ;;  %s12833_s28 = smov 37  }
  0x3a   :  { %14762 = sst [smem:[#allocation87_spill]] %s13027_s27 }
  0x3b   :  { %s13047_s27 = sld [smem:[%s14663_s0 + %s12828_s22]]   ;;  %s12832_s22 = smov 36  }
  0x3c   :  { %14764 = sst [smem:[#allocation89_spill]] %s13037_s5 }
  0x3d   :  { %s13057_s5 = sld [smem:[%s14663_s0 + %s12830_s7]]   ;;  %s12834_s7 = smov 38  }
  0x3e   :  { %s13062_s17 = sld [smem:[%s14663_s0 + %s12831_s15]]   ;;  %s12835_s15 = smov 39  }
  0x3f   :  { %s13072_s9 = sld [smem:[%s14663_s0 + %s12833_s28]]   ;;  %s12837_s28 = smov 41  }
  0x41   :  { %14766 = sst [smem:[#allocation91_spill]] %s13047_s27 }
  0x42   :  { %s13067_s27 = sld [smem:[%s14663_s0 + %s12832_s22]]   ;;  %s12836_s22 = smov 40  }
  0x43   :  { %14767 = sst [smem:[#allocation92_spill]] %s13057_s5 }
  0x44   :  { %14768 = sst [smem:[#allocation93_spill]] %s13062_s17 }
  0x45   :  { %14770 = sst [smem:[#allocation95_spill]] %s13072_s9 }
  0x46   :  { %s13077_s5 = sld [smem:[%s14663_s0 + %s12834_s7]]   ;;  %s12838_s7 = smov 42  }
  0x47   :  { %s13082_s17 = sld [smem:[%s14663_s0 + %s12835_s15]]   ;;  %s12839_s15 = smov 43  }
  0x48   :  { %14769 = sst [smem:[#allocation94_spill]] %s13067_s27 }
  0x49   :  { %s13087_s27 = sld [smem:[%s14663_s0 + %s12836_s22]]  }
  0x4a   :  { %s13092_s9 = sld [smem:[%s14663_s0 + %s12837_s28]]  }
  0x4c   :  { %14771 = sst [smem:[#allocation96_spill]] %s13077_s5 }
  0x4d   :  { %14772 = sst [smem:[#allocation97_spill]] %s13082_s17 }
  0x4e   :  { %s13097_s5 = sld [smem:[%s14663_s0 + %s12838_s7]]  }
  0x4f   :  { %s13102_s17 = sld [smem:[%s14663_s0 + %s12839_s15]]  }
  0x50   :  { %92 = vsyncpa [#allocation3], 0 }
  0x51   :  { %93 = vsyncpa [#allocation5], 0 }
  0x52   :  { %94 = vsyncpa [#allocation8], 0 }
  0x53   :  { %95 = vsyncpa [#allocation11], 0 }
  0x54   :  { %96 = vsyncpa [#allocation14], 0 }
  0x55   :  { %97 = vsyncpa [#allocation17], 0 }
  0x56   :  { %98 = vsyncpa [#allocation20], 0 }
  0x57   :  { %99 = vsyncpa [#allocation23], 0 }
  0x58   :  { %100 = vsyncpa [#allocation26], 0 }
  0x59   :  { %101 = vsyncpa [#allocation29], 0 }
  0x5a   :  { %102 = vsyncpa [#allocation32], 0 }
  0x5b   :  { %103 = vsyncpa [#allocation35], 0 }
  0x5c   :  { %104 = vsyncpa [#allocation38], 0 }
  0x5d   :  { %105 = vsyncpa [#allocation41], 0 }
  0x5e   :  { %106 = vsyncpa [#allocation44], 0 }
  0x5f   :  { %107 = vsyncpa [#allocation47], 0  ;;  %s13104_s22 = smov 0  }
  0x60 LB: > { %s14773_s14 = sld [smem:[#allocation88_spill]]  ;;  %s14774_s13 = sld [smem:[#allocation67_spill]]  ;;  %s12795_s22 = sphi %s13104_s22, %s113_s22  }
  0x61   : > { %s14775_s6 = sld [smem:[#allocation85_spill]]  ;;  %s14776_s4 = sld [smem:[#allocation82_spill]] }
  0x62   : > { %s14777_s3 = sld [smem:[#allocation90_spill]]  ;;  %s14778_s12 = sld [smem:[#allocation75_spill]] }
  0x63   : > { %s14779_s8 = sld [smem:[#allocation71_spill]]  ;;  %s12840_s0 = smov [#allocation4]  }
  0x64   : > { %s1075_s23 = sshll.u32 %s12840_s0, 4  ;;  %s14689_s26 = sadd.s32 4294967295, %s12795_s22   ;;  %s13118_s23 = int_to_ptr.vmem [resolvable:$true] %s1075_s23 }
  0x65   : > { %p9106_p0 = scmp.ge.s32.totalorder %s12795_s22, 1  ;;  %p1052_p1 = scmp.lt.s32.totalorder %s12795_s22, 3 }
  0x66   : > { %p13114_p2 = scmp.eq.s32.totalorder %s14689_s26, 0  ;;  %s12841_s2 = smov [#allocation7]  }
  0x67   : > { %p13120_p3 = pnand %p9106_p0, %p1052_p1  ;;  %s1102_s7 = sshll.u32 %s12841_s2, 4  ;;  %s13126_s7 = int_to_ptr.vmem [resolvable:$true] %s1102_s7 }
  0x68   : > { %s14780_s28 = scalar_select %p13114_p2, 1, 0 }
  0x69   : > { %s14781_s1 = scalar_select %p13120_p3, 1, 0 }
  0x6a   : > { %p11373_p4 = pneg %p13120_p3  ;;  %s12842_s11 = smov [#allocation10]  }
  0x6b   : > { %s1124_s15 = sshll.u32 %s12842_s11, 4  ;;  %s11857_s16 = scalar_lea.hbm %s14774_s13, 256  ;;  %s13134_s15 = int_to_ptr.vmem [resolvable:$true] %s1124_s15 }
  0x6c   : > { %p13130_p5 = pnand %p13114_p2, %p11373_p4  ;;  %p11858_p6 = scmp.ne.s32.totalorder %s14774_s13, %s11857_s16 }
  0x6d   : > { %p11864_p10 = scmp.lt.u32.totalorder %s11857_s16, %s14774_s13 }
  0x6e   : > { %p13140_p7 = pneg %p13130_p5 }
  0x70   : > { %p11860_p8 = pnand %p13140_p7, %p11858_p6 }
  0x72   : > { %p11861_p9 = pneg %p11860_p8 }
  0x74   : > { %p11866_p11 = pnand %p11864_p10, %p11861_p9 }
  0x76   : > { %11869 = shalt.err (!%p11866_p11)
}
  0x77   : > { %s11870_s0 = scalar_lea.vmem %s13118_s23, 256  ;;  %p11878_p1 = scmp.lt.s32.totalorder %s13118_s23, %s13118_s23 }
  0x78   : > { %p11871_p12 = scmp.ne.s32.totalorder %s13118_s23, %s11870_s0  ;;  %p11879_p4 = scmp.lt.s32.totalorder %s11870_s0, %s11870_s0 }
  0x7a   : > { %p11873_p13 = pnand %p11871_p12, %p13140_p7  ;;  %p11880_p2 = por %p11879_p4, %p11878_p1 }
  0x7c   : > { %p11874_p0 = pneg %p11873_p13 }
  0x7e   : > { %p11881_p3 = pnand %p11880_p2, %p11874_p0 }
  0x80   : > { %11884 = shalt.err (!%p11881_p3)
}
  0x81   : > { %s14690_s2 = smov 64   ;;  %s14692_s11 = smov 4  }
  0x82   : > { %11379 = dma.hbm_to_vmem [thread:$0]  (!%p13130_p5), %s14774_s13, 256, %s13118_s23, [#allocation5], %s14690_s2, %s14690_s2, %s14692_s11  }
  0x83   : > { %s11885_s16 = scalar_lea.hbm %s12907_s21, 64 }
  0x84   : > { %p11886_p6 = scmp.ne.s32.totalorder %s12907_s21, %s11885_s16  ;;  %p11892_p3 = scmp.lt.u32.totalorder %s11885_s16, %s12907_s21 }
  0x86   : > { %p11888_p8 = pnand %p11886_p6, %p13140_p7 }
  0x88   : > { %p11889_p2 = pneg %p11888_p8 }
  0x8a   : > { %p11894_p9 = pnand %p11892_p3, %p11889_p2 }
  0x8c   : > { %11897 = shalt.err (!%p11894_p9)
}
  0x8d   : > { %s11898_s0 = scalar_lea.vmem %s13126_s7, 64  ;;  %p11906_p13 = scmp.lt.s32.totalorder %s13126_s7, %s13126_s7 }
  0x8e   : > { %p11899_p10 = scmp.ne.s32.totalorder %s13126_s7, %s11898_s0  ;;  %p11907_p0 = scmp.lt.s32.totalorder %s11898_s0, %s11898_s0 }
  0x90   : > { %p11901_p11 = pnand %p11899_p10, %p13140_p7  ;;  %p11908_p1 = por %p11907_p0, %p11906_p13 }
  0x92   : > { %p11902_p12 = pneg %p11901_p11 }
  0x94   : > { %p11909_p4 = pnand %p11908_p1, %p11902_p12 }
  0x96   : > { %11912 = shalt.err (!%p11909_p4)
}
  0x97   : > { %11385 = dma.hbm_to_vmem [thread:$0]  (!%p13130_p5), %s12907_s21, 64, %s13126_s7, [#allocation8]  }
  0x98   : > { %s11913_s23 = scalar_lea.hbm %s12917_s29, 64 }
  0x99   : > { %p11914_p6 = scmp.ne.s32.totalorder %s12917_s29, %s11913_s23  ;;  %p11920_p3 = scmp.lt.u32.totalorder %s11913_s23, %s12917_s29 }
  0x9b   : > { %p11916_p8 = pnand %p11914_p6, %p13140_p7 }
  0x9d   : > { %p11917_p2 = pneg %p11916_p8 }
  0x9f   : > { %p11922_p9 = pnand %p11920_p3, %p11917_p2 }
  0xa1   : > { %11925 = shalt.err (!%p11922_p9)
}
  0xa2   : > { %s11926_s16 = scalar_lea.vmem %s13134_s15, 64  ;;  %p11934_p13 = scmp.lt.s32.totalorder %s13134_s15, %s13134_s15 }
  0xa3   : > { %p11927_p10 = scmp.ne.s32.totalorder %s13134_s15, %s11926_s16  ;;  %p11935_p0 = scmp.lt.s32.totalorder %s11926_s16, %s11926_s16 }
  0xa5   : > { %p11929_p11 = pnand %p11927_p10, %p13140_p7  ;;  %p11936_p1 = por %p11935_p0, %p11934_p13 }
  0xa7   : > { %p11930_p12 = pneg %p11929_p11 }
  0xa9   : > { %p11937_p4 = pnand %p11936_p1, %p11930_p12 }
  0xab   : > { %11940 = shalt.err (!%p11937_p4)
}
  0xac   : > { %11391 = dma.hbm_to_vmem [thread:$0]  (!%p13130_p5), %s12917_s29, 64, %s13134_s15, [#allocation11]  }
  0xad   : > { %s12845_s7 = smov [#allocation13]   ;;  %s12846_s23 = smov [#allocation16]  }
  0xae   : > { %s1145_s0 = sshll.u32 %s12845_s7, 4  ;;  %s1172_s26 = sshll.u32 %s12846_s23, 4  ;;  %s1146_s0 = int_to_ptr.vmem [resolvable:$true] %s1145_s0  ;;  %s1173_s26 = int_to_ptr.vmem [resolvable:$true] %s1172_s26 }
  0xaf   : > { %s11941_s2 = scalar_lea.hbm %s14779_s8, 256 }
  0xb0   : > { %p11942_p6 = scmp.ne.s32.totalorder %s14779_s8, %s11941_s2  ;;  %p11948_p3 = scmp.lt.u32.totalorder %s11941_s2, %s14779_s8 }
  0xb2   : > { %p11944_p8 = pnand %p11942_p6, %p13140_p7 }
  0xb4   : > { %p11945_p2 = pneg %p11944_p8 }
  0xb6   : > { %p11950_p9 = pnand %p11948_p3, %p11945_p2 }
  0xb8   : > { %11953 = shalt.err (!%p11950_p9)
}
  0xb9   : > { %s11954_s16 = scalar_lea.vmem %s1146_s0, 256  ;;  %p11962_p13 = scmp.lt.s32.totalorder %s1146_s0, %s1146_s0 }
  0xba   : > { %p11955_p10 = scmp.ne.s32.totalorder %s1146_s0, %s11954_s16  ;;  %p11963_p0 = scmp.lt.s32.totalorder %s11954_s16, %s11954_s16 }
  0xbc   : > { %p11957_p11 = pnand %p11955_p10, %p13140_p7  ;;  %p11964_p1 = por %p11963_p0, %p11962_p13 }
  0xbe   : > { %p11958_p12 = pneg %p11957_p11 }
  0xc0   : > { %p11965_p4 = pnand %p11964_p1, %p11958_p12 }
  0xc2   : > { %11968 = shalt.err (!%p11965_p4)
}
  0xc3   : > { %s14784_s15 = smov 64   ;;  %s11969_s2 = scalar_lea.hbm %s12937_s19, 32 }
  0xc4   : > { %11397 = dma.hbm_to_vmem [thread:$0]  (!%p13130_p5), %s14779_s8, 256, %s1146_s0, [#allocation14], %s14784_s15, %s14784_s15, %s14692_s11  }
  0xc5   : > { %p11970_p6 = scmp.ne.s32.totalorder %s12937_s19, %s11969_s2  ;;  %p11976_p3 = scmp.lt.u32.totalorder %s11969_s2, %s12937_s19 }
  0xc7   : > { %p11972_p8 = pnand %p11970_p6, %p13140_p7 }
  0xc9   : > { %p11973_p2 = pneg %p11972_p8 }
  0xcb   : > { %p11978_p9 = pnand %p11976_p3, %p11973_p2 }
  0xcd   : > { %11981 = shalt.err (!%p11978_p9)
}
  0xce   : > { %s11982_s7 = scalar_lea.vmem %s1173_s26, 32  ;;  %p11990_p13 = scmp.lt.s32.totalorder %s1173_s26, %s1173_s26 }
  0xcf   : > { %p11983_p10 = scmp.ne.s32.totalorder %s1173_s26, %s11982_s7  ;;  %p11991_p0 = scmp.lt.s32.totalorder %s11982_s7, %s11982_s7 }
  0xd1   : > { %p11985_p11 = pnand %p11983_p10, %p13140_p7  ;;  %p11992_p1 = por %p11991_p0, %p11990_p13 }
  0xd3   : > { %p11986_p12 = pneg %p11985_p11 }
  0xd5   : > { %p11993_p4 = pnand %p11992_p1, %p11986_p12 }
  0xd7   : > { %11996 = shalt.err (!%p11993_p4)
}
  0xd8   : > { %11403 = dma.hbm_to_vmem [thread:$0]  (!%p13130_p5), %s12937_s19, 32, %s1173_s26, [#allocation17]  }
  0xd9   : > { %s12847_s0 = smov [#allocation19]   ;;  %s12848_s16 = smov [#allocation22]  }
  0xda   : > { %s1195_s23 = sshll.u32 %s12847_s0, 4  ;;  %s1221_s2 = sshll.u32 %s12848_s16, 4  ;;  %s1196_s23 = int_to_ptr.vmem [resolvable:$true] %s1195_s23  ;;  %s1222_s2 = int_to_ptr.vmem [resolvable:$true] %s1221_s2 }
  0xdb   : > { %s11997_s11 = scalar_lea.hbm %s12947_s30, 128 }
  0xdc   : > { %p11998_p6 = scmp.ne.s32.totalorder %s12947_s30, %s11997_s11  ;;  %p12004_p3 = scmp.lt.u32.totalorder %s11997_s11, %s12947_s30 }
  0xde   : > { %p12000_p8 = pnand %p11998_p6, %p13140_p7 }
  0xe0   : > { %p12001_p2 = pneg %p12000_p8 }
  0xe2   : > { %p12006_p9 = pnand %p12004_p3, %p12001_p2 }
  0xe4   : > { %12009 = shalt.err (!%p12006_p9)
}
  0xe5   : > { %s12010_s7 = scalar_lea.vmem %s1196_s23, 128  ;;  %p12018_p13 = scmp.lt.s32.totalorder %s1196_s23, %s1196_s23 }
  0xe6   : > { %p12011_p10 = scmp.ne.s32.totalorder %s1196_s23, %s12010_s7  ;;  %p12019_p0 = scmp.lt.s32.totalorder %s12010_s7, %s12010_s7 }
  0xe8   : > { %p12013_p11 = pnand %p12011_p10, %p13140_p7  ;;  %p12020_p1 = por %p12019_p0, %p12018_p13 }
  0xea   : > { %p12014_p12 = pneg %p12013_p11 }
  0xec   : > { %p12021_p4 = pnand %p12020_p1, %p12014_p12 }
  0xee   : > { %12024 = shalt.err (!%p12021_p4)
}
  0xef   : > { %s14785_s26 = smov 4   ;;  %s12025_s11 = scalar_lea.hbm %s14778_s12, 384 }
  0xf0   : > { %11409 = dma.hbm_to_vmem [thread:$0]  (!%p13130_p5), %s12947_s30, 128, %s1196_s23, [#allocation20], %s14784_s15, %s14784_s15, %s14785_s26  }
  0xf1   : > { %p12026_p6 = scmp.ne.s32.totalorder %s14778_s12, %s12025_s11  ;;  %p12032_p3 = scmp.lt.u32.totalorder %s12025_s11, %s14778_s12 }
  0xf3   : > { %p12028_p8 = pnand %p12026_p6, %p13140_p7 }
  0xf5   : > { %p12029_p2 = pneg %p12028_p8 }
  0xf7   : > { %p12034_p9 = pnand %p12032_p3, %p12029_p2 }
  0xf9   : > { %12037 = shalt.err (!%p12034_p9)
}
  0xfa   : > { %s12038_s0 = scalar_lea.vmem %s1222_s2, 384  ;;  %p12046_p13 = scmp.lt.s32.totalorder %s1222_s2, %s1222_s2 }
  0xfb   : > { %p12039_p10 = scmp.ne.s32.totalorder %s1222_s2, %s12038_s0  ;;  %p12047_p0 = scmp.lt.s32.totalorder %s12038_s0, %s12038_s0 }
  0xfd   : > { %p12041_p11 = pnand %p12039_p10, %p13140_p7  ;;  %p12048_p1 = por %p12047_p0, %p12046_p13 }
  0xff   : > { %p12042_p12 = pneg %p12041_p11 }
 0x101   : > { %p12049_p4 = pnand %p12048_p1, %p12042_p12 }
 0x103   : > { %12052 = shalt.err (!%p12049_p4)
}
 0x104   : > { %11415 = dma.hbm_to_vmem [thread:$0]  (!%p13130_p5), %s14778_s12, 384, %s1222_s2, [#allocation23], %s14784_s15, %s14784_s15, %s14785_s26  }
 0x105   : > { %s12849_s23 = smov [#allocation25]   ;;  %s12053_s7 = scalar_lea.hbm %s14776_s4, 16 }
 0x106   : > { %s1261_s16 = sshll.u32 %s12849_s23, 4  ;;  %p12054_p6 = scmp.ne.s32.totalorder %s14776_s4, %s12053_s7  ;;  %s1262_s16 = int_to_ptr.vmem [resolvable:$true] %s1261_s16 }
 0x107   : > { %p12060_p3 = scmp.lt.u32.totalorder %s12053_s7, %s14776_s4 }
 0x108   : > { %p12056_p8 = pnand %p12054_p6, %p13140_p7 }
 0x10a   : > { %p12057_p2 = pneg %p12056_p8 }
 0x10c   : > { %p12062_p9 = pnand %p12060_p3, %p12057_p2 }
 0x10e   : > { %12065 = shalt.err (!%p12062_p9)
}
 0x10f   : > { %s12066_s11 = scalar_lea.vmem %s1262_s16, 16  ;;  %s12073_s0 = scalar_lea.vmem %s1262_s16, 32 }
 0x110   : > { %p12067_p10 = scmp.ne.s32.totalorder %s1262_s16, %s12066_s11  ;;  %p12074_p13 = scmp.lt.s32.totalorder %s1262_s16, %s1262_s16 }
 0x111   : > { %p12075_p0 = scmp.lt.s32.totalorder %s12073_s0, %s12066_s11 }
 0x112   : > { %p12069_p11 = pnand %p12067_p10, %p13140_p7 }
 0x113   : > { %p12076_p1 = por %p12075_p0, %p12074_p13 }
 0x114   : > { %p12070_p12 = pneg %p12069_p11 }
 0x116   : > { %p12077_p4 = pnand %p12076_p1, %p12070_p12 }
 0x118   : > { %12080 = shalt.err (!%p12077_p4)
}
 0x119   : > { %11421 = dma.hbm_to_vmem [thread:$0]  (!%p13130_p5), %s14776_s4, 16, %s1262_s16, [#allocation26]  }
 0x11a   : > { %s12850_s2 = smov [#allocation28]   ;;  %s12851_s7 = smov [#allocation31]  }
 0x11b   : > { %s1284_s23 = sshll.u32 %s12850_s2, 4  ;;  %s1309_s8 = sshll.u32 %s12851_s7, 4  ;;  %s1285_s23 = int_to_ptr.vmem [resolvable:$true] %s1284_s23  ;;  %s13249_s8 = int_to_ptr.vmem [resolvable:$true] %s1309_s8 }
 0x11c   : > { %s12081_s12 = scalar_lea.hbm %s13002_s20, 2048 }
 0x11d   : > { %p12082_p6 = scmp.ne.s32.totalorder %s13002_s20, %s12081_s12  ;;  %p12088_p3 = scmp.lt.u32.totalorder %s12081_s12, %s13002_s20 }
 0x11f   : > { %p12084_p8 = pnand %p12082_p6, %p13140_p7 }
 0x121   : > { %p12085_p2 = pneg %p12084_p8 }
 0x123   : > { %p12090_p9 = pnand %p12088_p3, %p12085_p2 }
 0x125   : > { %12093 = shalt.err (!%p12090_p9)
}
 0x126   : > { %s12094_s11 = scalar_lea.vmem %s1285_s23, 2048  ;;  %p12102_p13 = scmp.lt.s32.totalorder %s1285_s23, %s1285_s23 }
 0x127   : > { %p12095_p10 = scmp.ne.s32.totalorder %s1285_s23, %s12094_s11  ;;  %p12103_p0 = scmp.lt.s32.totalorder %s12094_s11, %s12094_s11 }
 0x129   : > { %p12097_p11 = pnand %p12095_p10, %p13140_p7  ;;  %p12104_p1 = por %p12103_p0, %p12102_p13 }
 0x12b   : > { %p12098_p12 = pneg %p12097_p11 }
 0x12d   : > { %p12105_p4 = pnand %p12104_p1, %p12098_p12 }
 0x12f   : > { %12108 = shalt.err (!%p12105_p4)
}
 0x130   : > { %s14696_s16 = smov 128   ;;  %s14698_s12 = smov 8  }
 0x131   : > { %11427 = dma.hbm_to_vmem [thread:$0]  (!%p13130_p5), %s13002_s20, 2048, %s1285_s23, [#allocation29], %s14696_s16, %s14696_s16, %s14698_s12  }
 0x132   : > { %s12109_s0 = scalar_lea.hbm %s14775_s6, 64 }
 0x133   : > { %p12110_p6 = scmp.ne.s32.totalorder %s14775_s6, %s12109_s0  ;;  %p12116_p3 = scmp.lt.u32.totalorder %s12109_s0, %s14775_s6 }
 0x135   : > { %p12112_p8 = pnand %p12110_p6, %p13140_p7 }
 0x137   : > { %p12113_p2 = pneg %p12112_p8 }
 0x139   : > { %p12118_p9 = pnand %p12116_p3, %p12113_p2 }
 0x13b   : > { %12121 = shalt.err (!%p12118_p9)
}
 0x13c   : > { %s12122_s2 = scalar_lea.vmem %s13249_s8, 64  ;;  %p12130_p13 = scmp.lt.s32.totalorder %s13249_s8, %s13249_s8 }
 0x13d   : > { %p12123_p10 = scmp.ne.s32.totalorder %s13249_s8, %s12122_s2  ;;  %p12131_p0 = scmp.lt.s32.totalorder %s12122_s2, %s12122_s2 }
 0x13f   : > { %p12125_p11 = pnand %p12123_p10, %p13140_p7  ;;  %p12132_p1 = por %p12131_p0, %p12130_p13 }
 0x141   : > { %p12126_p12 = pneg %p12125_p11 }
 0x143   : > { %p12133_p4 = pnand %p12132_p1, %p12126_p12 }
 0x145   : > { %12136 = shalt.err (!%p12133_p4)
}
 0x146   : > { %11433 = dma.hbm_to_vmem [thread:$0]  (!%p13130_p5), %s14775_s6, 64, %s13249_s8, [#allocation32]  }
 0x147   : > { %s12854_s23 = smov [#allocation34]   ;;  %s12855_s11 = smov [#allocation37]  }
 0x148   : > { %s1331_s7 = sshll.u32 %s12854_s23, 4  ;;  %s1354_s0 = sshll.u32 %s12855_s11, 4  ;;  %s1332_s7 = int_to_ptr.vmem [resolvable:$true] %s1331_s7  ;;  %s13279_s0 = int_to_ptr.vmem [resolvable:$true] %s1354_s0 }
 0x149   : > { %s12137_s2 = scalar_lea.hbm %s13022_s24, 16 }
 0x14a   : > { %p12138_p6 = scmp.ne.s32.totalorder %s13022_s24, %s12137_s2  ;;  %p12144_p3 = scmp.lt.u32.totalorder %s12137_s2, %s13022_s24 }
 0x14c   : > { %p12140_p8 = pnand %p12138_p6, %p13140_p7 }
 0x14e   : > { %p12141_p2 = pneg %p12140_p8 }
 0x150   : > { %p12146_p9 = pnand %p12144_p3, %p12141_p2 }
 0x152   : > { %12149 = shalt.err (!%p12146_p9)
}
 0x153   : > { %s12150_s16 = scalar_lea.vmem %s1332_s7, 16  ;;  %s12157_s8 = scalar_lea.vmem %s1332_s7, 32 }
 0x154   : > { %p12151_p10 = scmp.ne.s32.totalorder %s1332_s7, %s12150_s16  ;;  %p12158_p13 = scmp.lt.s32.totalorder %s1332_s7, %s1332_s7 }
 0x155   : > { %p12159_p0 = scmp.lt.s32.totalorder %s12157_s8, %s12150_s16 }
 0x156   : > { %p12153_p11 = pnand %p12151_p10, %p13140_p7 }
 0x157   : > { %p12160_p1 = por %p12159_p0, %p12158_p13 }
 0x158   : > { %p12154_p12 = pneg %p12153_p11 }
 0x15a   : > { %p12161_p4 = pnand %p12160_p1, %p12154_p12 }
 0x15c   : > { %12164 = shalt.err (!%p12161_p4)
}
 0x15d   : > { %11439 = dma.hbm_to_vmem [thread:$0]  (!%p13130_p5), %s13022_s24, 16, %s1332_s7, [#allocation35]  }
 0x15e   : > { %s12165_s23 = scalar_lea.hbm %s14773_s14, 1024 }
 0x15f   : > { %p12166_p6 = scmp.ne.s32.totalorder %s14773_s14, %s12165_s23  ;;  %p12172_p3 = scmp.lt.u32.totalorder %s12165_s23, %s14773_s14 }
 0x161   : > { %p12168_p8 = pnand %p12166_p6, %p13140_p7 }
 0x163   : > { %p12169_p2 = pneg %p12168_p8 }
 0x165   : > { %p12174_p9 = pnand %p12172_p3, %p12169_p2 }
 0x167   : > { %12177 = shalt.err (!%p12174_p9)
}
 0x168   : > { %s12178_s16 = scalar_lea.vmem %s13279_s0, 1024  ;;  %p12186_p13 = scmp.lt.s32.totalorder %s13279_s0, %s13279_s0 }
 0x169   : > { %p12179_p10 = scmp.ne.s32.totalorder %s13279_s0, %s12178_s16  ;;  %p12187_p0 = scmp.lt.s32.totalorder %s12178_s16, %s12178_s16 }
 0x16b   : > { %p12181_p11 = pnand %p12179_p10, %p13140_p7  ;;  %p12188_p1 = por %p12187_p0, %p12186_p13 }
 0x16d   : > { %p12182_p12 = pneg %p12181_p11 }
 0x16f   : > { %p12189_p4 = pnand %p12188_p1, %p12182_p12 }
 0x171   : > { %12192 = shalt.err (!%p12189_p4)
}
 0x172   : > { %11445 = dma.hbm_to_vmem [thread:$0]  (!%p13130_p5), %s14773_s14, 1024, %s13279_s0, [#allocation38], %s14784_s15, %s14784_s15, %s14785_s26  }
 0x173   : > { %s12856_s7 = smov [#allocation40]   ;;  %s12857_s2 = smov [#allocation43]  }
 0x174   : > { %s1380_s11 = sshll.u32 %s12856_s7, 4  ;;  %s1406_s8 = sshll.u32 %s12857_s2, 4  ;;  %s1381_s11 = int_to_ptr.vmem [resolvable:$true] %s1380_s11  ;;  %s13309_s8 = int_to_ptr.vmem [resolvable:$true] %s1406_s8 }
 0x175   : > { %s12193_s23 = scalar_lea.hbm %s14777_s3, 2048 }
 0x176   : > { %p12194_p6 = scmp.ne.s32.totalorder %s14777_s3, %s12193_s23  ;;  %p12200_p3 = scmp.lt.u32.totalorder %s12193_s23, %s14777_s3 }
 0x178   : > { %p12196_p8 = pnand %p12194_p6, %p13140_p7 }
 0x17a   : > { %p12197_p2 = pneg %p12196_p8 }
 0x17c   : > { %p12202_p9 = pnand %p12200_p3, %p12197_p2 }
 0x17e   : > { %12205 = shalt.err (!%p12202_p9)
}
 0x17f   : > { %s12206_s16 = scalar_lea.vmem %s1381_s11, 2048  ;;  %p12214_p13 = scmp.lt.s32.totalorder %s1381_s11, %s1381_s11 }
 0x180   : > { %p12207_p10 = scmp.ne.s32.totalorder %s1381_s11, %s12206_s16  ;;  %p12215_p0 = scmp.lt.s32.totalorder %s12206_s16, %s12206_s16 }
 0x182   : > { %p12209_p11 = pnand %p12207_p10, %p13140_p7  ;;  %p12216_p1 = por %p12215_p0, %p12214_p13 }
 0x184   : > { %p12210_p12 = pneg %p12209_p11 }
 0x186   : > { %p12217_p4 = pnand %p12216_p1, %p12210_p12 }
 0x188   : > { %12220 = shalt.err (!%p12217_p4)
}
 0x189   : > { %s14786_s0 = smov 128   ;;  %s12221_s7 = scalar_lea.hbm %s13052_s25, 128 }
 0x18a   : > { %11451 = dma.hbm_to_vmem [thread:$0]  (!%p13130_p5), %s14777_s3, 2048, %s1381_s11, [#allocation41], %s14786_s0, %s14786_s0, %s14698_s12  }
 0x18b   : > { %p12222_p6 = scmp.ne.s32.totalorder %s13052_s25, %s12221_s7  ;;  %p12228_p3 = scmp.lt.u32.totalorder %s12221_s7, %s13052_s25 }
 0x18d   : > { %p12224_p8 = pnand %p12222_p6, %p13140_p7 }
 0x18f   : > { %p12225_p2 = pneg %p12224_p8 }
 0x191   : > { %p12230_p9 = pnand %p12228_p3, %p12225_p2 }
 0x193   : > { %12233 = shalt.err (!%p12230_p9)
}
 0x194   : > { %s12234_s2 = scalar_lea.vmem %s13309_s8, 128  ;;  %p12242_p13 = scmp.lt.s32.totalorder %s13309_s8, %s13309_s8 }
 0x195   : > { %p12235_p10 = scmp.ne.s32.totalorder %s13309_s8, %s12234_s2  ;;  %p12243_p0 = scmp.lt.s32.totalorder %s12234_s2, %s12234_s2 }
 0x197   : > { %p12237_p11 = pnand %p12235_p10, %p13140_p7  ;;  %p12244_p1 = por %p12243_p0, %p12242_p13 }
 0x199   : > { %p12238_p12 = pneg %p12237_p11 }
 0x19b   : > { %p12245_p4 = pnand %p12244_p1, %p12238_p12 }
 0x19d   : > { %12248 = shalt.err (!%p12245_p4)
}
 0x19e   : > { %s14787_s11 = sld [smem:[#allocation95_spill]]  ;;  %s12858_s23 = smov [#allocation46]  }
 0x19f   : > { %11457 = dma.hbm_to_vmem [thread:$0]  (!%p13130_p5), %s13052_s25, 128, %s13309_s8, [#allocation44], %s14784_s15, %s14784_s15, %s14785_s26  }
 0x1a0   : > { %s1439_s16 = sshll.u32 %s12858_s23, 4  ;;  %s12859_s7 = smov [#allocation2]   ;;  %s1440_s16 = int_to_ptr.vmem [resolvable:$true] %s1439_s16 }
 0x1a1   : > { %s1065_s12 = sshll.u32 %s12859_s7, 4  ;;  %s13342_s12 = int_to_ptr.vmem [resolvable:$true] %s1065_s12 }
 0x1a4   : > { %s12249_s2 = scalar_lea.hbm %s14787_s11, 16 }
 0x1a5   : > { %p12250_p6 = scmp.ne.s32.totalorder %s14787_s11, %s12249_s2  ;;  %p12256_p3 = scmp.lt.u32.totalorder %s12249_s2, %s14787_s11 }
 0x1a7   : > { %p12252_p8 = pnand %p12250_p6, %p13140_p7 }
 0x1a9   : > { %p12253_p2 = pneg %p12252_p8 }
 0x1ab   : > { %p12258_p9 = pnand %p12256_p3, %p12253_p2 }
 0x1ad   : > { %12261 = shalt.err (!%p12258_p9)
}
 0x1ae   : > { %s12262_s3 = scalar_lea.vmem %s1440_s16, 16  ;;  %s12269_s8 = scalar_lea.vmem %s1440_s16, 32 }
 0x1af   : > { %p12263_p10 = scmp.ne.s32.totalorder %s1440_s16, %s12262_s3  ;;  %p12270_p13 = scmp.lt.s32.totalorder %s1440_s16, %s1440_s16 }
 0x1b0   : > { %p12271_p0 = scmp.lt.s32.totalorder %s12269_s8, %s12262_s3 }
 0x1b1   : > { %p12265_p11 = pnand %p12263_p10, %p13140_p7 }
 0x1b2   : > { %p12272_p1 = por %p12271_p0, %p12270_p13 }
 0x1b3   : > { %p12266_p12 = pneg %p12265_p11 }
 0x1b5   : > { %p12273_p4 = pnand %p12272_p1, %p12266_p12 }
 0x1b7   : > { %12276 = shalt.err (!%p12273_p4)
}
 0x1b8   : > { %s14788_s23 = sld [smem:[#allocation66_spill]] }
 0x1b9   : > { %11463 = dma.hbm_to_vmem [thread:$0]  (!%p13130_p5), %s14787_s11, 16, %s1440_s16, [#allocation47]  }
 0x1be   : > { %s12277_s7 = scalar_lea.hbm %s14788_s23, 16 }
 0x1bf   : > { %p12278_p6 = scmp.ne.s32.totalorder %s14788_s23, %s12277_s7  ;;  %p12284_p3 = scmp.lt.u32.totalorder %s12277_s7, %s14788_s23 }
 0x1c1   : > { %p12280_p8 = pnand %p12278_p6, %p13140_p7 }
 0x1c3   : > { %p12281_p2 = pneg %p12280_p8 }
 0x1c5   : > { %p12286_p9 = pnand %p12284_p3, %p12281_p2 }
 0x1c7   : > { %12289 = shalt.err (!%p12286_p9)
}
 0x1c8   : > { %s12290_s3 = scalar_lea.vmem %s13342_s12, 16  ;;  %s12297_s2 = scalar_lea.vmem %s13342_s12, 32 }
 0x1c9   : > { %p12291_p10 = scmp.ne.s32.totalorder %s13342_s12, %s12290_s3  ;;  %p12298_p13 = scmp.lt.s32.totalorder %s13342_s12, %s13342_s12 }
 0x1ca   : > { %p12299_p0 = scmp.lt.s32.totalorder %s12297_s2, %s12290_s3 }
 0x1cb   : > { %p12293_p11 = pnand %p12291_p10, %p13140_p7 }
 0x1cc   : > { %p12300_p1 = por %p12299_p0, %p12298_p13 }
 0x1cd   : > { %p12294_p12 = pneg %p12293_p11 }
 0x1cf   : > { %p12301_p4 = pnand %p12300_p1, %p12294_p12 }
 0x1d1   : > { %12304 = shalt.err (!%p12301_p4)
}
 0x1d2   : > { %s14789_s16 = sld [smem:[#allocation68_spill]]  ;;  %s12860_s8 = smov [#allocation6]  }
 0x1d3   : > { %11376 = dma.hbm_to_vmem [thread:$0]  (!%p13130_p5), %s14788_s23, 16, %s13342_s12, [#allocation3]  }
 0x1d4   : > { %s1088_s7 = sshll.u32 %s12860_s8, 4  ;;  %s12861_s4 = smov [#allocation9]   ;;  %s1089_s7 = int_to_ptr.vmem [resolvable:$true] %s1088_s7 }
 0x1d5   : > { %s1113_s6 = sshll.u32 %s12861_s4, 4  ;;  %s1114_s6 = int_to_ptr.vmem [resolvable:$true] %s1113_s6 }
 0x1d8   : > { %s12305_s11 = scalar_lea.hbm %s14789_s16, 512 }
 0x1d9   : > { %p12306_p6 = scmp.ne.s32.totalorder %s14789_s16, %s12305_s11  ;;  %p12312_p3 = scmp.lt.u32.totalorder %s12305_s11, %s14789_s16 }
 0x1db   : > { %p12308_p8 = pnand %p12306_p6, %p13140_p7 }
 0x1dd   : > { %p12309_p2 = pneg %p12308_p8 }
 0x1df   : > { %p12314_p9 = pnand %p12312_p3, %p12309_p2 }
 0x1e1   : > { %12317 = shalt.err (!%p12314_p9)
}
 0x1e2   : > { %s12318_s3 = scalar_lea.vmem %s1089_s7, 512  ;;  %p12326_p13 = scmp.lt.s32.totalorder %s1089_s7, %s1089_s7 }
 0x1e3   : > { %p12319_p10 = scmp.ne.s32.totalorder %s1089_s7, %s12318_s3  ;;  %p12327_p0 = scmp.lt.s32.totalorder %s12318_s3, %s12318_s3 }
 0x1e5   : > { %p12321_p11 = pnand %p12319_p10, %p13140_p7  ;;  %p12328_p1 = por %p12327_p0, %p12326_p13 }
 0x1e7   : > { %p12322_p12 = pneg %p12321_p11 }
 0x1e9   : > { %p12329_p4 = pnand %p12328_p1, %p12322_p12 }
 0x1eb   : > { %12332 = shalt.err (!%p12329_p4)
}
 0x1ec   : > { %s14790_s4 = smov 8   ;;  %s14791_s12 = sld [smem:[#allocation69_spill]] }
 0x1ed   : > { %11382 = dma.hbm_to_vmem [thread:$0]  (!%p13130_p5), %s14789_s16, 512, %s1089_s7, [#allocation5], %s14786_s0, %s14786_s0, %s14790_s4  }
 0x1f2   : > { %s12333_s11 = scalar_lea.hbm %s14791_s12, 128 }
 0x1f3   : > { %p12334_p6 = scmp.ne.s32.totalorder %s14791_s12, %s12333_s11  ;;  %p12340_p3 = scmp.lt.u32.totalorder %s12333_s11, %s14791_s12 }
 0x1f5   : > { %p12336_p8 = pnand %p12334_p6, %p13140_p7 }
 0x1f7   : > { %p12337_p2 = pneg %p12336_p8 }
 0x1f9   : > { %p12342_p9 = pnand %p12340_p3, %p12337_p2 }
 0x1fb   : > { %12345 = shalt.err (!%p12342_p9)
}
 0x1fc   : > { %s12346_s2 = scalar_lea.vmem %s1114_s6, 128  ;;  %p12354_p13 = scmp.lt.s32.totalorder %s1114_s6, %s1114_s6 }
 0x1fd   : > { %p12347_p10 = scmp.ne.s32.totalorder %s1114_s6, %s12346_s2  ;;  %p12355_p0 = scmp.lt.s32.totalorder %s12346_s2, %s12346_s2 }
 0x1ff   : > { %p12349_p11 = pnand %p12347_p10, %p13140_p7  ;;  %p12356_p1 = por %p12355_p0, %p12354_p13 }
 0x201   : > { %p12350_p12 = pneg %p12349_p11 }
 0x203   : > { %p12357_p4 = pnand %p12356_p1, %p12350_p12 }
 0x205   : > { %12360 = shalt.err (!%p12357_p4)
}
 0x206   : > { %s14792_s8 = sld [smem:[#allocation70_spill]]  ;;  %s12862_s7 = smov [#allocation12]  }
 0x207   : > { %11388 = dma.hbm_to_vmem [thread:$0]  (!%p13130_p5), %s14791_s12, 128, %s1114_s6, [#allocation8]  }
 0x208   : > { %s1135_s3 = sshll.u32 %s12862_s7, 4  ;;  %s12863_s11 = smov [#allocation15]   ;;  %s1136_s3 = int_to_ptr.vmem [resolvable:$true] %s1135_s3 }
 0x209   : > { %s1158_s13 = sshll.u32 %s12863_s11, 4  ;;  %s1159_s13 = int_to_ptr.vmem [resolvable:$true] %s1158_s13 }
 0x20c   : > { %s12361_s14 = scalar_lea.hbm %s14792_s8, 16 }
 0x20d   : > { %p12362_p6 = scmp.ne.s32.totalorder %s14792_s8, %s12361_s14  ;;  %p12368_p3 = scmp.lt.u32.totalorder %s12361_s14, %s14792_s8 }
 0x20f   : > { %p12364_p8 = pnand %p12362_p6, %p13140_p7 }
 0x211   : > { %p12365_p2 = pneg %p12364_p8 }
 0x213   : > { %p12370_p9 = pnand %p12368_p3, %p12365_p2 }
 0x215   : > { %12373 = shalt.err (!%p12370_p9)
}
 0x216   : > { %s12374_s2 = scalar_lea.vmem %s1136_s3, 16  ;;  %s12381_s6 = scalar_lea.vmem %s1136_s3, 32 }
 0x217   : > { %p12375_p10 = scmp.ne.s32.totalorder %s1136_s3, %s12374_s2  ;;  %p12382_p13 = scmp.lt.s32.totalorder %s1136_s3, %s1136_s3 }
 0x218   : > { %p12383_p0 = scmp.lt.s32.totalorder %s12381_s6, %s12374_s2 }
 0x219   : > { %p12377_p11 = pnand %p12375_p10, %p13140_p7 }
 0x21a   : > { %p12384_p1 = por %p12383_p0, %p12382_p13 }
 0x21b   : > { %p12378_p12 = pneg %p12377_p11 }
 0x21d   : > { %p12385_p4 = pnand %p12384_p1, %p12378_p12 }
 0x21f   : > { %12388 = shalt.err (!%p12385_p4)
}
 0x220   : > { %s14793_s7 = sld [smem:[#allocation72_spill]] }
 0x221   : > { %11394 = dma.hbm_to_vmem [thread:$0]  (!%p13130_p5), %s14792_s8, 16, %s1136_s3, [#allocation11]  }
 0x226   : > { %s12389_s14 = scalar_lea.hbm %s14793_s7, 256 }
 0x227   : > { %p12390_p6 = scmp.ne.s32.totalorder %s14793_s7, %s12389_s14  ;;  %p12396_p3 = scmp.lt.u32.totalorder %s12389_s14, %s14793_s7 }
 0x229   : > { %p12392_p8 = pnand %p12390_p6, %p13140_p7 }
 0x22b   : > { %p12393_p2 = pneg %p12392_p8 }
 0x22d   : > { %p12398_p9 = pnand %p12396_p3, %p12393_p2 }
 0x22f   : > { %12401 = shalt.err (!%p12398_p9)
}
 0x230   : > { %s12402_s11 = scalar_lea.vmem %s1159_s13, 256  ;;  %p12410_p13 = scmp.lt.s32.totalorder %s1159_s13, %s1159_s13 }
 0x231   : > { %p12403_p10 = scmp.ne.s32.totalorder %s1159_s13, %s12402_s11  ;;  %p12411_p0 = scmp.lt.s32.totalorder %s12402_s11, %s12402_s11 }
 0x233   : > { %p12405_p11 = pnand %p12403_p10, %p13140_p7  ;;  %p12412_p1 = por %p12411_p0, %p12410_p13 }
 0x235   : > { %p12406_p12 = pneg %p12405_p11 }
 0x237   : > { %p12413_p4 = pnand %p12412_p1, %p12406_p12 }
 0x239   : > { %12416 = shalt.err (!%p12413_p4)
}
 0x23a   : > { %s14794_s3 = sld [smem:[#allocation73_spill]]  ;;  %s12864_s2 = smov [#allocation18]  }
 0x23b   : > { %11400 = dma.hbm_to_vmem [thread:$0]  (!%p13130_p5), %s14793_s7, 256, %s1159_s13, [#allocation14], %s14784_s15, %s14784_s15, %s14785_s26  }
 0x23c   : > { %s1182_s6 = sshll.u32 %s12864_s2, 4  ;;  %s12865_s14 = smov [#allocation21]   ;;  %s1183_s6 = int_to_ptr.vmem [resolvable:$true] %s1182_s6 }
 0x23d   : > { %s1208_s8 = sshll.u32 %s12865_s14, 4  ;;  %s1209_s8 = int_to_ptr.vmem [resolvable:$true] %s1208_s8 }
 0x240   : > { %s12417_s11 = scalar_lea.hbm %s14794_s3, 512 }
 0x241   : > { %p12418_p6 = scmp.ne.s32.totalorder %s14794_s3, %s12417_s11  ;;  %p12424_p3 = scmp.lt.u32.totalorder %s12417_s11, %s14794_s3 }
 0x243   : > { %p12420_p8 = pnand %p12418_p6, %p13140_p7 }
 0x245   : > { %p12421_p2 = pneg %p12420_p8 }
 0x247   : > { %p12426_p9 = pnand %p12424_p3, %p12421_p2 }
 0x249   : > { %12429 = shalt.err (!%p12426_p9)
}
 0x24a   : > { %s12430_s12 = scalar_lea.vmem %s1183_s6, 512  ;;  %p12438_p13 = scmp.lt.s32.totalorder %s1183_s6, %s1183_s6 }
 0x24b   : > { %p12431_p10 = scmp.ne.s32.totalorder %s1183_s6, %s12430_s12  ;;  %p12439_p0 = scmp.lt.s32.totalorder %s12430_s12, %s12430_s12 }
 0x24d   : > { %p12433_p11 = pnand %p12431_p10, %p13140_p7  ;;  %p12440_p1 = por %p12439_p0, %p12438_p13 }
 0x24f   : > { %p12434_p12 = pneg %p12433_p11 }
 0x251   : > { %p12441_p4 = pnand %p12440_p1, %p12434_p12 }
 0x253   : > { %12444 = shalt.err (!%p12441_p4)
}
 0x254   : > { %s14795_s13 = sld [smem:[#allocation74_spill]] }
 0x255   : > { %11406 = dma.hbm_to_vmem [thread:$0]  (!%p13130_p5), %s14794_s3, 512, %s1183_s6, [#allocation17], %s14786_s0, %s14786_s0, %s14790_s4  }
 0x25a   : > { %s12445_s2 = scalar_lea.hbm %s14795_s13, 128 }
 0x25b   : > { %p12446_p6 = scmp.ne.s32.totalorder %s14795_s13, %s12445_s2  ;;  %p12452_p3 = scmp.lt.u32.totalorder %s12445_s2, %s14795_s13 }
 0x25d   : > { %p12448_p8 = pnand %p12446_p6, %p13140_p7 }
 0x25f   : > { %p12449_p2 = pneg %p12448_p8 }
 0x261   : > { %p12454_p9 = pnand %p12452_p3, %p12449_p2 }
 0x263   : > { %12457 = shalt.err (!%p12454_p9)
}
 0x264   : > { %s12458_s12 = scalar_lea.vmem %s1209_s8, 128  ;;  %p12466_p13 = scmp.lt.s32.totalorder %s1209_s8, %s1209_s8 }
 0x265   : > { %p12459_p10 = scmp.ne.s32.totalorder %s1209_s8, %s12458_s12  ;;  %p12467_p0 = scmp.lt.s32.totalorder %s12458_s12, %s12458_s12 }
 0x267   : > { %p12461_p11 = pnand %p12459_p10, %p13140_p7  ;;  %p12468_p1 = por %p12467_p0, %p12466_p13 }
 0x269   : > { %p12462_p12 = pneg %p12461_p11 }
 0x26b   : > { %p12469_p4 = pnand %p12468_p1, %p12462_p12 }
 0x26d   : > { %12472 = shalt.err (!%p12469_p4)
}
 0x26e   : > { %s14796_s0 = sld [smem:[#allocation78_spill]]  ;;  %s12866_s4 = smov [#allocation24]  }
 0x26f   : > { %11412 = dma.hbm_to_vmem [thread:$0]  (!%p13130_p5), %s14795_s13, 128, %s1209_s8, [#allocation20], %s14784_s15, %s14784_s15, %s14785_s26  }
 0x270   : > { %s1241_s6 = sshll.u32 %s12866_s4, 4  ;;  %s12867_s14 = smov [#allocation27]   ;;  %s1242_s6 = int_to_ptr.vmem [resolvable:$true] %s1241_s6 }
 0x271   : > { %s1271_s11 = sshll.u32 %s12867_s14, 4  ;;  %s1272_s11 = int_to_ptr.vmem [resolvable:$true] %s1271_s11 }
 0x274   : > { %s12473_s2 = scalar_lea.hbm %s14796_s0, 16 }
 0x275   : > { %p12474_p6 = scmp.ne.s32.totalorder %s14796_s0, %s12473_s2  ;;  %p12480_p3 = scmp.lt.u32.totalorder %s12473_s2, %s14796_s0 }
 0x277   : > { %p12476_p8 = pnand %p12474_p6, %p13140_p7 }
 0x279   : > { %p12477_p2 = pneg %p12476_p8 }
 0x27b   : > { %p12482_p9 = pnand %p12480_p3, %p12477_p2 }
 0x27d   : > { %12485 = shalt.err (!%p12482_p9)
}
 0x27e   : > { %s12486_s12 = scalar_lea.vmem %s1242_s6, 16  ;;  %s12493_s8 = scalar_lea.vmem %s1242_s6, 32 }
 0x27f   : > { %p12487_p10 = scmp.ne.s32.totalorder %s1242_s6, %s12486_s12  ;;  %p12494_p13 = scmp.lt.s32.totalorder %s1242_s6, %s1242_s6 }
 0x280   : > { %p12495_p0 = scmp.lt.s32.totalorder %s12493_s8, %s12486_s12 }
 0x281   : > { %p12489_p11 = pnand %p12487_p10, %p13140_p7 }
 0x282   : > { %p12496_p1 = por %p12495_p0, %p12494_p13 }
 0x283   : > { %p12490_p12 = pneg %p12489_p11 }
 0x285   : > { %p12497_p4 = pnand %p12496_p1, %p12490_p12 }
 0x287   : > { %12500 = shalt.err (!%p12497_p4)
}
 0x288   : > { %s14797_s4 = sld [smem:[#allocation83_spill]] }
 0x289   : > { %11418 = dma.hbm_to_vmem [thread:$0]  (!%p13130_p5), %s14796_s0, 16, %s1242_s6, [#allocation23]  }
 0x28e   : > { %s12501_s14 = scalar_lea.hbm %s14797_s4, 1024 }
 0x28f   : > { %p12502_p6 = scmp.ne.s32.totalorder %s14797_s4, %s12501_s14  ;;  %p12508_p3 = scmp.lt.u32.totalorder %s12501_s14, %s14797_s4 }
 0x291   : > { %p12504_p8 = pnand %p12502_p6, %p13140_p7 }
 0x293   : > { %p12505_p2 = pneg %p12504_p8 }
 0x295   : > { %p12510_p9 = pnand %p12508_p3, %p12505_p2 }
 0x297   : > { %12513 = shalt.err (!%p12510_p9)
}
 0x298   : > { %s12514_s2 = scalar_lea.vmem %s1272_s11, 1024  ;;  %p12522_p13 = scmp.lt.s32.totalorder %s1272_s11, %s1272_s11 }
 0x299   : > { %p12515_p10 = scmp.ne.s32.totalorder %s1272_s11, %s12514_s2  ;;  %p12523_p0 = scmp.lt.s32.totalorder %s12514_s2, %s12514_s2 }
 0x29b   : > { %p12517_p11 = pnand %p12515_p10, %p13140_p7  ;;  %p12524_p1 = por %p12523_p0, %p12522_p13 }
 0x29d   : > { %p12518_p12 = pneg %p12517_p11 }
 0x29f   : > { %p12525_p4 = pnand %p12524_p1, %p12518_p12 }
 0x2a1   : > { %12528 = shalt.err (!%p12525_p4)
}
 0x2a2   : > { %s14798_s6 = sld [smem:[#allocation84_spill]]  ;;  %s12868_s12 = smov [#allocation30]  }
 0x2a3   : > { %11424 = dma.hbm_to_vmem [thread:$0]  (!%p13130_p5), %s14797_s4, 1024, %s1272_s11, [#allocation26], %s14784_s15, %s14784_s15, %s14785_s26  }
 0x2a4   : > { %s1298_s8 = sshll.u32 %s12868_s12, 4  ;;  %s12869_s14 = smov [#allocation33]   ;;  %s1299_s8 = int_to_ptr.vmem [resolvable:$true] %s1298_s8 }
 0x2a5   : > { %s1320_s0 = sshll.u32 %s12869_s14, 4  ;;  %s1321_s0 = int_to_ptr.vmem [resolvable:$true] %s1320_s0 }
 0x2a8   : > { %s12529_s2 = scalar_lea.hbm %s14798_s6, 32 }
 0x2a9   : > { %p12530_p6 = scmp.ne.s32.totalorder %s14798_s6, %s12529_s2  ;;  %p12536_p3 = scmp.lt.u32.totalorder %s12529_s2, %s14798_s6 }
 0x2ab   : > { %p12532_p8 = pnand %p12530_p6, %p13140_p7 }
 0x2ad   : > { %p12533_p2 = pneg %p12532_p8 }
 0x2af   : > { %p12538_p9 = pnand %p12536_p3, %p12533_p2 }
 0x2b1   : > { %12541 = shalt.err (!%p12538_p9)
}
 0x2b2   : > { %s12542_s3 = scalar_lea.vmem %s1299_s8, 32  ;;  %p12550_p13 = scmp.lt.s32.totalorder %s1299_s8, %s1299_s8 }
 0x2b3   : > { %p12543_p10 = scmp.ne.s32.totalorder %s1299_s8, %s12542_s3  ;;  %p12551_p0 = scmp.lt.s32.totalorder %s12542_s3, %s12542_s3 }
 0x2b5   : > { %p12545_p11 = pnand %p12543_p10, %p13140_p7  ;;  %p12552_p1 = por %p12551_p0, %p12550_p13 }
 0x2b7   : > { %p12546_p12 = pneg %p12545_p11 }
 0x2b9   : > { %p12553_p4 = pnand %p12552_p1, %p12546_p12 }
 0x2bb   : > { %12556 = shalt.err (!%p12553_p4)
}
 0x2bc   : > { %s14799_s11 = sld [smem:[#allocation86_spill]] }
 0x2bd   : > { %11430 = dma.hbm_to_vmem [thread:$0]  (!%p13130_p5), %s14798_s6, 32, %s1299_s8, [#allocation29]  }
 0x2c2   : > { %s12557_s12 = scalar_lea.hbm %s14799_s11, 32 }
 0x2c3   : > { %p12558_p6 = scmp.ne.s32.totalorder %s14799_s11, %s12557_s12  ;;  %p12564_p3 = scmp.lt.u32.totalorder %s12557_s12, %s14799_s11 }
 0x2c5   : > { %p12560_p8 = pnand %p12558_p6, %p13140_p7 }
 0x2c7   : > { %p12561_p2 = pneg %p12560_p8 }
 0x2c9   : > { %p12566_p9 = pnand %p12564_p3, %p12561_p2 }
 0x2cb   : > { %12569 = shalt.err (!%p12566_p9)
}
 0x2cc   : > { %s12570_s3 = scalar_lea.vmem %s1321_s0, 32  ;;  %p12578_p13 = scmp.lt.s32.totalorder %s1321_s0, %s1321_s0 }
 0x2cd   : > { %p12571_p10 = scmp.ne.s32.totalorder %s1321_s0, %s12570_s3  ;;  %p12579_p0 = scmp.lt.s32.totalorder %s12570_s3, %s12570_s3 }
 0x2cf   : > { %p12573_p11 = pnand %p12571_p10, %p13140_p7  ;;  %p12580_p1 = por %p12579_p0, %p12578_p13 }
 0x2d1   : > { %p12574_p12 = pneg %p12573_p11 }
 0x2d3   : > { %p12581_p4 = pnand %p12580_p1, %p12574_p12 }
 0x2d5   : > { %12584 = shalt.err (!%p12581_p4)
}
 0x2d6   : > { %s14800_s8 = sld [smem:[#allocation87_spill]]  ;;  %s12870_s14 = smov [#allocation36]  }
 0x2d7   : > { %11436 = dma.hbm_to_vmem [thread:$0]  (!%p13130_p5), %s14799_s11, 32, %s1321_s0, [#allocation32]  }
 0x2d8   : > { %s1341_s2 = sshll.u32 %s12870_s14, 4  ;;  %s12871_s12 = smov [#allocation39]   ;;  %s1342_s2 = int_to_ptr.vmem [resolvable:$true] %s1341_s2 }
 0x2d9   : > { %s1367_s4 = sshll.u32 %s12871_s12, 4  ;;  %s1368_s4 = int_to_ptr.vmem [resolvable:$true] %s1367_s4 }
 0x2dc   : > { %s12585_s6 = scalar_lea.hbm %s14800_s8, 1024 }
 0x2dd   : > { %p12586_p6 = scmp.ne.s32.totalorder %s14800_s8, %s12585_s6  ;;  %p12592_p3 = scmp.lt.u32.totalorder %s12585_s6, %s14800_s8 }
 0x2df   : > { %p12588_p8 = pnand %p12586_p6, %p13140_p7 }
 0x2e1   : > { %p12589_p2 = pneg %p12588_p8 }
 0x2e3   : > { %p12594_p9 = pnand %p12592_p3, %p12589_p2 }
 0x2e5   : > { %12597 = shalt.err (!%p12594_p9)
}
 0x2e6   : > { %s12598_s3 = scalar_lea.vmem %s1342_s2, 1024  ;;  %p12606_p13 = scmp.lt.s32.totalorder %s1342_s2, %s1342_s2 }
 0x2e7   : > { %p12599_p10 = scmp.ne.s32.totalorder %s1342_s2, %s12598_s3  ;;  %p12607_p0 = scmp.lt.s32.totalorder %s12598_s3, %s12598_s3 }
 0x2e9   : > { %p12601_p11 = pnand %p12599_p10, %p13140_p7  ;;  %p12608_p1 = por %p12607_p0, %p12606_p13 }
 0x2eb   : > { %p12602_p12 = pneg %p12601_p11 }
 0x2ed   : > { %p12609_p4 = pnand %p12608_p1, %p12602_p12 }
 0x2ef   : > { %12612 = shalt.err (!%p12609_p4)
}
 0x2f0   : > { %s14801_s0 = sld [smem:[#allocation89_spill]] }
 0x2f1   : > { %11442 = dma.hbm_to_vmem [thread:$0]  (!%p13130_p5), %s14800_s8, 1024, %s1342_s2, [#allocation35], %s14784_s15, %s14784_s15, %s14785_s26  }
 0x2f6   : > { %s12613_s6 = scalar_lea.hbm %s14801_s0, 256 }
 0x2f7   : > { %p12614_p6 = scmp.ne.s32.totalorder %s14801_s0, %s12613_s6  ;;  %p12620_p3 = scmp.lt.u32.totalorder %s12613_s6, %s14801_s0 }
 0x2f9   : > { %p12616_p8 = pnand %p12614_p6, %p13140_p7 }
 0x2fb   : > { %p12617_p2 = pneg %p12616_p8 }
 0x2fd   : > { %p12622_p9 = pnand %p12620_p3, %p12617_p2 }
 0x2ff   : > { %12625 = shalt.err (!%p12622_p9)
}
 0x300   : > { %s12626_s14 = scalar_lea.vmem %s1368_s4, 256  ;;  %p12634_p13 = scmp.lt.s32.totalorder %s1368_s4, %s1368_s4 }
 0x301   : > { %p12627_p10 = scmp.ne.s32.totalorder %s1368_s4, %s12626_s14  ;;  %p12635_p0 = scmp.lt.s32.totalorder %s12626_s14, %s12626_s14 }
 0x303   : > { %p12629_p11 = pnand %p12627_p10, %p13140_p7  ;;  %p12636_p1 = por %p12635_p0, %p12634_p13 }
 0x305   : > { %p12630_p12 = pneg %p12629_p11 }
 0x307   : > { %p12637_p4 = pnand %p12636_p1, %p12630_p12 }
 0x309   : > { %12640 = shalt.err (!%p12637_p4)
}
 0x30a   : > { %s14802_s2 = sld [smem:[#allocation91_spill]]  ;;  %s12872_s12 = smov [#allocation42]  }
 0x30b   : > { %11448 = dma.hbm_to_vmem [thread:$0]  (!%p13130_p5), %s14801_s0, 256, %s1368_s4, [#allocation38], %s14784_s15, %s14784_s15, %s14785_s26  }
 0x30c   : > { %s1393_s3 = sshll.u32 %s12872_s12, 4  ;;  %s12873_s6 = smov [#allocation45]   ;;  %s1394_s3 = int_to_ptr.vmem [resolvable:$true] %s1393_s3 }
 0x30d   : > { %s1419_s7 = sshll.u32 %s12873_s6, 4  ;;  %s1420_s7 = int_to_ptr.vmem [resolvable:$true] %s1419_s7 }
 0x310   : > { %s12641_s14 = scalar_lea.hbm %s14802_s2, 128 }
 0x311   : > { %p12642_p6 = scmp.ne.s32.totalorder %s14802_s2, %s12641_s14  ;;  %p12648_p3 = scmp.lt.u32.totalorder %s12641_s14, %s14802_s2 }
 0x313   : > { %p12644_p8 = pnand %p12642_p6, %p13140_p7 }
 0x315   : > { %p12645_p2 = pneg %p12644_p8 }
 0x317   : > { %p12650_p9 = pnand %p12648_p3, %p12645_p2 }
 0x319   : > { %12653 = shalt.err (!%p12650_p9)
}
 0x31a   : > { %s12654_s8 = scalar_lea.vmem %s1394_s3, 128  ;;  %p12662_p13 = scmp.lt.s32.totalorder %s1394_s3, %s1394_s3 }
 0x31b   : > { %p12655_p10 = scmp.ne.s32.totalorder %s1394_s3, %s12654_s8  ;;  %p12663_p0 = scmp.lt.s32.totalorder %s12654_s8, %s12654_s8 }
 0x31d   : > { %p12657_p11 = pnand %p12655_p10, %p13140_p7  ;;  %p12664_p1 = por %p12663_p0, %p12662_p13 }
 0x31f   : > { %p12658_p12 = pneg %p12657_p11 }
 0x321   : > { %p12665_p4 = pnand %p12664_p1, %p12658_p12 }
 0x323   : > { %12668 = shalt.err (!%p12665_p4)
}
 0x324   : > { %s14803_s4 = sld [smem:[#allocation92_spill]] }
 0x325   : > { %11454 = dma.hbm_to_vmem [thread:$0]  (!%p13130_p5), %s14802_s2, 128, %s1394_s3, [#allocation41], %s14784_s15, %s14784_s15, %s14785_s26  }
 0x32a   : > { %s12669_s12 = scalar_lea.hbm %s14803_s4, 384 }
 0x32b   : > { %p12670_p6 = scmp.ne.s32.totalorder %s14803_s4, %s12669_s12  ;;  %p12676_p3 = scmp.lt.u32.totalorder %s12669_s12, %s14803_s4 }
 0x32d   : > { %p12672_p8 = pnand %p12670_p6, %p13140_p7 }
 0x32f   : > { %p12673_p2 = pneg %p12672_p8 }
 0x331   : > { %p12678_p9 = pnand %p12676_p3, %p12673_p2 }
 0x333   : > { %12681 = shalt.err (!%p12678_p9)
}
 0x334   : > { %s12682_s8 = scalar_lea.vmem %s1420_s7, 384  ;;  %p12690_p13 = scmp.lt.s32.totalorder %s1420_s7, %s1420_s7 }
 0x335   : > { %p12683_p10 = scmp.ne.s32.totalorder %s1420_s7, %s12682_s8  ;;  %p12691_p0 = scmp.lt.s32.totalorder %s12682_s8, %s12682_s8 }
 0x337   : > { %p12685_p11 = pnand %p12683_p10, %p13140_p7  ;;  %p12692_p1 = por %p12691_p0, %p12690_p13 }
 0x339   : > { %p12686_p12 = pneg %p12685_p11 }
 0x33b   : > { %p12693_p4 = pnand %p12692_p1, %p12686_p12 }
 0x33d   : > { %12696 = shalt.err (!%p12693_p4)
}
 0x33e   : > { %11460 = dma.hbm_to_vmem [thread:$0]  (!%p13130_p5), %s14803_s4, 384, %s1420_s7, [#allocation44], %s14784_s15, %s14784_s15, %s14785_s26  }
 0x33f   : > { %s12874_s3 = smov [#allocation48]   ;;  %s12697_s14 = scalar_lea.hbm %s13097_s5, 16 }
 0x340   : > { %s1462_s6 = sshll.u32 %s12874_s3, 4  ;;  %p12698_p6 = scmp.ne.s32.totalorder %s13097_s5, %s12697_s14  ;;  %s1463_s6 = int_to_ptr.vmem [resolvable:$true] %s1462_s6 }
 0x341   : > { %p12704_p3 = scmp.lt.u32.totalorder %s12697_s14, %s13097_s5 }
 0x342   : > { %p12700_p8 = pnand %p12698_p6, %p13140_p7 }
 0x344   : > { %p12701_p2 = pneg %p12700_p8 }
 0x346   : > { %p12706_p9 = pnand %p12704_p3, %p12701_p2 }
 0x348   : > { %12709 = shalt.err (!%p12706_p9)
}
 0x349   : > { %s12710_s12 = scalar_lea.vmem %s1463_s6, 16  ;;  %s12717_s8 = scalar_lea.vmem %s1463_s6, 32 }
 0x34a   : > { %p12711_p10 = scmp.ne.s32.totalorder %s1463_s6, %s12710_s12  ;;  %p12718_p13 = scmp.lt.s32.totalorder %s1463_s6, %s1463_s6 }
 0x34b   : > { %p12719_p0 = scmp.lt.s32.totalorder %s12717_s8, %s12710_s12 }
 0x34c   : > { %p12713_p11 = pnand %p12711_p10, %p13140_p7 }
 0x34d   : > { %p12720_p1 = por %p12719_p0, %p12718_p13 }
 0x34e   : > { %p12714_p12 = pneg %p12713_p11 }
 0x350   : > { %p12721_p4 = pnand %p12720_p1, %p12714_p12 }
 0x352   : > { %12724 = shalt.err (!%p12721_p4)
}
 0x353   : > { %11466 = dma.hbm_to_vmem [thread:$0]  (!%p13130_p5), %s13097_s5, 16, %s1463_s6, [#allocation47]  }
 0x354   : > { %p14804_p6 = scmp.ne.s32.totalorder %s14781_s1, 0 }
 0x355   : > { %p14805_p8 = scmp.ne.s32.totalorder (!%p14804_p6), %s14780_s28, 0 }
 0x356   : > { %1485 = sbr.rel (%p14804_p6) target bundleno = 14098 (0x3712), region = 192 }
 0x35d   : > { %12730 = dma.done.wait (%p14805_p8), [#allocation3], 16  }
 0x35e   : > { %12732 = vsyncadd (%p14805_p8), [#allocation3], 4294967280 }
 0x35f   : > { %12734 = dma.done.wait (%p14805_p8), [#allocation5], 768  }
 0x360   : > { %12736 = vsyncadd (%p14805_p8), [#allocation5], 4294966528 }
 0x361   : > { %12738 = dma.done.wait (%p14805_p8), [#allocation8], 192  }
 0x362   : > { %12740 = vsyncadd (%p14805_p8), [#allocation8], 4294967104 }
 0x363   : > { %12742 = dma.done.wait (%p14805_p8), [#allocation11], 80  }
 0x364   : > { %12744 = vsyncadd (%p14805_p8), [#allocation11], 4294967216 }
 0x365   : > { %12746 = dma.done.wait (%p14805_p8), [#allocation14], 512  }
 0x366   : > { %12748 = vsyncadd (%p14805_p8), [#allocation14], 4294966784 }
 0x367   : > { %12750 = dma.done.wait (%p14805_p8), [#allocation17], 544  }
 0x368   : > { %12752 = vsyncadd (%p14805_p8), [#allocation17], 4294966752 }
 0x369   : > { %12754 = dma.done.wait (%p14805_p8), [#allocation20], 256  }
 0x36a   : > { %12756 = vsyncadd (%p14805_p8), [#allocation20], 4294967040 }
 0x36b   : > { %12758 = dma.done.wait (%p14805_p8), [#allocation23], 400  }
 0x36c   : > { %12760 = vsyncadd (%p14805_p8), [#allocation23], 4294966896 }
 0x36d   : > { %12762 = dma.done.wait (%p14805_p8), [#allocation26], 1040  }
 0x36e   : > { %12764 = vsyncadd (%p14805_p8), [#allocation26], 4294966256 }
 0x36f   : > { %12766 = dma.done.wait (%p14805_p8), [#allocation29], 2080  }
 0x370   : > { %12768 = vsyncadd (%p14805_p8), [#allocation29], 4294965216 }
 0x371   : > { %12770 = dma.done.wait (%p14805_p8), [#allocation32], 96  }
 0x372   : > { %12772 = vsyncadd (%p14805_p8), [#allocation32], 4294967200 }
 0x373   : > { %12774 = dma.done.wait (%p14805_p8), [#allocation35], 1040  }
 0x374   : > { %12776 = vsyncadd (%p14805_p8), [#allocation35], 4294966256 }
 0x375   : > { %12778 = dma.done.wait (%p14805_p8), [#allocation38], 1280  }
 0x376   : > { %12780 = vsyncadd (%p14805_p8), [#allocation38], 4294966016 }
 0x377   : > { %12782 = dma.done.wait (%p14805_p8), [#allocation41], 2176  }
 0x378   : > { %12784 = vsyncadd (%p14805_p8), [#allocation41], 4294965120 }
 0x379   : > { %12786 = dma.done.wait (%p14805_p8), [#allocation44], 512  }
 0x37a   : > { %12788 = vsyncadd (%p14805_p8), [#allocation44], 4294966784 }
 0x37b   : > { %12790 = dma.done.wait (%p14805_p8), [#allocation47], 32  }
 0x37c   : > { %12792 = vsyncadd (%p14805_p8), [#allocation47], 4294967264  ;;  %s14806_s1 = sadd.s32 4294967295, %s12795_s22   ;;  %s14807_s10 = sld [smem:[#allocation65_spill]]  ;;  %v12875_v0 = vmov 0.0|0.0   ;;  %vm12876_vm0 = vmmov 0   ;;  %v1812_v14 = vlaneseq }
 0x37d   : > { %s9171_s18 = sshll.u32 %s14806_s1, 1  ;;  %10887 = vmatprep.subr.bf16.mxu0 %v12875_v0  ;;  %v14733_v1 = vmov 0.0   ;;  %v13630_v3 = vld [vmem:[#allocation2] sm:$0x1]  ;;  %v1875_v4 = vld [vmem:[#allocation6] sm:$0xff]  ;;  %vm1736_vm1 = vcmask 130048  }
 0x37e   : > { %p1712_p5 = scmp.lt.s32.totalorder %s9171_s18, 3  ;;  %10073 = vmatprep.mubr.msk.f32.mxu0 %vm12876_vm0, %v14733_v1  ;;  %10076 = vmatprep.subr.bf16.mxu1 %v14733_v1  ;;  %v1876_v5 = vld [vmem:[#allocation6 + $0x8] sm:$0xff]  ;;  %v1877_v6 = vld [vmem:[#allocation6 + $0x10] sm:$0xff]  ;;  %v1878_v7 = vld [vmem:[#allocation6 + $0x18] sm:$0xff]  ;;  %vm1833_vm2 = vcmask 261120   ;;  %v1813_v15 = vshrl.u32 %v1812_v14, 7 }
 0x37f   : > { %10080 = vmatprep.mubr.msk.f32.mxu1 %vm12876_vm0, %v14733_v1  ;;  %v13636_v9 = vpack.c.bf16 %v1876_v5, %v1875_v4  ;;  %v13638_v10 = vpack.c.bf16 %v1878_v7, %v1877_v6  ;;  %v13640_v11 = vld [vmem:[#allocation4] sm:$0xff]   ;;  %v13660_v13 = vld [vmem:[#allocation4 + $0x8] sm:$0xff]   ;;  %v13664_v16 = vld [vmem:[#allocation7] sm:$0xf]  ;;  %vm2041_vm3 = vcmask 64512   ;;  %v12878_v4 = vmov 0  }
 0x380   : > { %s14847_s18 = smov (!%p1712_p5, %s9171_s18), 3  ;;  %10077 = vmatpush3.bf16.msra.mxu1 %v13640_v11  ;;  %v13666_v17 = vsub.s32 0, %v1813_v15  ;;  %v1811_v18 = vunpack.c.l.bf16 %v13664_v16  ;;  %v13676_v28 = vld [vmem:[#allocation9] sm:$0xff]  ;;  %v13679_v35 = vld [vmem:[#allocation10] sm:$0xf]  ;;  %v13694_v63 = vld [vmem:[#allocation13] sm:$0xff]   ;;  %11620 = vset.pattern.permute.xlu1 %v12878_v4 }
 0x381   : > { %s9494_s28 = sshll.u32 %s14847_s18, 3  ;;  %10078 = vmatprep.subr.bf16.mxu1 %v14733_v1  ;;  %v13687_v59 = vld [vmem:[#allocation12] ss:$0 sm:$0xff]  ;;  %11619 = vset.pattern.permute.xlu0 %v12878_v4  ;;  %v13698_v5 = vld [vmem:[#allocation13 + $0x8] sm:$0xff]   ;;  %vm2363_vm4 = vcmask 1041408   ;;  %vm2356_vm5 = vcmask 31744   ;;  %vm13749_vm6 = vmpackc.low %vm2041_vm3, %vm2041_vm3 }
 0x382   : > { %s13625_s15 = scalar_lea.vmem %s14807_s10, %s9494_s28  ;;  %s14810_s26 = sld [smem:[#allocation76_spill]]  ;;  %vm5314_vm7 = vcmask 1043456   ;;  %vm5390_vm8 = vcmask 27648   ;;  %vm14338_vm9 = vmpackc.low %vm2356_vm5, %vm2356_vm5 }
 0x383   : > { %v13628_v2 = vld [vmem:[%s13625_s15] sm:$0xff]   ;;  %s14811_s7 = sld [smem:[#allocation77_spill]]  ;;  %s14812_s3 = sld [smem:[#allocation79_spill]] }
 0x384   : > { %10889 = vmatpush3.bf16.msra.mxu0 %v13628_v2  ;;  %v13634_v8 = vunpack.c.l.bf16 %v13628_v2  ;;  %v13652_v12 = vunpack.c.h.bf16 %v13628_v2  ;;  %10079 = vmatpush3.bf16.msra.mxu1 %v13660_v13  ;;  %s14813_s6 = sld [smem:[#allocation80_spill]]  ;;  %s14814_s14 = sld [smem:[#allocation81_spill]] }
 0x385   : > { %10891 = vmatprep.subr.bf16.mxu0 %v13636_v9  ;;  %10898 = vmatprep.subr.bf16.mxu1 %v12875_v0  ;;  %s14837_s12 = sld [smem:[#allocation93_spill]]  ;;  %s14843_s8 = sld [smem:[#allocation94_spill]] }
 0x386   : > { %s14844_s1 = sld [smem:[#allocation96_spill]]  ;;  %s14845_s10 = sld [smem:[#allocation97_spill]] }
 0x387   : > { %10074 = vmatmul.mubr.msk.f32.vlgmr.msra.gmra.mrb[0].mxu0 %vm1736_vm1, %v13630_v3  ;;  %s9495_s28 = sshll.u32 %s14847_s18, 4 }
 0x388   : > { %10893 = vmatpush3.bf16.msra.mxu0 %v13636_v9  ;;  %10091 = vmatprep.mubr.msk.f32.mxu0 %vm1833_vm2, %v13634_v8 }
 0x389   : > { %10895 = vmatprep.subr.bf16.mxu0 %v13638_v10 }
 0x38c   : > { %10897 = vmatpush3.bf16.msra.mxu0 %v13638_v10 }
 0x38d   : > { %10101 = vmatprep.subr.mxu0 %v14733_v1 }
 0x38f   : > { %10092 = vmatmul.mubr.msk.f32.vlgmr.msra.gmra.mrb[2].mxu0 %vm1833_vm2, %v13652_v12 }
 0x390   : > { %10103 = vmatprep.mubr.msk.bf16.mxu0 %vm12876_vm0, %v14733_v1 }
 0x45a   : > { %v1806_v19 = vpop.f32.mrb[0].mxu0 }
 0x45b   : > { %v1815_v20 = vrot.slane %v1806_v19, %v13666_v17  ;;  %v10075_v21 = vpop.f32.mrb[1].mxu0 }
 0x45c   : > { %v2411_v21 = vld [vmem:[#allocation18 + $0x8] sm:$0xff] }
 0x45d   : > { %v1816_v22 = vmul.f32 %v1815_v20, %v1811_v18  ;;  %v2410_v20 = vld [vmem:[#allocation18] sm:$0xff] }
 0x45f   : > { %10081 = vmatmul.mubr.msk.f32.vlgmr.msra.gmra.mrb[0].mxu1 %vm1833_vm2, %v1816_v22  ;;  %v13704_v22 = vpack.c.bf16 %v2411_v21, %v2410_v20 }
 0x460   : > { %10098 = vmatprep.mubr.msk.f32.mxu1 %vm12876_vm0, %v14733_v1 }
 0x462   : > { %v10093_v23 = vpop.f32.mrb[2].mxu0 }
 0x463   : > { %v1951_v24 = vpop.f32.mrb[3].mxu0 }
 0x464   : > { %v10899_v25 = vpack.c.bf16 %v10093_v23, %v1951_v24  ;;  %v2412_v23 = vld [vmem:[#allocation18 + $0x10] sm:$0xff]  ;;  %v2413_v24 = vld [vmem:[#allocation18 + $0x18] sm:$0xff] }
 0x466   : > { %10900 = vmatpush3.bf16.msra.mxu1 %v10899_v25  ;;  %v13708_v25 = vpack.c.bf16 %v2413_v24, %v2412_v23 }
 0x532   : > { %v1871_v26 = vpop.f32.mrb[0].mxu1 }
 0x533   : > { %v10082_v27 = vpop.f32.mrb[1].mxu1  ;;  %10099 = vmatmul.mubr.msk.f32.vlgmr.msra.gmra.mrb[2].mxu1 %vm1736_vm1, %v1871_v26  ;;  %v13714_v26 = vld [vmem:[#allocation15] sm:$0xff]  }
 0x534   : > { %10109 = vmatprep.mubr.msk.bf16.mxu1 %vm2041_vm3, %v13694_v63 }
 0x606   : > { %v2031_v29 = vpop.f32.mrb[2].mxu1 }
 0x607   : > { %v2032_v30 = vadd.f32 %v2031_v29, %v13676_v28  ;;  %v10100_v31 = vpop.f32.mrb[3].mxu1  ;;  %v9506_v29 = vunpack.c.l.bf16 %v13714_v26 }
 0x608   : > { %v13718_v31 = vld [vmem:[#allocation15 + $0x8] sm:$0xff]  }
 0x609   : > { %v9186_v32 = vmul.f32 -1.442695, %v2032_v30  ;;  %v9507_v30 = vunpack.c.h.bf16 %v13714_v26 }
 0x60b   : > { %11745 = vpow2.f32 %v9186_v32 }
 0x615   : > { %v11746_v33 = vpop.eup %11745 }
 0x616   : > { %v2038_v34 = vadd.f32 1.0, %v11746_v33 }
 0x618   : > { %11747 = vrcp.f32 %v2038_v34  ;;  %v9510_v34 = vunpack.c.l.bf16 %v13718_v31 }
 0x622   : > { %v11748_v36 = vpop.eup %11747 }
 0x623   : > { %10102 = vmatpush3.msra.mxu0 %v11748_v36 }
 0x624   : > { %10104 = vmatmul.mubr.msk.bf16.vlgmr.msra.gmra.mrb[4].mxu0 %vm2041_vm3, %v13679_v35  ;;  %10910 = vmatprep.subr.bf16.mxu0 %v13704_v22 }
 0x625   : > { %10137 = vmatprep.mubr.msk.f32.mxu0 %vm1833_vm2, %v13634_v8  ;;  %10912 = vmatpush3.bf16.msra.mxu0 %v13704_v22 }
 0x626   : > { %10914 = vmatprep.subr.bf16.mxu0 %v13708_v25 }
 0x629   : > { %10916 = vmatpush3.bf16.msra.mxu0 %v13708_v25 }
 0x62c   : > { %10138 = vmatmul.mubr.msk.f32.vlgmr.msra.gmra.mrb[8].mxu0 %vm1833_vm2, %v13652_v12 }
 0x6f7   : > { %v2111_v37 = vpop.f32.mrb[4].mxu0 }
 0x6f8   : > { %v2117_v38 = vsel %vm2041_vm3, %v2111_v37, -inf  ;;  %v10105_v39 = vpop.f32.mrb[5].mxu0 }
 0x6f9   : > { %v2118_v40 = vrot.slane %v2117_v38, 4  ;;  %v2114_v41 = vpop.f32.mrb[6].mxu0 }
 0x6fa   : > { %v10106_v42 = vpop.f32.mrb[7].mxu0 }
 0x6fb   : > { %v2119_v43 = vmax.f32 %v2117_v38, %v2118_v40  ;;  %v9511_v38 = vunpack.c.h.bf16 %v13718_v31 }
 0x6fd   : > { %v2120_v44 = vrot.slane %v2119_v43, 2 }
 0x6ff   : > { %v2121_v45 = vmax.f32 %v2119_v43, %v2120_v44  ;;  %v13730_v44 = vld [vmem:[#allocation16] sm:$0x3] }
 0x701   : > { %v2122_v46 = vrot.slane %v2121_v45, 1 }
 0x703   : > { %v2123_v47 = vmax.f32 %v2121_v45, %v2122_v46  ;;  %v13736_v45 = vsel %vm2363_vm4, %v13730_v44, 0  ;;  %v10139_v46 = vpop.f32.mrb[8].mxu0 }
 0x705   : > { %v2124_v48 = vsub.f32 %v2111_v37, %v2123_v47  ;;  %v2480_v47 = vpop.f32.mrb[9].mxu0 }
 0x707   : > { %v2125_v49 = vmul.f32 1.442695, %v2124_v48 }
 0x709   : > { %11749 = vpow2.f32 %v2125_v49 }
 0x713   : > { %v11750_v50 = vpop.eup %11749 }
 0x714   : > { %v2127_v51 = vsel %vm2041_vm3, %v11750_v50, 0.0 }
 0x715   : > { %v2128_v52 = vrot.slane %v2127_v51, 4 }
 0x717   : > { %v2129_v53 = vadd.f32 %v2128_v52, %v2127_v51 }
 0x719   : > { %v2130_v54 = vrot.slane %v2129_v53, 2 }
 0x71b   : > { %v2131_v55 = vadd.f32 %v2130_v54, %v2129_v53 }
 0x71d   : > { %v2132_v56 = vrot.slane %v2131_v55, 1 }
 0x71f   : > { %v2133_v57 = vadd.f32 %v2132_v56, %v2131_v55  ;;  %v13762_v56 = vld [vmem:[#allocation21] sm:$0xff]  }
 0x720   : > { %10152 = vmatprep.subr.bf16.mxu0 %v13762_v56 }
 0x721   : > { %11751 = vrcp.f32 %v2133_v57  ;;  %10153 = vmatpush3.bf16.msra.mxu0 %v13762_v56  ;;  %v13767_v57 = vld [vmem:[#allocation19] sm:$0xff]  }
 0x722   : > { %10924 = vmatprep.subr.bf16.mxu0 %v13628_v2 }
 0x72b   : > { %v11752_v58 = vpop.eup %11751 }
 0x72c   : > { %v13689_v60 = vmul.f32 %v11752_v58, %v11750_v50  ;;  %v9515_v58 = vunpack.c.h.bf16 %v13767_v57 }
 0x72e   : > { %v2143_v61 = vmul.f32 %v13687_v59, %v13689_v60 }
 0x730   : > { %v2144_v62 = vsel %vm2041_vm3, %v2143_v61, 0.0 }
 0x731   : > { %2145 = vadd.xlane.f32.xlu0 %v2144_v62 }
 0x7be   : > { %v2146_v6 = vpop.xlane.xlu0 %2145 }
 0x7bf   : > { %10107 = vmatprep.subr.mxu1 %v2146_v6 }
 0x7c0   : > { %10108 = vmatpush3.msra.mxu1 %v2146_v6 }
 0x7c1   : > { %10110 = vmatmul.mubr.msk.bf16.vlgmr.msra.gmra.mrb[4].mxu1 %vm2041_vm3, %v13698_v5 }
 0x7c2   : > { %10121 = vmatprep.mubr.msk.f32.mxu1 %vm1833_vm2, %v13634_v8 }
 0x894   : > { %v10111_v7 = vpop.f32.mrb[4].mxu1 }
 0x895   : > { %2268 = vperm.xlu1 %11620, %v10111_v7   ;;  %v2233_v14 = vpop.f32.mrb[5].mxu1 }
 0x896   : > { %2258 = vperm.xlu0 %11619, %v2233_v14   ;;  %v10112_v15 = vpop.f32.mrb[6].mxu1 }
 0x897   : > { %v2236_v19 = vpop.f32.mrb[7].mxu1 }
 0x899   : > { %2263 = vperm.xlu1 %11620, %v2236_v19  }
 0x89d   : > { %2273 = vperm.xlu1 %11620, %v10112_v15  }
 0x914   : > { %v2269_v27 = vpop.permute.xlu1 %2268 }
 0x915   : > { %v2259_v32 = vpop.permute.xlu0 %2258  ;;  %v2278_v41 = vmul.f32 %v9510_v34, %v2269_v27 }
 0x916   : > { %v2276_v36 = vmul.f32 %v9506_v29, %v2259_v32 }
 0x918   : > { %v2264_v33 = vpop.permute.xlu1 %2263 }
 0x919   : > { %v2277_v37 = vmul.f32 %v9507_v30, %v2264_v33 }
 0x91b   : > { %v10901_v39 = vpack.c.bf16 %v2277_v37, %v2276_v36 }
 0x91c   : > { %v2274_v40 = vpop.permute.xlu1 %2273 }
 0x91d   : > { %v2279_v42 = vmul.f32 %v9511_v38, %v2274_v40  ;;  %10902 = vmatprep.subr.bf16.mxu1 %v10901_v39 }
 0x91e   : > { %10904 = vmatpush3.bf16.msra.mxu1 %v10901_v39 }
 0x91f   : > { %v10905_v43 = vpack.c.bf16 %v2279_v42, %v2278_v41 }
 0x921   : > { %10906 = vmatprep.subr.bf16.mxu1 %v10905_v43 }
 0x922   : > { %10908 = vmatpush3.bf16.msra.mxu1 %v10905_v43 }
 0x923   : > { %11247 = vmatprep.subr.msk.bf16.mxu1 %vm2363_vm4, %v13730_v44 }
 0x925   : > { %10122 = vmatmul.mubr.msk.f32.vlgmr.msra.gmra.mrb[8].mxu1 %vm1833_vm2, %v13652_v12 }
 0x926   : > { %10125 = vmatpush3.bf16.msra.mxu1 %v13736_v45 }
 0x927   : > { %10140 = vmatprep.subr.mxu1 %v13689_v60 }
 0x9f8   : > { %v10123_v48 = vpop.f32.mrb[8].mxu1 }
 0x9f9   : > { %v2346_v49 = vpop.f32.mrb[9].mxu1 }
 0x9fa   : > { %10126 = vmatprep.mubr.msk.f32.mxu1 %vm2356_vm5, %v2346_v49 }
 0x9fb   : > { %10127 = vmatmul.mubr.msk.f32.vlgmr.msra.gmra.mrb[10].mxu1 %vm2356_vm5, %v10123_v48 }
 0x9fc   : > { %10141 = vmatpush3.msra.mxu1 %v13689_v60  ;;  %10142 = vmatprep.mubr.msk.f32.mxu1 %vm2041_vm3, %v2480_v47  ;;  %v9514_v60 = vunpack.c.l.bf16 %v13767_v57 }
 0x9ff   : > { %10143 = vmatmul.mubr.msk.f32.vlgmr.msra.gmra.mrb[12].mxu1 %vm2041_vm3, %v10139_v46 }
 0xace   : > { %v10128_v50 = vpop.f32.mrb[10].mxu1 }
 0xacf   : > { %v2401_v51 = vpop.f32.mrb[11].mxu1 }
 0xad0   : > { %v10917_v53 = vpack.c.bf16 %v10128_v50, %v2401_v51 }
 0xad2   : > { %10919 = vmatprep.subr.msk.bf16.mxu1 %vm13749_vm6, %v10917_v53  ;;  %v10144_v54 = vpop.f32.mrb[12].mxu1 }
 0xad3   : > { %10922 = vmatpush3.bf16.xpose.msk.msra.mxu1 %vm13749_vm6, %v10917_v53  ;;  %v2561_v55 = vpop.f32.mrb[13].mxu1  ;;  %v13783_v53 = vld [vmem:[#allocation22] sm:$0xff]  }
 0xad4   : > { %10149 = vmatprep.mubr.msk.f32.mxu1 %vm2041_vm3, %v2561_v55  ;;  %10928 = vmatprep.subr.bf16.mxu1 %v13628_v2  ;;  %v9518_v55 = vunpack.c.l.bf16 %v13783_v53 }
 0xada   : > { %10150 = vmatmul.mubr.msk.f32.vlgmr.msra.gmra.mrb[14].mxu1 %vm2041_vm3, %v10144_v54  ;;  %v13785_v54 = vld [vmem:[#allocation22 + $0x8] sm:$0xff]  }
 0xadb   : > { %10930 = vmatpush3.bf16.msra.mxu1 %v13628_v2 }
 0xadc   : > { %10935 = vmatprep.subr.bf16.mxu1 %v12875_v0 }
 0xbad   : > { %v10151_v61 = vpop.f32.mrb[14].mxu1 }
 0xbae   : > { %v2658_v62 = vadd.f32 %v10151_v61, %v9515_v58  ;;  %v2652_v4 = vpop.f32.mrb[15].mxu1  ;;  %v9522_v61 = vunpack.c.l.bf16 %v13785_v54 }
 0xbaf   : > { %v2653_v6 = vadd.f32 %v9514_v60, %v2652_v4 }
 0xbb0   : > { %v9206_v7 = vmul.f32 -1.442695, %v2658_v62 }
 0xbb1   : > { %v9205_v14 = vmul.f32 -1.442695, %v2653_v6  ;;  %v13789_v6 = vld [vmem:[#allocation22 + $0x10] sm:$0xff]  }
 0xbb2   : > { %11753 = vpow2.f32 %v9206_v7  ;;  %v9519_v7 = vunpack.c.h.bf16 %v13783_v53 }
 0xbb3   : > { %11755 = vpow2.f32 %v9205_v14 }
 0xbbc   : > { %v11754_v15 = vpop.eup %11753 }
 0xbbd   : > { %v11756_v19 = vpop.eup %11755  ;;  %v2668_v20 = vadd.f32 1.0, %v11754_v15  ;;  %v9523_v15 = vunpack.c.h.bf16 %v13785_v54  ;;  %v11634_v54 = vld [vmem:[%s14810_s26 + $0x4] ss:$8 sps:$4 sm:$0xff]  }
 0xbbe   : > { %v2667_v21 = vadd.f32 1.0, %v11756_v19 }
 0xbc0   : > { %11757 = vrcp.f32 %v2667_v21  ;;  %v9526_v21 = vunpack.c.l.bf16 %v13789_v6 }
 0xbc1   : > { %11759 = vrcp.f32 %v2668_v20 }
 0xbca   : > { %v11758_v23 = vpop.eup %11757 }
 0xbcb   : > { %v11760_v24 = vpop.eup %11759  ;;  %10154 = vmatprep.mubr.msk.f32.mxu0 %vm1736_vm1, %v11758_v23 }
 0xbcc   : > { %10155 = vmatmul.mubr.msk.f32.vlgmr.msra.gmra.mrb[10].mxu0 %vm1736_vm1, %v11760_v24 }
 0xbcd   : > { %10926 = vmatpush3.bf16.msra.mxu0 %v13628_v2 }
 0xbce   : > { %10932 = vmatprep.subr.bf16.mxu0 %v13628_v2 }
 0xc9f   : > { %v10156_v27 = vpop.f32.mrb[10].mxu0 }
 0xca0   : > { %v2721_v32 = vpop.f32.mrb[11].mxu0  ;;  %v2733_v33 = vsel %vm1736_vm1, %v10156_v27, -inf }
 0xca1   : > { %2734 = vmax.xlane.f32.xlu0 %v2733_v33  ;;  %v2730_v36 = vsel %vm1736_vm1, %v2721_v32, -inf }
 0xca2   : > { %2731 = vmax.xlane.f32.xlu1 %v2730_v36  ;;  %v13808_v36 = vld [vmem:[%s13625_s15 + $0x8] sm:$0xff]   ;;  %s1723_s15 = scalar_lea.vmem %s13102_s17, %s9495_s28 }
 0xd2e   : > { %v2735_v37 = vpop.xlane.xlu0 %2734 }
 0xd2f   : > { %v2737_v39 = vsub.f32 %v10156_v27, %v2735_v37  ;;  %v2732_v40 = vpop.xlane.xlu1 %2731 }
 0xd30   : > { %v2736_v41 = vsub.f32 %v2721_v32, %v2732_v40  ;;  %v9527_v32 = vunpack.c.h.bf16 %v13789_v6  ;;  %v11637_v6 = vld [vmem:[%s14810_s26 + $0x14] ss:$8 sps:$4 sm:$0xff]  }
 0xd31   : > { %v2740_v42 = vmul.f32 1.442695, %v2737_v39 }
 0xd32   : > { %v2738_v43 = vmul.f32 1.442695, %v2736_v41 }
 0xd34   : > { %11761 = vpow2.f32 %v2738_v43 }
 0xd35   : > { %11763 = vpow2.f32 %v2740_v42 }
 0xd3e   : > { %v11762_v46 = vpop.eup %11761 }
 0xd3f   : > { %v2742_v47 = vsel %vm1736_vm1, %v11762_v46, 0.0  ;;  %v11764_v48 = vpop.eup %11763 }
 0xd40   : > { %2743 = vadd.xlane.f32.xlu1 %v2742_v47  ;;  %v2745_v49 = vsel %vm1736_vm1, %v11764_v48, 0.0 }
 0xd44   : > { %2746 = vadd.xlane.f32.xlu1 %v2745_v49 }
 0xdcd   : > { %v2744_v50 = vpop.xlane.xlu1 %2743 }
 0xdce   : > { %11765 = vrcp.f32 %v2744_v50 }
 0xdd1   : > { %v2747_v51 = vpop.xlane.xlu1 %2746 }
 0xdd2   : > { %11767 = vrcp.f32 %v2747_v51 }
 0xdd8   : > { %v11766_v62 = vpop.eup %11765 }
 0xdd9   : > { %v2750_v4 = vmul.f32 %v11766_v62, %v11762_v46 }
 0xddb   : > { %v2756_v14 = vmul.f32 %v9518_v55, %v2750_v4  ;;  %v2844_v19 = vmul.f32 %v9522_v61, %v2750_v4  ;;  %v2932_v33 = vmul.f32 %v9526_v21, %v2750_v4 }
 0xddc   : > { %v11768_v20 = vpop.eup %11767 }
 0xddd   : > { %v2751_v23 = vmul.f32 %v11768_v20, %v11764_v48  ;;  %10161 = vmatprep.mubr.msk.f32.mxu0 %vm1736_vm1, %v2756_v14  ;;  %10168 = vmatprep.mubr.msk.f32.mxu1 %vm1736_vm1, %v2844_v19 }
 0xddf   : > { %v2757_v24 = vmul.f32 %v9519_v7, %v2751_v23  ;;  %v2845_v27 = vmul.f32 %v9523_v15, %v2751_v23  ;;  %v2933_v37 = vmul.f32 %v9527_v32, %v2751_v23 }
 0xde1   : > { %10162 = vmatmul.mubr.msk.f32.vlgmr.msra.gmra.mrb[12].mxu0 %vm1736_vm1, %v2757_v24  ;;  %10169 = vmatmul.mubr.msk.f32.vlgmr.msra.gmra.mrb[16].mxu1 %vm1736_vm1, %v2845_v27 }
 0xde2   : > { %10934 = vmatpush3.bf16.msra.mxu0 %v13628_v2  ;;  %10175 = vmatprep.mubr.msk.f32.mxu0 %vm1736_vm1, %v2932_v33  ;;  %v13835_v2 = vunpack.c.l.bf16 %v13808_v36 }
 0xde3   : > { %10937 = vmatpush3.bf16.msra.mxu1 %v13808_v36  ;;  %10182 = vmatprep.mubr.msk.f32.mxu1 %vm12876_vm0, %v14733_v1 }
 0xde4   : > { %10939 = vmatprep.subr.bf16.mxu1 %v13636_v9  ;;  %10185 = vmatprep.subr.bf16.mxu0 %v14733_v1 }
 0xde5   : > { %10176 = vmatmul.mubr.msk.f32.vlgmr.msra.gmra.mrb[14].mxu0 %vm1736_vm1, %v2933_v37 }
 0xde6   : > { %10183 = vmatmul.mubr.msk.f32.vlgmr.msra.gmra.mrb[18].mxu1 %vm1736_vm1, %v13630_v3  ;;  %10186 = vmatpush3.bf16.msra.mxu0 %v13640_v11  ;;  %v13838_v3 = vunpack.c.h.bf16 %v13808_v36 }
 0xde7   : > { %10941 = vmatpush3.bf16.msra.mxu1 %v13636_v9  ;;  %10187 = vmatprep.subr.bf16.mxu0 %v14733_v1 }
 0xde8   : > { %10943 = vmatprep.subr.bf16.mxu1 %v13638_v10  ;;  %10189 = vmatprep.mubr.msk.f32.mxu0 %vm12876_vm0, %v14733_v1 }
 0xde9   : > { %10200 = vmatprep.mubr.msk.f32.mxu1 %vm1833_vm2, %v13835_v2 }
 0xdea   : > { %10188 = vmatpush3.bf16.msra.mxu0 %v13660_v13 }
 0xdeb   : > { %10945 = vmatpush3.bf16.msra.mxu1 %v13638_v10  ;;  %10946 = vmatprep.subr.bf16.mxu0 %v12875_v0 }
 0xdec   : > { %10210 = vmatprep.subr.mxu1 %v14733_v1 }
 0xdee   : > { %10201 = vmatmul.mubr.msk.f32.vlgmr.msra.gmra.mrb[20].mxu1 %vm1833_vm2, %v13838_v3 }
 0xdef   : > { %10212 = vmatprep.mubr.msk.bf16.mxu1 %vm12876_vm0, %v14733_v1 }
 0xeb4   : > { %v13846_v9 = vpop.f32.mrb[12].mxu0  ;;  %v13848_v10 = vpop.f32.mrb[16].mxu1 }
 0xeb5   : > { %v13850_v11 = vpop.f32.mrb[13].mxu0  ;;  %v13852_v13 = vpop.f32.mrb[17].mxu1 }
 0xeb8   : > { %v13854_v39 = vpop.f32.mrb[14].mxu0 }
 0xeb9   : > { %v3081_v40 = vpop.f32.mrb[18].mxu1  ;;  %v13856_v41 = vpop.f32.mrb[15].mxu0 }
 0xeba   : > { %v3088_v42 = vrot.slane %v3081_v40, %v13666_v17  ;;  %v10184_v43 = vpop.f32.mrb[19].mxu1 }
 0xebc   : > { %v3089_v46 = vmul.f32 %v3088_v42, %v1811_v18 }
 0xebe   : > { %10190 = vmatmul.mubr.msk.f32.vlgmr.msra.gmra.mrb[16].mxu0 %vm1833_vm2, %v3089_v46 }
 0xebf   : > { %10207 = vmatprep.mubr.msk.f32.mxu0 %vm12876_vm0, %v14733_v1 }
 0xec1   : > { %v10202_v47 = vpop.f32.mrb[20].mxu1 }
 0xec2   : > { %v3203_v48 = vpop.f32.mrb[21].mxu1 }
 0xec3   : > { %v10947_v49 = vpack.c.bf16 %v10202_v47, %v3203_v48 }
 0xec5   : > { %10948 = vmatpush3.bf16.msra.mxu0 %v10947_v49 }
 0xf91   : > { %v3127_v50 = vpop.f32.mrb[16].mxu0 }
 0xf92   : > { %v10191_v51 = vpop.f32.mrb[17].mxu0  ;;  %10208 = vmatmul.mubr.msk.f32.vlgmr.msra.gmra.mrb[18].mxu0 %vm1736_vm1, %v3127_v50 }
 0xf93   : > { %10218 = vmatprep.mubr.msk.bf16.mxu0 %vm2041_vm3, %v13694_v63 }
0x1065   : > { %v3281_v62 = vpop.f32.mrb[18].mxu0 }
0x1066   : > { %v3282_v16 = vadd.f32 %v3281_v62, %v13676_v28  ;;  %v10209_v18 = vpop.f32.mrb[19].mxu0 }
0x1068   : > { %v9221_v4 = vmul.f32 -1.442695, %v3282_v16 }
0x106a   : > { %11769 = vpow2.f32 %v9221_v4 }
0x1074   : > { %v11770_v14 = vpop.eup %11769 }
0x1075   : > { %v3288_v19 = vadd.f32 1.0, %v11770_v14 }
0x1077   : > { %11771 = vrcp.f32 %v3288_v19 }
0x1081   : > { %v11772_v20 = vpop.eup %11771 }
0x1082   : > { %10211 = vmatpush3.msra.mxu1 %v11772_v20 }
0x1083   : > { %10213 = vmatmul.mubr.msk.bf16.vlgmr.msra.gmra.mrb[24].mxu1 %vm2041_vm3, %v13679_v35 }
0x1084   : > { %10230 = vmatprep.mubr.msk.f32.mxu1 %vm1833_vm2, %v13835_v2 }
0x1156   : > { %v3357_v23 = vpop.f32.mrb[24].mxu1 }
0x1157   : > { %v3363_v63 = vsel %vm2041_vm3, %v3357_v23, -inf  ;;  %v10214_v24 = vpop.f32.mrb[25].mxu1 }
0x1158   : > { %v3364_v27 = vrot.slane %v3363_v63, 4  ;;  %v3360_v28 = vpop.f32.mrb[26].mxu1 }
0x1159   : > { %v10215_v33 = vpop.f32.mrb[27].mxu1 }
0x115a   : > { %v3365_v37 = vmax.f32 %v3363_v63, %v3364_v27 }
0x115c   : > { %v3366_v40 = vrot.slane %v3365_v37, 2 }
0x115e   : > { %v3367_v42 = vmax.f32 %v3365_v37, %v3366_v40 }
0x1160   : > { %v3368_v43 = vrot.slane %v3367_v42, 1 }
0x1162   : > { %v3369_v46 = vmax.f32 %v3367_v42, %v3368_v43 }
0x1164   : > { %v3370_v47 = vsub.f32 %v3357_v23, %v3369_v46 }
0x1166   : > { %v3371_v48 = vmul.f32 1.442695, %v3370_v47 }
0x1168   : > { %11773 = vpow2.f32 %v3371_v48 }
0x1172   : > { %v11774_v49 = vpop.eup %11773 }
0x1173   : > { %v3373_v35 = vsel %vm2041_vm3, %v11774_v49, 0.0 }
0x1174   : > { %v3374_v50 = vrot.slane %v3373_v35, 4 }
0x1176   : > { %v3375_v51 = vadd.f32 %v3374_v50, %v3373_v35 }
0x1178   : > { %v3376_v62 = vrot.slane %v3375_v51, 2 }
0x117a   : > { %v3377_v16 = vadd.f32 %v3376_v62, %v3375_v51 }
0x117c   : > { %v3378_v18 = vrot.slane %v3377_v16, 1 }
0x117e   : > { %v3379_v4 = vadd.f32 %v3378_v18, %v3377_v16 }
0x1180   : > { %11775 = vrcp.f32 %v3379_v4 }
0x118a   : > { %v11776_v14 = vpop.eup %11775 }
0x118b   : > { %v3381_v19 = vmul.f32 %v11776_v14, %v11774_v49 }
0x118d   : > { %v3382_v20 = vmul.f32 %v13687_v59, %v3381_v19 }
0x118f   : > { %v3383_v63 = vsel %vm2041_vm3, %v3382_v20, 0.0 }
0x1190   : > { %3384 = vadd.xlane.f32.xlu1 %v3383_v63 }
0x121d   : > { %v3385_v23 = vpop.xlane.xlu1 %3384 }
0x121e   : > { %10216 = vmatprep.subr.mxu0 %v3385_v23 }
0x121f   : > { %10217 = vmatpush3.msra.mxu0 %v3385_v23 }
0x1220   : > { %10219 = vmatmul.mubr.msk.bf16.vlgmr.msra.gmra.mrb[20].mxu0 %vm2041_vm3, %v13698_v5  ;;  %11248 = vmatprep.subr.msk.bf16.mxu0 %vm2363_vm4, %v13730_v44 }
0x1221   : > { %10234 = vmatpush3.bf16.msra.mxu0 %v13736_v45 }
0x1222   : > { %10249 = vmatprep.subr.mxu0 %v3381_v19 }
0x12f3   : > { %v10220_v24 = vpop.f32.mrb[20].mxu0 }
0x12f4   : > { %3479 = vperm.xlu0 %11619, %v10220_v24   ;;  %v3452_v27 = vpop.f32.mrb[21].mxu0 }
0x12f5   : > { %3469 = vperm.xlu1 %11620, %v3452_v27   ;;  %v10221_v59 = vpop.f32.mrb[22].mxu0 }
0x12f6   : > { %v3455_v28 = vpop.f32.mrb[23].mxu0 }
0x12f9   : > { %3474 = vperm.xlu1 %11620, %v3455_v28  }
0x12fd   : > { %3484 = vperm.xlu1 %11620, %v10221_v59  }
0x1373   : > { %v3480_v44 = vpop.permute.xlu0 %3479 }
0x1374   : > { %v3470_v33 = vpop.permute.xlu1 %3469  ;;  %v3489_v43 = vmul.f32 %v9510_v34, %v3480_v44  ;;  %v11628_v44 = vld [vmem:[%s14810_s26 + $0x24] ss:$8 sps:$4 sm:$0xff]  }
0x1375   : > { %v3487_v40 = vmul.f32 %v9506_v29, %v3470_v33 }
0x1378   : > { %v3475_v37 = vpop.permute.xlu1 %3474 }
0x1379   : > { %v3488_v5 = vmul.f32 %v9507_v30, %v3475_v37 }
0x137b   : > { %v10949_v42 = vpack.c.bf16 %v3488_v5, %v3487_v40 }
0x137c   : > { %v3485_v45 = vpop.permute.xlu1 %3484 }
0x137d   : > { %v3490_v46 = vmul.f32 %v9511_v38, %v3485_v45  ;;  %10950 = vmatprep.subr.bf16.mxu1 %v10949_v42 }
0x137e   : > { %10952 = vmatpush3.bf16.msra.mxu1 %v10949_v42 }
0x137f   : > { %v10953_v47 = vpack.c.bf16 %v3490_v46, %v3489_v43 }
0x1381   : > { %10954 = vmatprep.subr.bf16.mxu1 %v10953_v47 }
0x1382   : > { %10956 = vmatpush3.bf16.msra.mxu1 %v10953_v47 }
0x1383   : > { %10958 = vmatprep.subr.bf16.mxu1 %v13704_v22 }
0x1385   : > { %10231 = vmatmul.mubr.msk.f32.vlgmr.msra.gmra.mrb[22].mxu1 %vm1833_vm2, %v13838_v3 }
0x1386   : > { %10960 = vmatpush3.bf16.msra.mxu1 %v13704_v22  ;;  %10246 = vmatprep.mubr.msk.f32.mxu1 %vm1833_vm2, %v13835_v2 }
0x1387   : > { %10962 = vmatprep.subr.bf16.mxu1 %v13708_v25 }
0x138a   : > { %10964 = vmatpush3.bf16.msra.mxu1 %v13708_v25 }
0x138b   : > { %10261 = vmatprep.subr.bf16.mxu1 %v13762_v56 }
0x138d   : > { %10247 = vmatmul.mubr.msk.f32.vlgmr.msra.gmra.mrb[28].mxu1 %vm1833_vm2, %v13838_v3 }
0x138e   : > { %10262 = vmatpush3.bf16.msra.mxu1 %v13762_v56 }
0x138f   : > { %10972 = vmatprep.subr.bf16.mxu1 %v13808_v36 }
0x1458   : > { %v10232_v26 = vpop.f32.mrb[22].mxu1 }
0x1459   : > { %v3557_v29 = vpop.f32.mrb[23].mxu1 }
0x145a   : > { %10235 = vmatprep.mubr.msk.f32.mxu0 %vm2356_vm5, %v3557_v29 }
0x145b   : > { %10236 = vmatmul.mubr.msk.f32.vlgmr.msra.gmra.mrb[24].mxu0 %vm2356_vm5, %v10232_v26 }
0x145c   : > { %10250 = vmatpush3.msra.mxu0 %v3381_v19 }
0x1460   : > { %v10248_v22 = vpop.f32.mrb[28].mxu1 }
0x1461   : > { %v3681_v30 = vpop.f32.mrb[29].mxu1 }
0x1462   : > { %10251 = vmatprep.mubr.msk.f32.mxu0 %vm2041_vm3, %v3681_v30  ;;  %v11626_v30 = vld [vmem:[%s14810_s26 + $0x20] ss:$8 sps:$4 sm:$0xff]  }
0x1463   : > { %10252 = vmatmul.mubr.msk.f32.vlgmr.msra.gmra.mrb[26].mxu0 %vm2041_vm3, %v10248_v22 }
0x152e   : > { %v10237_v25 = vpop.f32.mrb[24].mxu0 }
0x152f   : > { %v3606_v31 = vpop.f32.mrb[25].mxu0 }
0x1530   : > { %v10965_v34 = vpack.c.bf16 %v10237_v25, %v3606_v31 }
0x1532   : > { %10967 = vmatprep.subr.msk.bf16.mxu0 %vm13749_vm6, %v10965_v34 }
0x1533   : > { %10970 = vmatpush3.bf16.xpose.msk.msra.mxu0 %vm13749_vm6, %v10965_v34  ;;  %v11631_v34 = vld [vmem:[%s14810_s26 + $0x34] ss:$8 sps:$4 sm:$0xff]  }
0x1534   : > { %10976 = vmatprep.subr.bf16.mxu0 %v13808_v36 }
0x1536   : > { %v10253_v38 = vpop.f32.mrb[26].mxu0 }
0x1537   : > { %v3762_v56 = vpop.f32.mrb[27].mxu0 }
0x1538   : > { %10258 = vmatprep.mubr.msk.f32.mxu0 %vm2041_vm3, %v3762_v56  ;;  %v11649_v56 = vld [vmem:[%s14811_s7 + $0x10] sm:$0xff]  }
0x153a   : > { %10259 = vmatmul.mubr.msk.f32.vlgmr.msra.gmra.mrb[28].mxu0 %vm2041_vm3, %v10253_v38  ;;  %v11648_v38 = vld [vmem:[%s14811_s7 + $0x50] sm:$0xff]  }
0x153b   : > { %10978 = vmatpush3.bf16.msra.mxu0 %v13808_v36 }
0x153c   : > { %4231 = vmatprep.subr.bf16.mxu0 %v11628_v44 }
0x160d   : > { %v10260_v48 = vpop.f32.mrb[28].mxu0 }
0x160e   : > { %v3855_v49 = vadd.f32 %v10260_v48, %v9515_v58  ;;  %v3849_v35 = vpop.f32.mrb[29].mxu0  ;;  %v11650_v48 = vld [vmem:[%s14811_s7 + $0x58] sm:$0xff]  }
0x160f   : > { %v3850_v50 = vadd.f32 %v9514_v60, %v3849_v35  ;;  %v11652_v35 = vld [vmem:[%s14811_s7 + $0x60] sm:$0xff]  }
0x1610   : > { %v9238_v52 = vmul.f32 -1.442695, %v3855_v49  ;;  %v11651_v49 = vld [vmem:[%s14811_s7 + $0x18] sm:$0xff]  }
0x1611   : > { %v9237_v51 = vmul.f32 -1.442695, %v3850_v50  ;;  %v11653_v50 = vld [vmem:[%s14811_s7 + $0x20] sm:$0xff]  }
0x1612   : > { %11777 = vpow2.f32 %v9238_v52  ;;  %v11654_v52 = vld [vmem:[%s14811_s7 + $0x68] sm:$0xff]  }
0x1613   : > { %11779 = vpow2.f32 %v9237_v51  ;;  %v11655_v51 = vld [vmem:[%s14811_s7 + $0x28] sm:$0xff]  }
0x161c   : > { %v11778_v62 = vpop.eup %11777 }
0x161d   : > { %v11780_v16 = vpop.eup %11779  ;;  %v3865_v18 = vadd.f32 1.0, %v11778_v62  ;;  %v11656_v62 = vld [vmem:[%s14811_s7 + $0x70] sm:$0xff]  }
0x161e   : > { %v3864_v4 = vadd.f32 1.0, %v11780_v16  ;;  %v11657_v16 = vld [vmem:[%s14811_s7 + $0x30] sm:$0xff]  }
0x1620   : > { %11781 = vrcp.f32 %v3864_v4 }
0x1621   : > { %11783 = vrcp.f32 %v3865_v18 }
0x162a   : > { %v11782_v14 = vpop.eup %11781 }
0x162b   : > { %v11784_v19 = vpop.eup %11783  ;;  %10263 = vmatprep.mubr.msk.f32.mxu1 %vm1736_vm1, %v11782_v14 }
0x162c   : > { %10264 = vmatmul.mubr.msk.f32.vlgmr.msra.gmra.mrb[30].mxu1 %vm1736_vm1, %v11784_v19 }
0x162d   : > { %10974 = vmatpush3.bf16.msra.mxu1 %v13808_v36 }
0x162e   : > { %10980 = vmatprep.subr.bf16.mxu1 %v13808_v36 }
0x16ff   : > { %v10265_v57 = vpop.f32.mrb[30].mxu1 }
0x1700   : > { %v3910_v58 = vpop.f32.mrb[31].mxu1  ;;  %v3922_v60 = vsel %vm1736_vm1, %v10265_v57, -inf }
0x1701   : > { %3923 = vmax.xlane.f32.xlu0 %v3922_v60  ;;  %v3919_v20 = vsel %vm1736_vm1, %v3910_v58, -inf  ;;  %v11638_v60 = vld [vmem:[%s14810_s26 + $0x40] ss:$8 sps:$4 sm:$0xff]  }
0x1702   : > { %3920 = vmax.xlane.f32.xlu1 %v3919_v20  ;;  %v11643_v20 = vld [vmem:[%s14810_s26 + $0x54] ss:$8 sps:$4 sm:$0xff]  }
0x178e   : > { %v3924_v63 = vpop.xlane.xlu0 %3923 }
0x178f   : > { %v3926_v23 = vsub.f32 %v10265_v57, %v3924_v63  ;;  %v3921_v24 = vpop.xlane.xlu1 %3920  ;;  %v11641_v63 = vld [vmem:[%s14810_s26 + $0x50] ss:$8 sps:$4 sm:$0xff]  }
0x1790   : > { %v3925_v27 = vsub.f32 %v3910_v58, %v3921_v24  ;;  %v11663_v24 = vld [vmem:[%s14812_s3 + $0x8] sm:$0xff]  }
0x1791   : > { %v3929_v59 = vmul.f32 1.442695, %v3926_v23  ;;  %v11662_v23 = vld [vmem:[%s14812_s3] sm:$0xff]  }
0x1792   : > { %v3927_v28 = vmul.f32 1.442695, %v3925_v27 }
0x1794   : > { %11785 = vpow2.f32 %v3927_v28 }
0x1795   : > { %11787 = vpow2.f32 %v3929_v59 }
0x179e   : > { %v11786_v33 = vpop.eup %11785 }
0x179f   : > { %v3931_v37 = vsel %vm1736_vm1, %v11786_v33, 0.0  ;;  %v11788_v40 = vpop.eup %11787 }
0x17a0   : > { %3932 = vadd.xlane.f32.xlu1 %v3931_v37  ;;  %v3934_v5 = vsel %vm1736_vm1, %v11788_v40, 0.0  ;;  %v11661_v37 = vld [vmem:[%s14811_s7 + $0x88] sm:$0xff]  }
0x17a4   : > { %3935 = vadd.xlane.f32.xlu1 %v3934_v5 }
0x182d   : > { %v3933_v42 = vpop.xlane.xlu1 %3932 }
0x182e   : > { %11789 = vrcp.f32 %v3933_v42 }
0x1831   : > { %v3936_v45 = vpop.xlane.xlu1 %3935 }
0x1832   : > { %11791 = vrcp.f32 %v3936_v45 }
0x1838   : > { %v11790_v43 = vpop.eup %11789 }
0x1839   : > { %v3939_v46 = vmul.f32 %v11790_v43, %v11786_v33 }
0x183b   : > { %v3941_v47 = vmul.f32 %v9518_v55, %v3939_v46  ;;  %v4024_v26 = vmul.f32 %v9522_v61, %v3939_v46  ;;  %v4107_v55 = vmul.f32 %v9526_v21, %v3939_v46  ;;  %v11629_v61 = vld [vmem:[%s14810_s26 + $0x30] ss:$8 sps:$4 sm:$0xff]   ;;  %v11640_v21 = vld [vmem:[%s14810_s26 + $0x44] ss:$8 sps:$4 sm:$0xff]  }
0x183c   : > { %v11792_v29 = vpop.eup %11791 }
0x183d   : > { %v3940_v22 = vmul.f32 %v11792_v29, %v11788_v40  ;;  %10270 = vmatprep.mubr.msk.f32.mxu1 %vm1736_vm1, %v3941_v47  ;;  %10277 = vmatprep.mubr.msk.f32.mxu0 %vm1736_vm1, %v4024_v26 }
0x183f   : > { %v3942_v25 = vmul.f32 %v9519_v7, %v3940_v22  ;;  %v4025_v31 = vmul.f32 %v9523_v15, %v3940_v22  ;;  %v4108_v53 = vmul.f32 %v9527_v32, %v3940_v22  ;;  %v11632_v7 = vld [vmem:[%s14810_s26] ss:$8 sps:$4 sm:$0xff]   ;;  %v11635_v15 = vld [vmem:[%s14810_s26 + $0x10] ss:$8 sps:$4 sm:$0xff]  }
0x1840   : > { %v11644_v32 = vld [vmem:[%s14811_s7 + $0x40] sm:$0xff]  }
0x1841   : > { %10271 = vmatmul.mubr.msk.f32.vlgmr.msra.gmra.mrb[32].mxu1 %vm1736_vm1, %v3942_v25  ;;  %10278 = vmatmul.mubr.msk.f32.vlgmr.msra.gmra.mrb[30].mxu0 %vm1736_vm1, %v4025_v31  ;;  %v11665_v25 = vld [vmem:[%s14812_s3 + $0x18] sm:$0xff]  }
0x1842   : > { %4232 = vmatpush1.bf16.msra.mxu0 %v11626_v30  ;;  %10982 = vmatpush3.bf16.msra.mxu1 %v13808_v36  ;;  %v11645_v36 = vld [vmem:[%s14811_s7] sm:$0xff]  }
0x1843   : > { %10284 = vmatprep.mubr.msk.f32.mxu1 %vm1736_vm1, %v4107_v55  ;;  %4233 = vmatprep.subr.bf16.mxu0 %v11631_v34 }
0x1844   : > { %4263 = vmatprep.mubr.f32.mxu0 %v14733_v1  ;;  %9699 = vmatprep.subr.bf16.mxu1 %v11644_v32 }
0x1845   : > { %10285 = vmatmul.mubr.msk.f32.vlgmr.msra.gmra.mrb[34].mxu1 %vm1736_vm1, %v4108_v53 }
0x1846   : > { %4234 = vmatpush1.bf16.msra.mxu0 %v11629_v61  ;;  %9700 = vmatpush3.bf16.msra.mxu1 %v11645_v36  ;;  %v9279_v36 = vld [vmem:[#allocation24] ss:$0 sm:$0xff] }
0x1847   : > { %4320 = vmatprep.subr.bf16.mxu0 %v11634_v54 }
0x1849   : > { %9255 = vmatmul.mubr.msk.f32.vlgmr.msra.gmra.mrb[32].mxu0 %vm1833_vm2, %v13852_v13  ;;  %v11646_v13 = vld [vmem:[%s14811_s7 + $0x48] sm:$0xff]  }
0x184a   : > { %4269 = vmatprep.mubr.f32.mxu0 %v14733_v1  ;;  %4321 = vmatpush1.bf16.msra.mxu0 %v11632_v7 }
0x184b   : > { %4322 = vmatprep.subr.bf16.mxu0 %v11637_v6  ;;  %9701 = vmatprep.subr.bf16.mxu1 %v11646_v13 }
0x184d   : > { %9256 = vmatmul.mubr.msk.f32.gmra.mrb[34].mxu0 %vm1833_vm2, %v13848_v10  ;;  %v11647_v10 = vld [vmem:[%s14811_s7 + $0x8] sm:$0xff]  }
0x184e   : > { %4275 = vmatprep.mubr.f32.mxu0 %v14733_v1  ;;  %4323 = vmatpush1.bf16.msra.mxu0 %v11635_v15 }
0x184f   : > { %4414 = vmatprep.subr.bf16.mxu0 %v11640_v21  ;;  %9702 = vmatpush3.bf16.msra.mxu1 %v11647_v10 }
0x1850   : > { %9703 = vmatprep.subr.bf16.mxu1 %v11648_v38 }
0x1853   : > { %9704 = vmatpush3.bf16.msra.mxu1 %v11649_v56 }
0x1854   : > { %9705 = vmatprep.subr.bf16.mxu1 %v11650_v48 }
0x1857   : > { %9706 = vmatpush3.bf16.msra.mxu1 %v11651_v49 }
0x1858   : > { %9707 = vmatprep.subr.bf16.mxu1 %v11652_v35 }
0x185b   : > { %9708 = vmatpush3.bf16.msra.mxu1 %v11653_v50 }
0x185c   : > { %9709 = vmatprep.subr.bf16.mxu1 %v11654_v52 }
0x185f   : > { %9710 = vmatpush3.bf16.msra.mxu1 %v11655_v51 }
0x1860   : > { %9711 = vmatprep.subr.bf16.mxu1 %v11656_v62 }
0x1863   : > { %9712 = vmatpush3.bf16.msra.mxu1 %v11657_v16 }
0x1914   : > { %v10272_v18 = vpop.f32.mrb[32].mxu1  ;;  %v10279_v4 = vpop.f32.mrb[30].mxu0 }
0x1915   : > { %v4015_v14 = vpop.f32.mrb[33].mxu1  ;;  %v4098_v19 = vpop.f32.mrb[31].mxu0 }
0x1916   : > { %9257 = vmatmul.mubr.msk.f32.gmra.mrb[36].mxu0 %vm1833_vm2, %v4098_v19 }
0x1917   : > { %4281 = vmatprep.mubr.f32.mxu0 %v14733_v1 }
0x1918   : > { %v10286_v57 = vpop.f32.mrb[34].mxu1 }
0x1919   : > { %v4181_v58 = vpop.f32.mrb[35].mxu1 }
0x191a   : > { %9258 = vmatmul.mubr.msk.f32.gmra.mrb[38].mxu0 %vm1833_vm2, %v10279_v4 }
0x191b   : > { %4352 = vmatprep.mubr.f32.mxu0 %v14733_v1 }
0x191e   : > { %9263 = vmatmul.mubr.msk.f32.vlgmr.msra.gmra.mrb[32].mxu0 %vm1833_vm2, %v13850_v11  ;;  %v11659_v11 = vld [vmem:[%s14811_s7 + $0x38] sm:$0xff]  }
0x191f   : > { %4358 = vmatprep.mubr.f32.mxu0 %v14733_v1  ;;  %4415 = vmatpush1.bf16.msra.mxu0 %v11638_v60  ;;  %v5140_v60 = vld [vmem:[#allocation28 + $0x8] sm:$0xff] }
0x1920   : > { %4416 = vmatprep.subr.bf16.mxu0 %v11643_v20 }
0x1922   : > { %9264 = vmatmul.mubr.msk.f32.gmra.mrb[34].mxu0 %vm1833_vm2, %v13846_v9  ;;  %v11658_v9 = vld [vmem:[%s14811_s7 + $0x78] sm:$0xff]  }
0x1923   : > { %4364 = vmatprep.mubr.f32.mxu0 %v14733_v1  ;;  %4417 = vmatpush1.bf16.msra.mxu0 %v11641_v63 }
0x1924   : > { %9713 = vmatprep.subr.bf16.mxu1 %v11658_v9  ;;  %10297 = vmatprep.subr.bf16.mxu0 %v11662_v23 }
0x1925   : > { %9714 = vmatpush3.bf16.msra.mxu1 %v11659_v11 }
0x1926   : > { %9265 = vmatmul.mubr.msk.f32.gmra.mrb[36].mxu0 %vm1833_vm2, %v4015_v14 }
0x1927   : > { %4370 = vmatprep.mubr.f32.mxu0 %v14733_v1 }
0x192a   : > { %9266 = vmatmul.mubr.msk.f32.gmra.mrb[38].mxu0 %vm1833_vm2, %v10272_v18 }
0x192b   : > { %4446 = vmatprep.mubr.f32.mxu0 %v14733_v1 }
0x192e   : > { %9275 = vmatmul.mubr.msk.f32.vlgmr.msra.gmra.mrb[32].mxu0 %vm1833_vm2, %v13856_v41  ;;  %v11660_v41 = vld [vmem:[%s14811_s7 + $0x80] sm:$0xff]  }
0x192f   : > { %4452 = vmatprep.mubr.f32.mxu0 %v14733_v1  ;;  %10287 = vmatprep.subr.bf16.mxu1 %v11660_v41 }
0x1930   : > { %10298 = vmatpush3.bf16.msra.mxu0 %v11662_v23 }
0x1931   : > { %10299 = vmatprep.subr.bf16.mxu0 %v11663_v24 }
0x1932   : > { %9276 = vmatmul.mubr.msk.f32.gmra.mrb[34].mxu0 %vm1833_vm2, %v13854_v39  ;;  %v11664_v39 = vld [vmem:[%s14812_s3 + $0x10] sm:$0xff]  }
0x1933   : > { %4458 = vmatprep.mubr.f32.mxu0 %v14733_v1 }
0x1934   : > { %10300 = vmatpush3.bf16.msra.mxu0 %v11663_v24 }
0x1935   : > { %10301 = vmatprep.subr.bf16.mxu0 %v11664_v39 }
0x1936   : > { %9277 = vmatmul.mubr.msk.f32.gmra.mrb[36].mxu0 %vm1833_vm2, %v4181_v58  ;;  %v5139_v58 = vld [vmem:[#allocation28] sm:$0xff] }
0x1937   : > { %4464 = vmatprep.mubr.f32.mxu0 %v14733_v1  ;;  %v14024_v20 = vpack.c.bf16 %v5140_v60, %v5139_v58 }
0x1938   : > { %10302 = vmatpush3.bf16.msra.mxu0 %v11664_v39 }
0x1939   : > { %10303 = vmatprep.subr.bf16.mxu0 %v11665_v25 }
0x193a   : > { %9278 = vmatmul.mubr.msk.f32.gmra.mrb[38].mxu0 %vm1833_vm2, %v10286_v57 }
0x193c   : > { %10304 = vmatpush3.bf16.msra.mxu0 %v11665_v25 }
0x1a01   : > { %v4448_v27 = vpop.f32.mrb[32].mxu0 }
0x1a02   : > { %v4450_v59 = vpop.f32.mrb[33].mxu0  ;;  %v4479_v33 = vmax.f32 %v4448_v27, 0.0 }
0x1a03   : > { %v4480_v28 = vmax.f32 %v4450_v59, 0.0 }
0x1a05   : > { %v4454_v40 = vpop.f32.mrb[34].mxu0  ;;  %4670 = vmatprep.mubr.f32.mxu1 %v4480_v28 }
0x1a06   : > { %v4456_v5 = vpop.f32.mrb[35].mxu0  ;;  %4671 = vmatmul.mubr.f32.vlgmr.msra.gmra.mrb[36].mxu1 %v4479_v33  ;;  %v4481_v42 = vmax.f32 %v4454_v40, 0.0 }
0x1a07   : > { %v4482_v44 = vmax.f32 %v4456_v5, 0.0  ;;  %10288 = vmatpush3.bf16.msra.mxu1 %v11660_v41  ;;  %v5143_v5 = vld [vmem:[#allocation28 + $0x20] sm:$0xff] }
0x1a08   : > { %10289 = vmatprep.subr.bf16.mxu1 %v11661_v37 }
0x1a09   : > { %v4460_v45 = vpop.f32.mrb[36].mxu0  ;;  %4675 = vmatprep.mubr.f32.mxu1 %v4482_v44  ;;  %v5144_v44 = vld [vmem:[#allocation28 + $0x28] sm:$0xff] }
0x1a0a   : > { %v4462_v43 = vpop.f32.mrb[37].mxu0  ;;  %4676 = vmatmul.mubr.f32.gmra.mrb[38].mxu1 %v4481_v42  ;;  %v4483_v47 = vmax.f32 %v4460_v45, 0.0 }
0x1a0b   : > { %v4484_v46 = vmax.f32 %v4462_v43, 0.0  ;;  %10290 = vmatpush3.bf16.msra.mxu1 %v11661_v37  ;;  %v14047_v43 = vpack.c.bf16 %v5144_v44, %v5143_v5 }
0x1a0c   : > { %10319 = vmatprep.subr.bf16.mxu1 %v11662_v23 }
0x1a0d   : > { %v4466_v26 = vpop.f32.mrb[38].mxu0  ;;  %4680 = vmatprep.mubr.f32.mxu1 %v4484_v46  ;;  %v5145_v46 = vld [vmem:[#allocation28 + $0x30] sm:$0xff] }
0x1a0e   : > { %v4468_v29 = vpop.f32.mrb[39].mxu0  ;;  %4681 = vmatmul.mubr.f32.gmra.mrb[40].mxu1 %v4483_v47  ;;  %v4485_v30 = vmax.f32 %v4466_v26, 0.0  ;;  %v5146_v47 = vld [vmem:[#allocation28 + $0x38] sm:$0xff] }
0x1a0f   : > { %v4486_v22 = vmax.f32 %v4468_v29, 0.0  ;;  %v14052_v26 = vpack.c.bf16 %v5146_v47, %v5145_v46  ;;  %v5147_v29 = vld [vmem:[#allocation28 + $0x40] sm:$0xff] }
0x1a11   : > { %4685 = vmatprep.mubr.f32.mxu1 %v4486_v22  ;;  %v5148_v22 = vld [vmem:[#allocation28 + $0x48] sm:$0xff] }
0x1a12   : > { %4686 = vmatmul.mubr.f32.gmra.mrb[42].mxu1 %v4485_v30  ;;  %v14056_v30 = vpack.c.bf16 %v5148_v22, %v5147_v29 }
0x1a13   : > { %10291 = vmatprep.mubr.msk.f32.mxu1 %vm1833_vm2, %v13634_v8  ;;  %v11666_v8 = vld [vmem:[%s14812_s3 + $0x20] sm:$0xff]  }
0x1a14   : > { %10305 = vmatprep.subr.bf16.mxu0 %v11666_v8 }
0x1a15   : > { %10306 = vmatpush3.bf16.msra.mxu0 %v11666_v8 }
0x1a16   : > { %10292 = vmatmul.mubr.msk.f32.vlgmr.msra.gmra.mrb[44].mxu1 %vm1833_vm2, %v13652_v12  ;;  %v11667_v12 = vld [vmem:[%s14812_s3 + $0x28] sm:$0xff]  }
0x1a17   : > { %10294 = vmatprep.mubr.msk.f32.mxu1 %vm1833_vm2, %v13835_v2  ;;  %10320 = vmatpush3.bf16.msra.mxu1 %v11662_v23  ;;  %v11668_v2 = vld [vmem:[%s14812_s3 + $0x30] sm:$0xff]   ;;  %v5141_v23 = vld [vmem:[#allocation28 + $0x10] sm:$0xff] }
0x1a18   : > { %10321 = vmatprep.subr.bf16.mxu1 %v11663_v24  ;;  %10307 = vmatprep.subr.bf16.mxu0 %v11667_v12 }
0x1a19   : > { %10308 = vmatpush3.bf16.msra.mxu0 %v11667_v12 }
0x1a1a   : > { %10295 = vmatmul.mubr.msk.f32.gmra.mrb[46].mxu1 %vm1833_vm2, %v13838_v3  ;;  %10309 = vmatprep.subr.bf16.mxu0 %v11668_v2  ;;  %v11669_v3 = vld [vmem:[%s14812_s3 + $0x38] sm:$0xff]  }
0x1a1b   : > { %10322 = vmatpush3.bf16.msra.mxu1 %v11663_v24  ;;  %v5142_v24 = vld [vmem:[#allocation28 + $0x18] sm:$0xff] }
0x1a1c   : > { %10323 = vmatprep.subr.bf16.mxu1 %v11664_v39  ;;  %v14037_v37 = vpack.c.bf16 %v5142_v24, %v5141_v23  ;;  %v14114_v23 = vld [vmem:[#allocation27 + $0x18] sm:$0xff]   ;;  %v14118_v24 = vld [vmem:[#allocation27 + $0x20] sm:$0xff]  }
0x1a1d   : > { %10310 = vmatpush3.bf16.msra.mxu0 %v11668_v2 }
0x1a1e   : > { %10311 = vmatprep.subr.bf16.mxu0 %v11669_v3 }
0x1a1f   : > { %10324 = vmatpush3.bf16.msra.mxu1 %v11664_v39 }
0x1a20   : > { %10325 = vmatprep.subr.bf16.mxu1 %v11665_v25 }
0x1a21   : > { %10312 = vmatpush3.bf16.msra.mxu0 %v11669_v3 }
0x1a22   : > { %10983 = vmatprep.subr.bf16.mxu0 %v12875_v0 }
0x1a23   : > { %10326 = vmatpush3.bf16.msra.mxu1 %v11665_v25  ;;  %v5149_v25 = vld [vmem:[#allocation28 + $0x50] sm:$0xff] }
0x1a24   : > { %10327 = vmatprep.subr.bf16.mxu1 %v11666_v8 }
0x1a27   : > { %10328 = vmatpush3.bf16.msra.mxu1 %v11666_v8  ;;  %v5150_v8 = vld [vmem:[#allocation28 + $0x58] sm:$0xff] }
0x1a28   : > { %10329 = vmatprep.subr.bf16.mxu1 %v11667_v12 }
0x1a2b   : > { %10330 = vmatpush3.bf16.msra.mxu1 %v11667_v12  ;;  %v14060_v12 = vpack.c.bf16 %v5150_v8, %v5149_v25  ;;  %v14144_v25 = vld [vmem:[#allocation31] sm:$0xf] }
0x1a2c   : > { %10331 = vmatprep.subr.bf16.mxu1 %v11668_v2 }
0x1a2f   : > { %10332 = vmatpush3.bf16.msra.mxu1 %v11668_v2  ;;  %v5151_v2 = vld [vmem:[#allocation28 + $0x60] sm:$0xff] }
0x1a30   : > { %10333 = vmatprep.subr.bf16.mxu1 %v11669_v3 }
0x1a33   : > { %10334 = vmatpush3.bf16.msra.mxu1 %v11669_v3  ;;  %v5152_v3 = vld [vmem:[#allocation28 + $0x68] sm:$0xff] }
0x1a34   : > { %10987 = vmatprep.subr.bf16.mxu1 %v14024_v20 }
0x1ad9   : > { %v9715_v31 = vpop.f32.mrb[36].mxu1 }
0x1ada   : > { %v9716_v34 = vpop.f32.mrb[37].mxu1 }
0x1adb   : > { %v9717_v55 = vadd.f32 %v9716_v34, %v9715_v31  ;;  %v14064_v31 = vpack.c.bf16 %v5152_v3, %v5151_v2  ;;  %v5153_v34 = vld [vmem:[#allocation28 + $0x70] sm:$0xff] }
0x1add   : > { %v9718_v61 = vpop.f32.mrb[38].mxu1  ;;  %v4673_v56 = vadd.f32 %v9717_v55, %v9279_v36  ;;  %v5154_v55 = vld [vmem:[#allocation28 + $0x78] sm:$0xff] }
0x1ade   : > { %v9719_v53 = vpop.f32.mrb[39].mxu1 }
0x1adf   : > { %v9720_v54 = vadd.f32 %v9719_v53, %v9718_v61  ;;  %v14068_v61 = vpack.c.bf16 %v5154_v55, %v5153_v34 }
0x1ae1   : > { %v9721_v7 = vpop.f32.mrb[40].mxu1  ;;  %v4678_v10 = vadd.f32 %v9720_v54, %v9279_v36 }
0x1ae2   : > { %v9722_v6 = vpop.f32.mrb[41].mxu1 }
0x1ae3   : > { %v9723_v15 = vadd.f32 %v9722_v6, %v9721_v7 }
0x1ae5   : > { %v9724_v21 = vpop.f32.mrb[42].mxu1  ;;  %v4683_v62 = vadd.f32 %v9723_v15, %v9279_v36 }
0x1ae6   : > { %v9725_v32 = vpop.f32.mrb[43].mxu1 }
0x1ae7   : > { %v9726_v13 = vadd.f32 %v9725_v32, %v9724_v21 }
0x1ae9   : > { %v10293_v38 = vpop.f32.mrb[44].mxu1  ;;  %v4688_v50 = vadd.f32 %v9726_v13, %v9279_v36 }
0x1aea   : > { %v4731_v48 = vadd.f32 %v10293_v38, %v4678_v10  ;;  %v4725_v49 = vpop.f32.mrb[45].mxu1  ;;  %v9310_v10 = vld [vmem:[%s14813_s6] ss:$0 sm:$0xff] }
0x1aeb   : > { %v4726_v35 = vadd.f32 %v4725_v49, %v4673_v56  ;;  %v9311_v49 = vld [vmem:[%s14814_s14] ss:$0 sm:$0xff] }
0x1aec   : > { %v4745_v16 = vmax.f32 %v4731_v48, 0.0 }
0x1aed   : > { %v4744_v52 = vmax.f32 %v4726_v35, 0.0  ;;  %v10296_v51 = vpop.f32.mrb[46].mxu1 }
0x1aee   : > { %v4741_v18 = vadd.f32 %v10296_v51, %v4688_v50  ;;  %v4735_v4 = vpop.f32.mrb[47].mxu1 }
0x1aef   : > { %v4736_v14 = vadd.f32 %v4735_v4, %v4683_v62  ;;  %10313 = vmatprep.mubr.f32.mxu0 %v4744_v52 }
0x1af0   : > { %10314 = vmatmul.mubr.f32.vlgmr.msra.gmra.mrb[40].mxu0 %v4745_v16  ;;  %v4747_v57 = vmax.f32 %v4741_v18, 0.0 }
0x1af1   : > { %v4746_v19 = vmax.f32 %v4736_v14, 0.0 }
0x1af3   : > { %10316 = vmatprep.mubr.f32.mxu0 %v4746_v19 }
0x1af4   : > { %10317 = vmatmul.mubr.f32.gmra.mrb[42].mxu0 %v4747_v57 }
0x1af5   : > { %10345 = vmatprep.mubr.msk.f32.mxu0 %vm12876_vm0, %v14733_v1 }
0x1bc3   : > { %v10315_v63 = vpop.f32.mrb[40].mxu0 }
0x1bc4   : > { %v14027_v9 = vsub.f32 %v4745_v16, %v10315_v63  ;;  %v4846_v11 = vpop.f32.mrb[41].mxu0  ;;  %v14094_v63 = vld [vmem:[#allocation25] sm:$0x1] }
0x1bc5   : > { %v14029_v41 = vsub.f32 %v4744_v52, %v4846_v11  ;;  %v14104_v11 = vld [vmem:[#allocation27 + $0x8] sm:$0xff]  }
0x1bc6   : > { %v4870_v59 = vmul.f32 %v14027_v9, %v14027_v9 }
0x1bc7   : > { %v4869_v39 = vmul.f32 %v14029_v41, %v14029_v41  ;;  %v10318_v27 = vpop.f32.mrb[42].mxu0 }
0x1bc8   : > { %v14035_v28 = vsub.f32 %v4747_v57, %v10318_v27  ;;  %v4856_v33 = vpop.f32.mrb[43].mxu0  ;;  %v14127_v27 = vld [vmem:[#allocation27 + $0x30] sm:$0xff]  }
0x1bc9   : > { %v14039_v40 = vsub.f32 %v4746_v19, %v4856_v33  ;;  %10335 = vmatprep.mubr.f32.mxu1 %v4869_v39  ;;  %v14122_v39 = vld [vmem:[#allocation27 + $0x28] sm:$0xff]   ;;  %v14135_v33 = vld [vmem:[#allocation30] sm:$0x3] }
0x1bca   : > { %10336 = vmatmul.mubr.f32.vlgmr.msra.gmra.mrb[48].mxu1 %v4870_v59  ;;  %v4872_v45 = vmul.f32 %v14035_v28, %v14035_v28  ;;  %v14131_v59 = vld [vmem:[#allocation27 + $0x38] sm:$0xff]   ;;  %v14730_v44 = vunpack.c.l.bf16 %v14135_v33 }
0x1bcb   : > { %v4871_v42 = vmul.f32 %v14039_v40, %v14039_v40  ;;  %10989 = vmatpush3.bf16.msra.mxu1 %v14024_v20 }
0x1bcc   : > { %10991 = vmatprep.subr.bf16.mxu1 %v14037_v37 }
0x1bcd   : > { %10338 = vmatprep.mubr.f32.mxu1 %v4871_v42 }
0x1bce   : > { %10339 = vmatmul.mubr.f32.gmra.mrb[50].mxu1 %v4872_v45 }
0x1bcf   : > { %10993 = vmatpush3.bf16.msra.mxu1 %v14037_v37 }
0x1bd0   : > { %10995 = vmatprep.subr.bf16.mxu1 %v14047_v43 }
0x1bd3   : > { %10997 = vmatpush3.bf16.msra.mxu1 %v14047_v43 }
0x1bd4   : > { %10999 = vmatprep.subr.bf16.mxu1 %v14052_v26 }
0x1bd7   : > { %11001 = vmatpush3.bf16.msra.mxu1 %v14052_v26 }
0x1bd8   : > { %11003 = vmatprep.subr.bf16.mxu1 %v14056_v30 }
0x1bdb   : > { %11005 = vmatpush3.bf16.msra.mxu1 %v14056_v30 }
0x1bdc   : > { %11007 = vmatprep.subr.bf16.mxu1 %v14060_v12 }
0x1bdf   : > { %11009 = vmatpush3.bf16.msra.mxu1 %v14060_v12 }
0x1be0   : > { %11011 = vmatprep.subr.bf16.mxu1 %v14064_v31 }
0x1be3   : > { %11013 = vmatpush3.bf16.msra.mxu1 %v14064_v31 }
0x1be4   : > { %11015 = vmatprep.subr.bf16.mxu1 %v14068_v61 }
0x1be7   : > { %11017 = vmatpush3.bf16.msra.mxu1 %v14068_v61 }
0x1be8   : > { %10409 = vmatprep.subr.mxu1 %v14733_v1 }
0x1c9d   : > { %v10337_v53 = vpop.f32.mrb[48].mxu1 }
0x1c9e   : > { %v4913_v54 = vadd.f32 1e-05, %v10337_v53  ;;  %v4907_v7 = vpop.f32.mrb[49].mxu1 }
0x1c9f   : > { %v4908_v6 = vadd.f32 1e-05, %v4907_v7  ;;  %v5902_v7 = vld [vmem:[#allocation40 + $0x8] sm:$0xff] }
0x1ca0   : > { %11793 = vrsqrt.f32 %v4913_v54  ;;  %v5901_v54 = vld [vmem:[#allocation40] sm:$0xff] }
0x1ca1   : > { %11795 = vrsqrt.f32 %v4908_v6  ;;  %v10340_v15 = vpop.f32.mrb[50].mxu1  ;;  %v5903_v6 = vld [vmem:[#allocation40 + $0x10] sm:$0xff] }
0x1ca2   : > { %v4923_v21 = vadd.f32 1e-05, %v10340_v15  ;;  %v4917_v32 = vpop.f32.mrb[51].mxu1  ;;  %v5904_v15 = vld [vmem:[#allocation40 + $0x18] sm:$0xff] }
0x1ca3   : > { %v4918_v36 = vadd.f32 1e-05, %v4917_v32  ;;  %v14149_v32 = vld [vmem:[#allocation33] sm:$0x3] }
0x1ca4   : > { %11797 = vrsqrt.f32 %v4923_v21  ;;  %v14147_v21 = vpack.c.bf16 %v5902_v7, %v5901_v54 }
0x1ca5   : > { %11799 = vrsqrt.f32 %v4918_v36 }
0x1caa   : > { %v11794_v13 = vpop.eup %11793 }
0x1cab   : > { %v11796_v38 = vpop.eup %11795  ;;  %v4931_v56 = vmul.f32 %v11794_v13, %v14027_v9  ;;  %v14096_v9 = vld [vmem:[#allocation27] sm:$0xff]   ;;  %v14151_v13 = vpack.c.bf16 %v5904_v15, %v5903_v6 }
0x1cac   : > { %v4930_v48 = vmul.f32 %v11796_v38, %v14029_v41  ;;  %v14110_v41 = vld [vmem:[#allocation27 + $0x10] sm:$0xff]   ;;  %v5906_v38 = vld [vmem:[#allocation40 + $0x28] sm:$0xff] }
0x1cad   : > { %v4942_v35 = vmul.f32 %v9310_v10, %v4931_v56 }
0x1cae   : > { %v11798_v50 = vpop.eup %11797  ;;  %v4941_v52 = vmul.f32 %v9310_v10, %v4930_v48  ;;  %v5907_v48 = vld [vmem:[#allocation40 + $0x30] sm:$0xff] }
0x1caf   : > { %v11800_v51 = vpop.eup %11799  ;;  %v4933_v62 = vmul.f32 %v11798_v50, %v14035_v28  ;;  %v14078_v16 = vadd.f32 %v9311_v49, %v4942_v35  ;;  %v5909_v50 = vld [vmem:[#allocation40 + $0x40] sm:$0xff] }
0x1cb0   : > { %v4932_v18 = vmul.f32 %v11800_v51, %v14039_v40  ;;  %v14081_v4 = vadd.f32 %v9311_v49, %v4941_v52  ;;  %v5910_v52 = vld [vmem:[#allocation40 + $0x48] sm:$0xff] }
0x1cb1   : > { %v4944_v14 = vmul.f32 %v9310_v10, %v4933_v62  ;;  %v14168_v51 = vpack.c.bf16 %v5910_v52, %v5909_v50  ;;  %v5911_v62 = vld [vmem:[#allocation40 + $0x50] sm:$0xff] }
0x1cb2   : > { %v4943_v19 = vmul.f32 %v9310_v10, %v4932_v18  ;;  %10399 = vmatprep.mubr.f32.mxu1 %v14081_v4  ;;  %v14086_v57 = vpack.c.bf16 %v14078_v16, %v14081_v4  ;;  %v5905_v10 = vld [vmem:[#allocation40 + $0x20] sm:$0xff]  ;;  %v5912_v18 = vld [vmem:[#allocation40 + $0x58] sm:$0xff]  ;;  %v14218_v52 = vld [vmem:[#allocation36] sm:$0xff]  }
0x1cb3   : > { %v14088_v58 = vadd.f32 %v9311_v49, %v4944_v14  ;;  %10400 = vmatmul.mubr.f32.vlgmr.msra.gmra.mrb[52].mxu1 %v14078_v16  ;;  %v14160_v56 = vpack.c.bf16 %v5906_v38, %v5905_v10  ;;  %v14172_v14 = vpack.c.bf16 %v5912_v18, %v5911_v62  ;;  %v14211_v38 = vld [vmem:[#allocation34] ss:$0 sm:$0xff]  ;;  %v14222_v62 = vld [vmem:[#allocation36 + $0x8] sm:$0xff]  }
0x1cb4   : > { %v14091_v60 = vadd.f32 %v9311_v49, %v4943_v19  ;;  %10985 = vmatpush3.bf16.msra.mxu0 %v14086_v57  ;;  %10411 = vmatprep.mubr.msk.bf16.mxu1 %vm12876_vm0, %v14733_v1  ;;  %v5908_v49 = vld [vmem:[#allocation40 + $0x38] sm:$0xff]  ;;  %v5913_v19 = vld [vmem:[#allocation40 + $0x60] sm:$0xff] }
0x1cb5   : > { %10348 = vmatprep.subr.bf16.mxu0 %v14733_v1  ;;  %v14164_v35 = vpack.c.bf16 %v5908_v49, %v5907_v48 }
0x1cb7   : > { %10346 = vmatmul.mubr.msk.f32.vlgmr.msra.gmra.mrb[44].mxu0 %vm1736_vm1, %v14094_v63 }
0x1cb8   : > { %10349 = vmatpush3.bf16.msra.mxu0 %v14096_v9  ;;  %10364 = vmatprep.mubr.msk.f32.mxu0 %vm12876_vm0, %v14733_v1 }
0x1cb9   : > { %10350 = vmatprep.subr.bf16.mxu0 %v14733_v1 }
0x1cbc   : > { %10351 = vmatpush3.bf16.msra.mxu0 %v14104_v11 }
0x1cbd   : > { %10352 = vmatprep.subr.bf16.mxu0 %v14733_v1 }
0x1cc0   : > { %10353 = vmatpush3.bf16.msra.mxu0 %v14110_v41 }
0x1cc1   : > { %10354 = vmatprep.subr.bf16.mxu0 %v14733_v1 }
0x1cc4   : > { %10355 = vmatpush3.bf16.msra.mxu0 %v14114_v23 }
0x1cc5   : > { %10356 = vmatprep.subr.bf16.mxu0 %v14733_v1 }
0x1cc8   : > { %10357 = vmatpush3.bf16.msra.mxu0 %v14118_v24 }
0x1cc9   : > { %10358 = vmatprep.subr.bf16.mxu0 %v14733_v1 }
0x1ccc   : > { %10359 = vmatpush3.bf16.msra.mxu0 %v14122_v39 }
0x1ccd   : > { %10360 = vmatprep.subr.bf16.mxu0 %v14733_v1 }
0x1cd0   : > { %10361 = vmatpush3.bf16.msra.mxu0 %v14127_v27 }
0x1cd1   : > { %10362 = vmatprep.subr.bf16.mxu0 %v14733_v1 }
0x1cd4   : > { %10363 = vmatpush3.bf16.msra.mxu0 %v14131_v59 }
0x1cd5   : > { %11018 = vmatprep.subr.bf16.mxu0 %v12875_v0 }
0x1d86   : > { %v10401_v28 = vpop.f32.mrb[52].mxu1 }
0x1d87   : > { %v5221_v40 = vpop.f32.mrb[53].mxu1 }
0x1d88   : > { %v11019_v5 = vpack.c.bf16 %v10401_v28, %v5221_v40  ;;  %v5914_v28 = vld [vmem:[#allocation40 + $0x68] sm:$0xff] }
0x1d89   : > { %v14176_v40 = vpack.c.bf16 %v5914_v28, %v5913_v19  ;;  %v14224_v19 = vld [vmem:[#allocation36 + $0x10] sm:$0xff]   ;;  %v14232_v28 = vld [vmem:[#allocation36 + $0x18] sm:$0xff]  }
0x1d8a   : > { %v5026_v42 = vpop.f32.mrb[44].mxu0 }
0x1d8b   : > { %v5035_v45 = vrot.slane %v5026_v42, %v13666_v17  ;;  %v10347_v46 = vpop.f32.mrb[45].mxu0  ;;  %v5916_v42 = vld [vmem:[#allocation40 + $0x78] sm:$0xff] }
0x1d8d   : > { %v5036_v47 = vmul.f32 %v5035_v45, %v14730_v44 }
0x1d8f   : > { %10365 = vmatmul.mubr.f32.vlgmr.msra.gmra.mrb[46].mxu0 %v5036_v47 }
0x1d90   : > { %11020 = vmatpush3.bf16.msra.mxu0 %v11019_v5  ;;  %10406 = vmatprep.mubr.msk.f32.mxu0 %vm12876_vm0, %v14733_v1  ;;  %v5915_v5 = vld [vmem:[#allocation40 + $0x70] sm:$0xff] }
0x1d91   : > { %v14180_v45 = vpack.c.bf16 %v5916_v42, %v5915_v5  ;;  %v14234_v5 = vld [vmem:[#allocation36 + $0x20] sm:$0xff]   ;;  %v14240_v42 = vld [vmem:[#allocation36 + $0x28] sm:$0xff]  }
0x1e62   : > { %v5135_v29 = vpop.f32.mrb[46].mxu0 }
0x1e63   : > { %10407 = vmatmul.mubr.msk.f32.vlgmr.msra.gmra.mrb[48].mxu0 %vm1736_vm1, %v5135_v29  ;;  %v10366_v22 = vpop.f32.mrb[47].mxu0 }
0x1e64   : > { %10417 = vmatprep.mubr.msk.bf16.mxu0 %vm2356_vm5, %v14218_v52 }
0x1f36   : > { %v5301_v8 = vpop.f32.mrb[48].mxu0 }
0x1f37   : > { %v5302_v2 = vadd.f32 %v5301_v8, %v14144_v25  ;;  %v10408_v3 = vpop.f32.mrb[49].mxu0 }
0x1f39   : > { %v9322_v34 = vmul.f32 -1.442695, %v5302_v2 }
0x1f3b   : > { %11801 = vpow2.f32 %v9322_v34 }
0x1f45   : > { %v11802_v55 = vpop.eup %11801 }
0x1f46   : > { %v5308_v53 = vadd.f32 1.0, %v11802_v55 }
0x1f48   : > { %11803 = vrcp.f32 %v5308_v53 }
0x1f52   : > { %v11804_v36 = vpop.eup %11803 }
0x1f53   : > { %10410 = vmatpush3.msk.msra.mxu1 %vm5314_vm7, %v11804_v36 }
0x1f54   : > { %10412 = vmatmul.mubr.msk.bf16.vlgmr.msra.gmra.mrb[56].mxu1 %vm2356_vm5, %v14149_v32  ;;  %11054 = vmatprep.subr.bf16.mxu1 %v14147_v21 }
0x1f55   : > { %11056 = vmatpush3.bf16.msra.mxu1 %v14147_v21  ;;  %10507 = vmatprep.mubr.f32.mxu1 %v14081_v4 }
0x1f56   : > { %11058 = vmatprep.subr.bf16.mxu1 %v14151_v13 }
0x1f59   : > { %11060 = vmatpush3.bf16.msra.mxu1 %v14151_v13 }
0x1f5a   : > { %11062 = vmatprep.subr.bf16.mxu1 %v14160_v56 }
0x1f5d   : > { %11064 = vmatpush3.bf16.msra.mxu1 %v14160_v56 }
0x1f5e   : > { %11066 = vmatprep.subr.bf16.mxu1 %v14164_v35 }
0x1f61   : > { %11068 = vmatpush3.bf16.msra.mxu1 %v14164_v35 }
0x1f62   : > { %11070 = vmatprep.subr.bf16.mxu1 %v14168_v51 }
0x1f65   : > { %11072 = vmatpush3.bf16.msra.mxu1 %v14168_v51 }
0x1f66   : > { %11074 = vmatprep.subr.bf16.mxu1 %v14172_v14 }
0x1f69   : > { %11076 = vmatpush3.bf16.msra.mxu1 %v14172_v14 }
0x1f6a   : > { %11078 = vmatprep.subr.bf16.mxu1 %v14176_v40 }
0x1f6d   : > { %11080 = vmatpush3.bf16.msra.mxu1 %v14176_v40 }
0x1f6e   : > { %11082 = vmatprep.subr.bf16.mxu1 %v14180_v45 }
0x1f71   : > { %11084 = vmatpush3.bf16.msra.mxu1 %v14180_v45 }
0x1f72   : > { %10555 = vmatprep.subr.bf16.mxu1 %v14733_v1 }
0x1f74   : > { %10508 = vmatmul.mubr.f32.vlgmr.msra.gmra.mrb[54].mxu1 %v14078_v16 }
0x1f75   : > { %10556 = vmatpush3.bf16.msra.mxu1 %v14096_v9  ;;  %10571 = vmatprep.mubr.msk.f32.mxu1 %vm12876_vm0, %v14733_v1 }
0x1f76   : > { %10557 = vmatprep.subr.bf16.mxu1 %v14733_v1 }
0x1f79   : > { %10558 = vmatpush3.bf16.msra.mxu1 %v14104_v11 }
0x1f7a   : > { %10559 = vmatprep.subr.bf16.mxu1 %v14733_v1 }
0x1f7d   : > { %10560 = vmatpush3.bf16.msra.mxu1 %v14110_v41 }
0x1f7e   : > { %10561 = vmatprep.subr.bf16.mxu1 %v14733_v1 }
0x1f81   : > { %10562 = vmatpush3.bf16.msra.mxu1 %v14114_v23 }
0x1f82   : > { %10563 = vmatprep.subr.bf16.mxu1 %v14733_v1 }
0x1f85   : > { %10564 = vmatpush3.bf16.msra.mxu1 %v14118_v24 }
0x1f86   : > { %10565 = vmatprep.subr.bf16.mxu1 %v14733_v1 }
0x1f89   : > { %10566 = vmatpush3.bf16.msra.mxu1 %v14122_v39 }
0x1f8a   : > { %10567 = vmatprep.subr.bf16.mxu1 %v14733_v1 }
0x1f8d   : > { %10568 = vmatpush3.bf16.msra.mxu1 %v14127_v27 }
0x1f8e   : > { %10569 = vmatprep.subr.bf16.mxu1 %v14733_v1 }
0x1f91   : > { %10570 = vmatpush3.bf16.msra.mxu1 %v14131_v59 }
0x1f92   : > { %11138 = vmatprep.subr.bf16.mxu1 %v12875_v0 }
0x2027   : > { %v5384_v9 = vpop.f32.mrb[56].mxu1 }
0x2028   : > { %v5391_v11 = vsel %vm5390_vm8, %v5384_v9, -inf  ;;  %v10413_v41 = vpop.f32.mrb[57].mxu1 }
0x2029   : > { %v5392_v23 = vrot.slane %v5391_v11, 4  ;;  %v5387_v24 = vpop.f32.mrb[58].mxu1 }
0x202a   : > { %v10414_v46 = vpop.f32.mrb[59].mxu1 }
0x202b   : > { %v5393_v47 = vmax.f32 %v5391_v11, %v5392_v23  ;;  %v14248_v11 = vld [vmem:[#allocation36 + $0x38] sm:$0xff]  }
0x202d   : > { %v5394_v39 = vrot.slane %v5393_v47, 2 }
0x202f   : > { %v5395_v29 = vmax.f32 %v5393_v47, %v5394_v39 }
0x2031   : > { %v5396_v22 = vrot.slane %v5395_v29, 1 }
0x2033   : > { %v5397_v8 = vmax.f32 %v5395_v29, %v5396_v22 }
0x2035   : > { %v5398_v27 = vsub.f32 %v5384_v9, %v5397_v8  ;;  %v14242_v9 = vld [vmem:[#allocation36 + $0x30] sm:$0xff]  }
0x2037   : > { %v5399_v2 = vmul.f32 1.442695, %v5398_v27 }
0x2039   : > { %11805 = vpow2.f32 %v5399_v2 }
0x2043   : > { %v11806_v3 = vpop.eup %11805 }
0x2044   : > { %v5401_v59 = vsel %vm5390_vm8, %v11806_v3, 0.0 }
0x2045   : > { %v5402_v34 = vrot.slane %v5401_v59, 4 }
0x2047   : > { %v5403_v55 = vadd.f32 %v5402_v34, %v5401_v59  ;;  %v14207_v53 = vpop.f32.mrb[54].mxu1 }
0x2048   : > { %v14209_v54 = vpop.f32.mrb[55].mxu1 }
0x2049   : > { %v5404_v7 = vrot.slane %v5403_v55, 2 }
0x204b   : > { %v5405_v6 = vadd.f32 %v5404_v7, %v5403_v55 }
0x204d   : > { %v5406_v15 = vrot.slane %v5405_v6, 1 }
0x204f   : > { %v5407_v36 = vadd.f32 %v5406_v15, %v5405_v6  ;;  %v14253_v6 = vld [vmem:[#allocation37] sm:$0xff]  }
0x2050   : > { %v14729_v15 = vunpack.c.l.bf16 %v14253_v6 }
0x2051   : > { %11807 = vrcp.f32 %v5407_v36  ;;  %v14722_v36 = vunpack.c.h.bf16 %v14253_v6 }
0x205b   : > { %v11808_v10 = vpop.eup %11807 }
0x205c   : > { %v14213_v48 = vmul.f32 %v11808_v10, %v11806_v3 }
0x205e   : > { %v5417_v49 = vmul.f32 %v14211_v38, %v14213_v48 }
0x2060   : > { %v5418_v50 = vsel %vm5390_vm8, %v5417_v49, 0.0  ;;  %v14257_v49 = vld [vmem:[#allocation37 + $0x8] sm:$0xff]  }
0x2061   : > { %5419 = vadd.xlane.f32.xlu1 %v5418_v50 }
0x20ee   : > { %v5420_v18 = vpop.xlane.xlu1 %5419 }
0x20ef   : > { %10415 = vmatprep.subr.msk.mxu0 %vm5314_vm7, %v5420_v18 }
0x20f0   : > { %10416 = vmatpush3.msk.msra.mxu0 %vm5314_vm7, %v5420_v18 }
0x20f1   : > { %10418 = vmatmul.mubr.msk.bf16.vlgmr.msra.gmra.mrb[52].mxu0 %vm2356_vm5, %v14222_v62 }
0x20f2   : > { %10421 = vmatprep.mubr.msk.bf16.mxu0 %vm2356_vm5, %v14224_v19 }
0x20f9   : > { %10422 = vmatmul.mubr.msk.bf16.gmra.mrb[56].mxu0 %vm2356_vm5, %v14232_v28 }
0x20fa   : > { %10425 = vmatprep.mubr.msk.bf16.mxu0 %vm2356_vm5, %v14234_v5 }
0x2101   : > { %10426 = vmatmul.mubr.msk.bf16.gmra.mrb[60].mxu0 %vm2356_vm5, %v14240_v42 }
0x2102   : > { %10429 = vmatprep.mubr.msk.bf16.mxu0 %vm2356_vm5, %v14242_v9 }
0x2109   : > { %10430 = vmatmul.mubr.msk.bf16.gmra.mrb[64].mxu0 %vm2356_vm5, %v14248_v11 }
0x210a   : > { %10465 = vmatprep.mubr.f32.mxu0 %v14081_v4 }
0x21c4   : > { %v10419_v41 = vpop.f32.mrb[52].mxu0 }
0x21c5   : > { %v5570_v23 = vpop.f32.mrb[53].mxu0 }
0x21c6   : > { %5667 = vperm.xlu0 %11619, %v5570_v23   ;;  %v10420_v24 = vpop.f32.mrb[54].mxu0  ;;  %v14716_v23 = vunpack.c.h.bf16 %v14257_v49 }
0x21c7   : > { %v5573_v46 = vpop.f32.mrb[55].mxu0 }
0x21c8   : > { %5672 = vperm.xlu1 %11620, %v5573_v46  }
0x21ca   : > { %5682 = vperm.xlu0 %11619, %v10420_v24   ;;  %v14719_v24 = vunpack.c.l.bf16 %v14257_v49 }
0x21cc   : > { %5677 = vperm.xlu1 %11620, %v10419_v41   ;;  %v10423_v47 = vpop.f32.mrb[56].mxu0 }
0x21cd   : > { %v5586_v39 = vpop.f32.mrb[57].mxu0 }
0x21ce   : > { %v10424_v29 = vpop.f32.mrb[58].mxu0 }
0x21cf   : > { %v5589_v22 = vpop.f32.mrb[59].mxu0 }
0x21d0   : > { %5687 = vperm.xlu1 %11620, %v5586_v39   ;;  %5692 = vperm.xlu0 %11619, %v5589_v22  }
0x21d4   : > { %5697 = vperm.xlu1 %11620, %v10423_v47   ;;  %5702 = vperm.xlu0 %11619, %v10424_v29   ;;  %v10427_v8 = vpop.f32.mrb[60].mxu0  ;;  %v14265_v47 = vld [vmem:[#allocation37 + $0x10] sm:$0xff]  }
0x21d5   : > { %v5602_v27 = vpop.f32.mrb[61].mxu0 }
0x21d6   : > { %v10428_v2 = vpop.f32.mrb[62].mxu0 }
0x21d7   : > { %v5605_v3 = vpop.f32.mrb[63].mxu0 }
0x21d8   : > { %5707 = vperm.xlu1 %11620, %v5602_v27   ;;  %5712 = vperm.xlu0 %11619, %v5605_v3   ;;  %v14715_v27 = vunpack.c.l.bf16 %v14265_v47  ;;  %v14273_v3 = vld [vmem:[#allocation37 + $0x18] sm:$0xff]  }
0x21dc   : > { %5717 = vperm.xlu1 %11620, %v10427_v8   ;;  %5722 = vperm.xlu0 %11619, %v10428_v2   ;;  %v10431_v59 = vpop.f32.mrb[64].mxu0  ;;  %v14714_v2 = vunpack.c.h.bf16 %v14265_v47 }
0x21dd   : > { %v5618_v34 = vpop.f32.mrb[65].mxu0 }
0x21de   : > { %v10432_v55 = vpop.f32.mrb[66].mxu0 }
0x21df   : > { %v5621_v7 = vpop.f32.mrb[67].mxu0 }
0x21e0   : > { %5727 = vperm.xlu1 %11620, %v5618_v34   ;;  %5732 = vperm.xlu0 %11619, %v5621_v7  }
0x21e4   : > { %5737 = vperm.xlu1 %11620, %v10431_v59   ;;  %5742 = vperm.xlu0 %11619, %v10432_v55  }
0x2245   : > { %v5668_v10 = vpop.permute.xlu0 %5667 }
0x2246   : > { %v5745_v18 = vmul.f32 %v14729_v15, %v5668_v10 }
0x2247   : > { %v5673_v50 = vpop.permute.xlu1 %5672 }
0x2248   : > { %v5746_v41 = vmul.f32 %v14722_v36, %v5673_v50  ;;  %v14718_v50 = vunpack.c.l.bf16 %v14273_v3 }
0x2249   : > { %v5683_v46 = vpop.permute.xlu0 %5682 }
0x224a   : > { %v11021_v39 = vpack.c.bf16 %v5746_v41, %v5745_v18  ;;  %v5748_v22 = vmul.f32 %v14716_v23, %v5683_v46  ;;  %v14717_v18 = vunpack.c.h.bf16 %v14273_v3  ;;  %v14281_v41 = vld [vmem:[#allocation37 + $0x20] sm:$0xff]  }
0x224b   : > { %v5678_v29 = vpop.permute.xlu1 %5677 }
0x224c   : > { %v5747_v8 = vmul.f32 %v14719_v24, %v5678_v29  ;;  %11022 = vmatprep.subr.bf16.mxu0 %v11021_v39 }
0x224d   : > { %11024 = vmatpush3.bf16.msra.mxu0 %v11021_v39 }
0x224e   : > { %v11025_v59 = vpack.c.bf16 %v5748_v22, %v5747_v8 }
0x224f   : > { %v5688_v34 = vpop.permute.xlu1 %5687  ;;  %v5693_v55 = vpop.permute.xlu0 %5692 }
0x2250   : > { %v5749_v7 = vmul.f32 %v14715_v27, %v5688_v34  ;;  %v5750_v10 = vmul.f32 %v14714_v2, %v5693_v55  ;;  %11026 = vmatprep.subr.bf16.mxu0 %v11025_v59  ;;  %v14721_v34 = vunpack.c.l.bf16 %v14281_v41  ;;  %v14720_v55 = vunpack.c.h.bf16 %v14281_v41  ;;  %v14289_v2 = vld [vmem:[#allocation37 + $0x28] sm:$0xff]  }
0x2251   : > { %11028 = vmatpush3.bf16.msra.mxu0 %v11025_v59 }
0x2252   : > { %v11029_v46 = vpack.c.bf16 %v5750_v10, %v5749_v7 }
0x2253   : > { %v5698_v39 = vpop.permute.xlu1 %5697  ;;  %v5703_v29 = vpop.permute.xlu0 %5702 }
0x2254   : > { %v5751_v22 = vmul.f32 %v14718_v50, %v5698_v39  ;;  %v5752_v8 = vmul.f32 %v14717_v18, %v5703_v29  ;;  %11030 = vmatprep.subr.bf16.mxu0 %v11029_v46  ;;  %v14724_v39 = vunpack.c.l.bf16 %v14289_v2  ;;  %v14723_v29 = vunpack.c.h.bf16 %v14289_v2  ;;  %v14297_v18 = vld [vmem:[#allocation37 + $0x30] sm:$0xff]  }
0x2255   : > { %11032 = vmatpush3.bf16.msra.mxu0 %v11029_v46 }
0x2256   : > { %v11033_v59 = vpack.c.bf16 %v5752_v8, %v5751_v22  ;;  %v14728_v8 = vunpack.c.h.bf16 %v14297_v18 }
0x2257   : > { %v5708_v27 = vpop.permute.xlu1 %5707  ;;  %v5713_v23 = vpop.permute.xlu0 %5712 }
0x2258   : > { %v5753_v7 = vmul.f32 %v14721_v34, %v5708_v27  ;;  %v5754_v10 = vmul.f32 %v14720_v55, %v5713_v23  ;;  %11034 = vmatprep.subr.bf16.mxu0 %v11033_v59  ;;  %v14725_v23 = vunpack.c.l.bf16 %v14297_v18  ;;  %v14305_v55 = vld [vmem:[#allocation37 + $0x38] sm:$0xff]  }
0x2259   : > { %11036 = vmatpush3.bf16.msra.mxu0 %v11033_v59 }
0x225a   : > { %v11037_v46 = vpack.c.bf16 %v5754_v10, %v5753_v7  ;;  %v14726_v10 = vunpack.c.h.bf16 %v14305_v55 }
0x225b   : > { %v5718_v50 = vpop.permute.xlu1 %5717  ;;  %v5723_v24 = vpop.permute.xlu0 %5722 }
0x225c   : > { %v5755_v22 = vmul.f32 %v14724_v39, %v5718_v50  ;;  %v5756_v27 = vmul.f32 %v14723_v29, %v5723_v24  ;;  %11038 = vmatprep.subr.bf16.mxu0 %v11037_v46  ;;  %v14727_v24 = vunpack.c.l.bf16 %v14305_v55 }
0x225d   : > { %11040 = vmatpush3.bf16.msra.mxu0 %v11037_v46 }
0x225e   : > { %v11041_v59 = vpack.c.bf16 %v5756_v27, %v5755_v22 }
0x225f   : > { %v5728_v34 = vpop.permute.xlu1 %5727  ;;  %v5733_v36 = vpop.permute.xlu0 %5732 }
0x2260   : > { %v5757_v7 = vmul.f32 %v14725_v23, %v5728_v34  ;;  %v5758_v50 = vmul.f32 %v14728_v8, %v5733_v36  ;;  %11042 = vmatprep.subr.bf16.mxu0 %v11041_v59  ;;  %v14317_v23 = vld [vmem:[#allocation39] sm:$0xff]   ;;  %v14320_v36 = vld [vmem:[#allocation39 + $0x8] sm:$0xff]  }
0x2261   : > { %11044 = vmatpush3.bf16.msra.mxu0 %v11041_v59 }
0x2262   : > { %v11045_v29 = vpack.c.bf16 %v5758_v50, %v5757_v7 }
0x2263   : > { %v5738_v39 = vpop.permute.xlu1 %5737  ;;  %v5743_v46 = vpop.permute.xlu0 %5742 }
0x2264   : > { %v5759_v22 = vmul.f32 %v14727_v24, %v5738_v39  ;;  %v5760_v27 = vmul.f32 %v14726_v10, %v5743_v46  ;;  %11046 = vmatprep.subr.bf16.mxu0 %v11045_v29 }
0x2265   : > { %11048 = vmatpush3.bf16.msra.mxu0 %v11045_v29 }
0x2266   : > { %v11049_v34 = vpack.c.bf16 %v5760_v27, %v5759_v22  ;;  %v14342_v22 = vld [vmem:[#allocation43] sm:$0xff]  }
0x2268   : > { %11050 = vmatprep.subr.bf16.mxu0 %v11049_v34 }
0x2269   : > { %11052 = vmatpush3.bf16.msra.mxu0 %v11049_v34 }
0x226a   : > { %10468 = vmatprep.subr.bf16.mxu0 %v14317_v23 }
0x226c   : > { %10466 = vmatmul.mubr.f32.vlgmr.msra.gmra.mrb[50].mxu0 %v14078_v16 }
0x226d   : > { %10469 = vmatpush3.bf16.msra.mxu0 %v14317_v23 }
0x226e   : > { %10470 = vmatprep.subr.bf16.mxu0 %v14320_v36 }
0x2271   : > { %10471 = vmatpush3.bf16.msra.mxu0 %v14320_v36 }
0x2272   : > { %10510 = vmatprep.subr.msk.mxu0 %vm5314_vm7, %v14213_v48 }
0x233f   : > { %v10467_v39 = vpop.f32.mrb[50].mxu0 }
0x2340   : > { %v5827_v29 = vpop.f32.mrb[51].mxu0 }
0x2341   : > { %10472 = vmatprep.mubr.msk.f32.mxu0 %vm1833_vm2, %v5827_v29 }
0x2342   : > { %10473 = vmatmul.mubr.msk.f32.vlgmr.msra.gmra.mrb[68].mxu0 %vm1833_vm2, %v10467_v39 }
0x2343   : > { %10511 = vmatpush3.msk.msra.mxu0 %vm5314_vm7, %v14213_v48  ;;  %10512 = vmatprep.mubr.msk.f32.mxu0 %vm2356_vm5, %v14209_v54 }
0x2346   : > { %10513 = vmatmul.mubr.msk.f32.vlgmr.msra.gmra.mrb[70].mxu0 %vm2356_vm5, %v14207_v53  ;;  %v14353_v53 = vld [vmem:[#allocation42] sm:$0xff]  }
0x2347   : > { %v14732_v54 = vunpack.c.h.bf16 %v14353_v53  ;;  %v14731_v34 = vunpack.c.l.bf16 %v14353_v53  ;;  %v14836_v50 = vunpack.c.l.bf16 %v14353_v53 }
0x2415   : > { %v10474_v59 = vpop.f32.mrb[68].mxu0 }
0x2416   : > { %v5892_v7 = vpop.f32.mrb[69].mxu0 }
0x2417   : > { %v11085_v46 = vpack.c.bf16 %v10474_v59, %v5892_v7 }
0x2419   : > { %v10514_v27 = vpop.f32.mrb[70].mxu0  ;;  %11087 = vmatprep.subr.msk.bf16.mxu0 %vm14338_vm9, %v11085_v46 }
0x241a   : > { %v6067_v48 = vpop.f32.mrb[71].mxu0  ;;  %11090 = vmatpush3.bf16.xpose.msk.msra.mxu0 %vm14338_vm9, %v11085_v46 }
0x241b   : > { %10519 = vmatprep.mubr.msk.f32.mxu0 %vm2356_vm5, %v6067_v48  ;;  %10522 = vmatprep.subr.bf16.mxu0 %v14342_v22 }
0x2421   : > { %10520 = vmatmul.mubr.msk.f32.vlgmr.msra.gmra.mrb[72].mxu0 %vm2356_vm5, %v10514_v27 }
0x2422   : > { %10523 = vmatpush3.bf16.msra.mxu0 %v14342_v22 }
0x2423   : > { %11092 = vmatprep.subr.bf16.mxu0 %v14086_v57 }
0x24f4   : > { %v10521_v39 = vpop.f32.mrb[72].mxu0 }
0x24f5   : > { %v6164_v29 = vadd.f32 %v10521_v39, %v14732_v54  ;;  %v6158_v59 = vpop.f32.mrb[73].mxu0 }
0x24f6   : > { %v6159_v7 = vadd.f32 %v14731_v34, %v6158_v59 }
0x24f7   : > { %v9355_v46 = vmul.f32 -1.442695, %v6164_v29 }
0x24f8   : > { %v9354_v27 = vmul.f32 -1.442695, %v6159_v7 }
0x24f9   : > { %11809 = vpow2.f32 %v9355_v46 }
0x24fa   : > { %11811 = vpow2.f32 %v9354_v27 }
0x2503   : > { %v11810_v48 = vpop.eup %11809 }
0x2504   : > { %v11812_v10 = vpop.eup %11811  ;;  %v6174_v24 = vadd.f32 1.0, %v11810_v48 }
0x2505   : > { %v6173_v8 = vadd.f32 1.0, %v11812_v10 }
0x2507   : > { %11813 = vrcp.f32 %v6173_v8 }
0x2508   : > { %11815 = vrcp.f32 %v6174_v24 }
0x2511   : > { %v11814_v15 = vpop.eup %11813 }
0x2512   : > { %v11816_v44 = vpop.eup %11815  ;;  %10524 = vmatprep.mubr.msk.f32.mxu0 %vm1736_vm1, %v11814_v15 }
0x2513   : > { %10525 = vmatmul.mubr.msk.f32.vlgmr.msra.gmra.mrb[74].mxu0 %vm1736_vm1, %v11816_v44 }
0x2514   : > { %11094 = vmatpush3.bf16.msra.mxu0 %v14086_v57 }
0x2515   : > { %11096 = vmatprep.subr.bf16.mxu0 %v14086_v57 }
0x25e6   : > { %v10526_v39 = vpop.f32.mrb[74].mxu0 }
0x25e7   : > { %v6227_v29 = vpop.f32.mrb[75].mxu0  ;;  %v6239_v59 = vsel %vm1736_vm1, %v10526_v39, -inf }
0x25e8   : > { %6240 = vmax.xlane.f32.xlu0 %v6239_v59  ;;  %v6236_v7 = vsel %vm1736_vm1, %v6227_v29, -inf }
0x25e9   : > { %6237 = vmax.xlane.f32.xlu1 %v6236_v7  ;;  %v14369_v7 = vld [vmem:[#allocation45] sm:$0xff]  }
0x2675   : > { %v6241_v8 = vpop.xlane.xlu0 %6240 }
0x2676   : > { %v6243_v24 = vsub.f32 %v10526_v39, %v6241_v8  ;;  %v6238_v10 = vpop.xlane.xlu1 %6237  ;;  %v14371_v39 = vld [vmem:[#allocation45 + $0x8] sm:$0xff]   ;;  %v9566_v8 = vunpack.c.l.bf16 %v14369_v7 }
0x2677   : > { %v6242_v46 = vsub.f32 %v6227_v29, %v6238_v10 }
0x2678   : > { %v6246_v27 = vmul.f32 1.442695, %v6243_v24 }
0x2679   : > { %v6244_v15 = vmul.f32 1.442695, %v6242_v46  ;;  %v14739_v46 = vunpack.c.h.bf16 %v14369_v7 }
0x267a   : > { %11817 = vpow2.f32 %v6246_v27 }
0x267b   : > { %11819 = vpow2.f32 %v6244_v15  ;;  %v14376_v15 = vld [vmem:[#allocation45 + $0x10] sm:$0xff]  }
0x2684   : > { %v11818_v44 = vpop.eup %11817 }
0x2685   : > { %v11820_v48 = vpop.eup %11819  ;;  %v6251_v34 = vsel %vm1736_vm1, %v11818_v44, 0.0 }
0x2686   : > { %6252 = vadd.xlane.f32.xlu1 %v6251_v34  ;;  %v6248_v54 = vsel %vm1736_vm1, %v11820_v48, 0.0  ;;  %v14738_v34 = vunpack.c.l.bf16 %v14371_v39 }
0x2687   : > { %6249 = vadd.xlane.f32.xlu0 %v6248_v54 }
0x2713   : > { %v6253_v59 = vpop.xlane.xlu1 %6252 }
0x2714   : > { %11821 = vrcp.f32 %v6253_v59  ;;  %v6250_v1 = vpop.xlane.xlu0 %6249  ;;  %v14737_v59 = vunpack.c.h.bf16 %v14371_v39 }
0x2715   : > { %11823 = vrcp.f32 %v6250_v1 }
0x271e   : > { %v11822_v29 = vpop.eup %11821 }
0x271f   : > { %v11824_v24 = vpop.eup %11823  ;;  %v6257_v10 = vmul.f32 %v11822_v29, %v11818_v44  ;;  %v14736_v29 = vunpack.c.l.bf16 %v14376_v15 }
0x2720   : > { %v6256_v27 = vmul.f32 %v11824_v24, %v11820_v48  ;;  %v14735_v24 = vunpack.c.h.bf16 %v14376_v15 }
0x2721   : > { %v6263_v1 = vmul.f32 %v14739_v46, %v6257_v10  ;;  %v6351_v48 = vmul.f32 %v14737_v59, %v6257_v10 }
0x2722   : > { %v6262_v54 = vmul.f32 %v9566_v8, %v6256_v27  ;;  %v6350_v44 = vmul.f32 %v14738_v34, %v6256_v27 }
0x2724   : > { %10531 = vmatprep.mubr.msk.f32.mxu0 %vm1736_vm1, %v6262_v54  ;;  %v6438_v54 = vmul.f32 %v14736_v29, %v6256_v27  ;;  %v14817_v27 = vmov 0.0  }
0x2725   : > { %10532 = vmatmul.mubr.msk.f32.vlgmr.msra.gmra.mrb[76].mxu0 %vm1736_vm1, %v6263_v1  ;;  %v6439_v1 = vmul.f32 %v14735_v24, %v6257_v10 }
0x2726   : > { %11098 = vmatpush3.bf16.msra.mxu0 %v14086_v57  ;;  %10538 = vmatprep.mubr.msk.f32.mxu0 %vm1736_vm1, %v6350_v44  ;;  %v14404_v44 = vpack.c.bf16 %v14088_v58, %v14091_v60 }
0x2727   : > { %11100 = vmatprep.subr.bf16.mxu0 %v14086_v57 }
0x2729   : > { %10539 = vmatmul.mubr.msk.f32.vlgmr.msra.gmra.mrb[78].mxu0 %vm1736_vm1, %v6351_v48 }
0x272a   : > { %11102 = vmatpush3.bf16.msra.mxu0 %v14086_v57  ;;  %10545 = vmatprep.mubr.msk.f32.mxu0 %vm1736_vm1, %v6438_v54  ;;  %v14818_v57 = vunpack.c.l.bf16 %v14135_v33 }
0x272b   : > { %11103 = vmatprep.subr.bf16.mxu0 %v12875_v0 }
0x272d   : > { %10546 = vmatmul.mubr.msk.f32.vlgmr.msra.gmra.mrb[80].mxu0 %vm1736_vm1, %v6439_v1 }
0x272e   : > { %11105 = vmatpush3.bf16.msra.mxu0 %v14404_v44  ;;  %10552 = vmatprep.mubr.msk.f32.mxu0 %vm12876_vm0, %v14817_v27 }
0x272f   : > { %11107 = vmatprep.subr.bf16.mxu0 %v14024_v20 }
0x2731   : > { %10553 = vmatmul.mubr.msk.f32.vlgmr.msra.gmra.mrb[82].mxu0 %vm1736_vm1, %v14094_v63 }
0x2732   : > { %11109 = vmatpush3.bf16.msra.mxu0 %v14024_v20  ;;  %10606 = vmatprep.mubr.f32.mxu0 %v14091_v60 }
0x2733   : > { %11111 = vmatprep.subr.bf16.mxu0 %v14037_v37 }
0x2736   : > { %11113 = vmatpush3.bf16.msra.mxu0 %v14037_v37 }
0x2737   : > { %11115 = vmatprep.subr.bf16.mxu0 %v14047_v43 }
0x273a   : > { %11117 = vmatpush3.bf16.msra.mxu0 %v14047_v43 }
0x273b   : > { %11119 = vmatprep.subr.bf16.mxu0 %v14052_v26 }
0x273e   : > { %11121 = vmatpush3.bf16.msra.mxu0 %v14052_v26 }
0x273f   : > { %11123 = vmatprep.subr.bf16.mxu0 %v14056_v30 }
0x2742   : > { %11125 = vmatpush3.bf16.msra.mxu0 %v14056_v30 }
0x2743   : > { %11127 = vmatprep.subr.bf16.mxu0 %v14060_v12 }
0x2746   : > { %11129 = vmatpush3.bf16.msra.mxu0 %v14060_v12 }
0x2747   : > { %11131 = vmatprep.subr.bf16.mxu0 %v14064_v31 }
0x274a   : > { %11133 = vmatpush3.bf16.msra.mxu0 %v14064_v31 }
0x274b   : > { %11135 = vmatprep.subr.bf16.mxu0 %v14068_v61 }
0x274e   : > { %11137 = vmatpush3.bf16.msra.mxu0 %v14068_v61 }
0x274f   : > { %10616 = vmatprep.subr.mxu0 %v14817_v27 }
0x2751   : > { %10607 = vmatmul.mubr.f32.vlgmr.msra.gmra.mrb[84].mxu0 %v14088_v58 }
0x2752   : > { %10618 = vmatprep.mubr.msk.bf16.mxu0 %vm12876_vm0, %v14817_v27 }
0x27f8   : > { %v14433_v0 = vpop.f32.mrb[76].mxu0 }
0x27f9   : > { %v14435_v20 = vpop.f32.mrb[77].mxu0 }
0x27fc   : > { %v14437_v37 = vpop.f32.mrb[78].mxu0 }
0x27fd   : > { %v14439_v43 = vpop.f32.mrb[79].mxu0 }
0x2800   : > { %v14441_v26 = vpop.f32.mrb[80].mxu0 }
0x2801   : > { %v14443_v30 = vpop.f32.mrb[81].mxu0 }
0x2804   : > { %v6587_v12 = vpop.f32.mrb[82].mxu0 }
0x2805   : > { %v6594_v31 = vrot.slane %v6587_v12, %v13666_v17  ;;  %v10554_v61 = vpop.f32.mrb[83].mxu0 }
0x2807   : > { %v6595_v63 = vmul.f32 %v6594_v31, %v14818_v57 }
0x2809   : > { %10572 = vmatmul.mubr.f32.vlgmr.msra.gmra.mrb[60].mxu1 %v6595_v63 }
0x280a   : > { %10613 = vmatprep.mubr.msk.f32.mxu1 %vm12876_vm0, %v14817_v27 }
0x2824   : > { %v10608_v10 = vpop.f32.mrb[84].mxu0 }
0x2825   : > { %v6700_v48 = vpop.f32.mrb[85].mxu0 }
0x2826   : > { %v11139_v54 = vpack.c.bf16 %v10608_v10, %v6700_v48 }
0x2828   : > { %11140 = vmatpush3.bf16.msra.mxu1 %v11139_v54 }
0x28dc   : > { %v6630_v1 = vpop.f32.mrb[60].mxu1 }
0x28dd   : > { %10614 = vmatmul.mubr.msk.f32.vlgmr.msra.gmra.mrb[62].mxu1 %vm1736_vm1, %v6630_v1  ;;  %v10573_v24 = vpop.f32.mrb[61].mxu1 }
0x28de   : > { %10624 = vmatprep.mubr.msk.bf16.mxu1 %vm2356_vm5, %v14218_v52 }
0x29b0   : > { %v6778_v17 = vpop.f32.mrb[62].mxu1 }
0x29b1   : > { %v6779_v12 = vadd.f32 %v6778_v17, %v14144_v25  ;;  %v10615_v33 = vpop.f32.mrb[63].mxu1 }
0x29b3   : > { %v9367_v31 = vmul.f32 -1.442695, %v6779_v12 }
0x29b5   : > { %11825 = vpow2.f32 %v9367_v31 }
0x29bf   : > { %v11826_v61 = vpop.eup %11825 }
0x29c0   : > { %v6785_v57 = vadd.f32 1.0, %v11826_v61 }
0x29c2   : > { %11827 = vrcp.f32 %v6785_v57 }
0x29cc   : > { %v11828_v27 = vpop.eup %11827 }
0x29cd   : > { %10617 = vmatpush3.msk.msra.mxu0 %vm5314_vm7, %v11828_v27 }
0x29ce   : > { %10619 = vmatmul.mubr.msk.bf16.vlgmr.msra.gmra.mrb[88].mxu0 %vm2356_vm5, %v14149_v32 }
0x29cf   : > { %10672 = vmatprep.mubr.f32.mxu0 %v14091_v60 }
0x2aa1   : > { %v6857_v24 = vpop.f32.mrb[88].mxu0 }
0x2aa2   : > { %v6863_v52 = vsel %vm5390_vm8, %v6857_v24, -inf  ;;  %v10620_v63 = vpop.f32.mrb[89].mxu0 }
0x2aa3   : > { %v6864_v10 = vrot.slane %v6863_v52, 4  ;;  %v6860_v25 = vpop.f32.mrb[90].mxu0 }
0x2aa4   : > { %v10621_v48 = vpop.f32.mrb[91].mxu0 }
0x2aa5   : > { %v6865_v54 = vmax.f32 %v6863_v52, %v6864_v10 }
0x2aa7   : > { %v6866_v1 = vrot.slane %v6865_v54, 2 }
0x2aa9   : > { %v6867_v17 = vmax.f32 %v6865_v54, %v6866_v1 }
0x2aab   : > { %v6868_v12 = vrot.slane %v6867_v17, 1 }
0x2aad   : > { %v6869_v33 = vmax.f32 %v6867_v17, %v6868_v12 }
0x2aaf   : > { %v6870_v31 = vsub.f32 %v6857_v24, %v6869_v33  ;;  %v14819_v33 = vunpack.c.l.bf16 %v14253_v6 }
0x2ab1   : > { %v6871_v61 = vmul.f32 1.442695, %v6870_v31 }
0x2ab3   : > { %11829 = vpow2.f32 %v6871_v61  ;;  %v14820_v61 = vunpack.c.h.bf16 %v14253_v6  ;;  %v14824_v6 = vunpack.c.h.bf16 %v14265_v47 }
0x2abd   : > { %v11830_v57 = vpop.eup %11829 }
0x2abe   : > { %v6873_v32 = vsel %vm5390_vm8, %v11830_v57, 0.0 }
0x2abf   : > { %v6874_v27 = vrot.slane %v6873_v32, 4 }
0x2ac1   : > { %v6875_v29 = vadd.f32 %v6874_v27, %v6873_v32 }
0x2ac3   : > { %v6876_v59 = vrot.slane %v6875_v29, 2 }
0x2ac5   : > { %v6877_v34 = vadd.f32 %v6876_v59, %v6875_v29 }
0x2ac7   : > { %v6878_v46 = vrot.slane %v6877_v34, 1 }
0x2ac9   : > { %v6879_v63 = vadd.f32 %v6878_v46, %v6877_v34 }
0x2acb   : > { %11831 = vrcp.f32 %v6879_v63 }
0x2ad5   : > { %v11832_v25 = vpop.eup %11831 }
0x2ad6   : > { %v14460_v48 = vmul.f32 %v11832_v25, %v11830_v57 }
0x2ad8   : > { %v6882_v52 = vmul.f32 %v14211_v38, %v14460_v48 }
0x2ada   : > { %v6883_v24 = vsel %vm5390_vm8, %v6882_v52, 0.0  ;;  %v14821_v52 = vunpack.c.l.bf16 %v14257_v49 }
0x2adb   : > { %6884 = vadd.xlane.f32.xlu0 %v6883_v24 }
0x2b68   : > { %v6885_v10 = vpop.xlane.xlu0 %6884 }
0x2b69   : > { %10622 = vmatprep.subr.msk.mxu1 %vm5314_vm7, %v6885_v10 }
0x2b6a   : > { %10623 = vmatpush3.msk.msra.mxu1 %vm5314_vm7, %v6885_v10  ;;  %v14822_v10 = vunpack.c.h.bf16 %v14257_v49  ;;  %v14826_v49 = vunpack.c.h.bf16 %v14273_v3 }
0x2b6b   : > { %10625 = vmatmul.mubr.msk.bf16.vlgmr.msra.gmra.mrb[64].mxu1 %vm2356_vm5, %v14222_v62  ;;  %10675 = vmatprep.subr.bf16.mxu1 %v14317_v23 }
0x2b6c   : > { %10676 = vmatpush3.bf16.msra.mxu1 %v14317_v23  ;;  %10628 = vmatprep.mubr.msk.bf16.mxu1 %vm2356_vm5, %v14224_v19 }
0x2b6d   : > { %10677 = vmatprep.subr.bf16.mxu1 %v14320_v36 }
0x2b70   : > { %10678 = vmatpush3.bf16.msra.mxu1 %v14320_v36 }
0x2b71   : > { %10717 = vmatprep.subr.msk.mxu1 %vm5314_vm7, %v14460_v48 }
0x2b73   : > { %10629 = vmatmul.mubr.msk.bf16.gmra.mrb[68].mxu1 %vm2356_vm5, %v14232_v28 }
0x2b74   : > { %10632 = vmatprep.mubr.msk.bf16.mxu1 %vm2356_vm5, %v14234_v5 }
0x2b7b   : > { %10633 = vmatmul.mubr.msk.bf16.gmra.mrb[72].mxu1 %vm2356_vm5, %v14240_v42 }
0x2b7c   : > { %10636 = vmatprep.mubr.msk.bf16.mxu1 %vm2356_vm5, %v14242_v9 }
0x2b83   : > { %10637 = vmatmul.mubr.msk.bf16.gmra.mrb[76].mxu1 %vm2356_vm5, %v14248_v11 }
0x2c3e   : > { %v10626_v38 = vpop.f32.mrb[64].mxu1 }
0x2c3f   : > { %v6955_v62 = vpop.f32.mrb[65].mxu1 }
0x2c40   : > { %7020 = vperm.xlu1 %11620, %v6955_v62   ;;  %v10627_v19 = vpop.f32.mrb[66].mxu1 }
0x2c41   : > { %v6958_v23 = vpop.f32.mrb[67].mxu1 }
0x2c42   : > { %7025 = vperm.xlu0 %11619, %v6958_v23  }
0x2c44   : > { %7030 = vperm.xlu1 %11620, %v10626_v38  }
0x2c46   : > { %v10630_v28 = vpop.f32.mrb[68].mxu1 }
0x2c47   : > { %v6971_v36 = vpop.f32.mrb[69].mxu1 }
0x2c48   : > { %7035 = vperm.xlu1 %11620, %v10627_v19   ;;  %7040 = vperm.xlu0 %11619, %v6971_v36   ;;  %v10631_v5 = vpop.f32.mrb[70].mxu1 }
0x2c49   : > { %v6974_v46 = vpop.f32.mrb[71].mxu1 }
0x2c4c   : > { %7050 = vperm.xlu0 %11619, %v10630_v28   ;;  %7045 = vperm.xlu1 %11620, %v6974_v46   ;;  %v14823_v28 = vunpack.c.l.bf16 %v14265_v47 }
0x2c4e   : > { %v10634_v42 = vpop.f32.mrb[72].mxu1 }
0x2c4f   : > { %v6987_v9 = vpop.f32.mrb[73].mxu1 }
0x2c50   : > { %7055 = vperm.xlu1 %11620, %v10631_v5   ;;  %7060 = vperm.xlu0 %11619, %v6987_v9   ;;  %v10635_v11 = vpop.f32.mrb[74].mxu1 }
0x2c51   : > { %v6990_v34 = vpop.f32.mrb[75].mxu1 }
0x2c54   : > { %7070 = vperm.xlu0 %11619, %v10634_v42   ;;  %7065 = vperm.xlu1 %11620, %v6990_v34  }
0x2c56   : > { %v10638_v59 = vpop.f32.mrb[76].mxu1 }
0x2c57   : > { %v7003_v29 = vpop.f32.mrb[77].mxu1 }
0x2c58   : > { %7075 = vperm.xlu1 %11620, %v10635_v11   ;;  %7080 = vperm.xlu0 %11619, %v7003_v29   ;;  %v10639_v54 = vpop.f32.mrb[78].mxu1  ;;  %v14825_v11 = vunpack.c.l.bf16 %v14273_v3 }
0x2c59   : > { %v7006_v1 = vpop.f32.mrb[79].mxu1 }
0x2c5c   : > { %7090 = vperm.xlu0 %11619, %v10638_v59   ;;  %7085 = vperm.xlu1 %11620, %v7006_v1  }
0x2c60   : > { %7095 = vperm.xlu1 %11620, %v10639_v54  }
0x2cbf   : > { %v7021_v17 = vpop.permute.xlu1 %7020 }
0x2cc0   : > { %v7098_v31 = vmul.f32 %v14819_v33, %v7021_v17  ;;  %v14827_v17 = vunpack.c.l.bf16 %v14281_v41 }
0x2cc1   : > { %v7026_v12 = vpop.permute.xlu0 %7025 }
0x2cc2   : > { %v7099_v57 = vmul.f32 %v14820_v61, %v7026_v12  ;;  %v14828_v12 = vunpack.c.h.bf16 %v14281_v41  ;;  %v14832_v41 = vunpack.c.h.bf16 %v14297_v18 }
0x2cc3   : > { %v7031_v32 = vpop.permute.xlu1 %7030 }
0x2cc4   : > { %v11141_v27 = vpack.c.bf16 %v7099_v57, %v7098_v31  ;;  %v7100_v24 = vmul.f32 %v14821_v52, %v7031_v32  ;;  %v14829_v32 = vunpack.c.l.bf16 %v14289_v2 }
0x2cc6   : > { %11142 = vmatprep.subr.bf16.mxu0 %v11141_v27 }
0x2cc7   : > { %v7036_v63 = vpop.permute.xlu1 %7035  ;;  %11144 = vmatpush3.bf16.msra.mxu0 %v11141_v27  ;;  %v7041_v25 = vpop.permute.xlu0 %7040  ;;  %v14830_v27 = vunpack.c.h.bf16 %v14289_v2  ;;  %v14834_v2 = vunpack.c.h.bf16 %v14305_v55 }
0x2cc8   : > { %v7101_v38 = vmul.f32 %v14822_v10, %v7036_v63  ;;  %v7102_v36 = vmul.f32 %v14823_v28, %v7041_v25  ;;  %v14833_v28 = vunpack.c.l.bf16 %v14305_v55  ;;  %v14835_v55 = vunpack.c.h.bf16 %v14353_v53 }
0x2cca   : > { %v11145_v62 = vpack.c.bf16 %v7101_v38, %v7100_v24  ;;  %v14831_v24 = vunpack.c.l.bf16 %v14297_v18 }
0x2ccb   : > { %v7051_v19 = vpop.permute.xlu0 %7050  ;;  %v7046_v23 = vpop.permute.xlu1 %7045 }
0x2ccc   : > { %v7103_v5 = vmul.f32 %v14824_v6, %v7046_v23  ;;  %11146 = vmatprep.subr.bf16.mxu0 %v11145_v62  ;;  %v7104_v34 = vmul.f32 %v14825_v11, %v7051_v19 }
0x2ccd   : > { %11148 = vmatpush3.bf16.msra.mxu0 %v11145_v62 }
0x2cce   : > { %v11149_v46 = vpack.c.bf16 %v7103_v5, %v7102_v36 }
0x2ccf   : > { %v7056_v42 = vpop.permute.xlu1 %7055  ;;  %v7061_v9 = vpop.permute.xlu0 %7060 }
0x2cd0   : > { %v7105_v59 = vmul.f32 %v14826_v49, %v7056_v42  ;;  %11150 = vmatprep.subr.bf16.mxu0 %v11149_v46  ;;  %v7106_v47 = vmul.f32 %v14827_v17, %v7061_v9 }
0x2cd1   : > { %11152 = vmatpush3.bf16.msra.mxu0 %v11149_v46 }
0x2cd2   : > { %v11153_v29 = vpack.c.bf16 %v7105_v59, %v7104_v34 }
0x2cd3   : > { %v7071_v54 = vpop.permute.xlu0 %7070  ;;  %v7066_v1 = vpop.permute.xlu1 %7065 }
0x2cd4   : > { %v7107_v33 = vmul.f32 %v14828_v12, %v7066_v1  ;;  %11154 = vmatprep.subr.bf16.mxu0 %v11153_v29  ;;  %v7108_v3 = vmul.f32 %v14829_v32, %v7071_v54 }
0x2cd5   : > { %11156 = vmatpush3.bf16.msra.mxu0 %v11153_v29 }
0x2cd6   : > { %v11157_v31 = vpack.c.bf16 %v7107_v33, %v7106_v47 }
0x2cd7   : > { %v7076_v61 = vpop.permute.xlu1 %7075  ;;  %v7081_v57 = vpop.permute.xlu0 %7080 }
0x2cd8   : > { %v7109_v63 = vmul.f32 %v14830_v27, %v7076_v61  ;;  %11158 = vmatprep.subr.bf16.mxu0 %v11157_v31  ;;  %v7110_v10 = vmul.f32 %v14831_v24, %v7081_v57 }
0x2cd9   : > { %11160 = vmatpush3.bf16.msra.mxu0 %v11157_v31 }
0x2cda   : > { %v11161_v25 = vpack.c.bf16 %v7109_v63, %v7108_v3 }
0x2cdb   : > { %v7086_v52 = vpop.permute.xlu1 %7085  ;;  %v7091_v62 = vpop.permute.xlu0 %7090 }
0x2cdc   : > { %v7111_v38 = vmul.f32 %v14832_v41, %v7086_v52  ;;  %11162 = vmatprep.subr.bf16.mxu0 %v11161_v25  ;;  %v7112_v36 = vmul.f32 %v14833_v28, %v7091_v62 }
0x2cdd   : > { %11164 = vmatpush3.bf16.msra.mxu0 %v11161_v25 }
0x2cde   : > { %v11165_v19 = vpack.c.bf16 %v7111_v38, %v7110_v10 }
0x2cdf   : > { %v7096_v23 = vpop.permute.xlu1 %7095 }
0x2ce0   : > { %v7113_v6 = vmul.f32 %v14834_v2, %v7096_v23  ;;  %11166 = vmatprep.subr.bf16.mxu0 %v11165_v19  ;;  %v14838_v23 = vunpack.c.h.bf16 %v14369_v7  ;;  %v14841_v7 = vunpack.c.l.bf16 %v14376_v15 }
0x2ce1   : > { %11168 = vmatpush3.bf16.msra.mxu0 %v11165_v19 }
0x2ce2   : > { %v11169_v5 = vpack.c.bf16 %v7113_v6, %v7112_v36  ;;  %v14839_v36 = vunpack.c.l.bf16 %v14371_v39 }
0x2ce4   : > { %11170 = vmatprep.subr.bf16.mxu0 %v11169_v5 }
0x2ce5   : > { %11172 = vmatpush3.bf16.msra.mxu0 %v11169_v5  ;;  %v11689_v5 = vld [vmem:[%s14837_s12 + $0x40] sm:$0xff]  }
0x2ce6   : > { %11174 = vmatprep.subr.bf16.mxu0 %v14147_v21 }
0x2ce8   : > { %10673 = vmatmul.mubr.f32.vlgmr.msra.gmra.mrb[86].mxu0 %v14088_v58 }
0x2ce9   : > { %11176 = vmatpush3.bf16.msra.mxu0 %v14147_v21  ;;  %10714 = vmatprep.mubr.f32.mxu0 %v14091_v60 }
0x2cea   : > { %11178 = vmatprep.subr.bf16.mxu0 %v14151_v13 }
0x2ced   : > { %11180 = vmatpush3.bf16.msra.mxu0 %v14151_v13 }
0x2cee   : > { %11182 = vmatprep.subr.bf16.mxu0 %v14160_v56 }
0x2cf1   : > { %11184 = vmatpush3.bf16.msra.mxu0 %v14160_v56 }
0x2cf2   : > { %11186 = vmatprep.subr.bf16.mxu0 %v14164_v35 }
0x2cf5   : > { %11188 = vmatpush3.bf16.msra.mxu0 %v14164_v35 }
0x2cf6   : > { %11190 = vmatprep.subr.bf16.mxu0 %v14168_v51 }
0x2cf9   : > { %11192 = vmatpush3.bf16.msra.mxu0 %v14168_v51 }
0x2cfa   : > { %11194 = vmatprep.subr.bf16.mxu0 %v14172_v14 }
0x2cfd   : > { %11196 = vmatpush3.bf16.msra.mxu0 %v14172_v14 }
0x2cfe   : > { %11198 = vmatprep.subr.bf16.mxu0 %v14176_v40 }
0x2d01   : > { %11200 = vmatpush3.bf16.msra.mxu0 %v14176_v40 }
0x2d02   : > { %11202 = vmatprep.subr.bf16.mxu0 %v14180_v45 }
0x2d05   : > { %11204 = vmatpush3.bf16.msra.mxu0 %v14180_v45 }
0x2d08   : > { %10715 = vmatmul.mubr.f32.vlgmr.msra.gmra.mrb[92].mxu0 %v14088_v58 }
0x2d09   : > { %8344 = vmatprep.mubr.f32.mxu0 %v14081_v4 }
0x2dbb   : > { %v10674_v21 = vpop.f32.mrb[86].mxu0 }
0x2dbc   : > { %v7180_v13 = vpop.f32.mrb[87].mxu0 }
0x2dbd   : > { %10679 = vmatprep.mubr.msk.f32.mxu1 %vm1833_vm2, %v7180_v13  ;;  %v14842_v13 = vunpack.c.h.bf16 %v14376_v15  ;;  %v11693_v15 = vld [vmem:[%s14837_s12 + $0x60] sm:$0xff]  }
0x2dbe   : > { %10680 = vmatmul.mubr.msk.f32.vlgmr.msra.gmra.mrb[80].mxu1 %vm1833_vm2, %v10674_v21 }
0x2dbf   : > { %10718 = vmatpush3.msk.msra.mxu1 %vm5314_vm7, %v14460_v48 }
0x2ddb   : > { %v10716_v56 = vpop.f32.mrb[92].mxu0 }
0x2ddc   : > { %v7304_v35 = vpop.f32.mrb[93].mxu0 }
0x2ddd   : > { %10719 = vmatprep.mubr.msk.f32.mxu1 %vm2356_vm5, %v7304_v35  ;;  %v11690_v35 = vld [vmem:[%s14837_s12 + $0x48] sm:$0xff]  }
0x2dde   : > { %10720 = vmatmul.mubr.msk.f32.vlgmr.msra.gmra.mrb[82].mxu1 %vm2356_vm5, %v10716_v56 }
0x2e91   : > { %v10681_v51 = vpop.f32.mrb[80].mxu1 }
0x2e92   : > { %v7229_v14 = vpop.f32.mrb[81].mxu1 }
0x2e93   : > { %v11205_v40 = vpack.c.bf16 %v10681_v51, %v7229_v14  ;;  %v11694_v51 = vld [vmem:[%s14837_s12 + $0x68] sm:$0xff]   ;;  %v11695_v14 = vld [vmem:[%s14837_s12 + $0x70] sm:$0xff]  }
0x2e95   : > { %11207 = vmatprep.subr.msk.bf16.mxu1 %vm14338_vm9, %v11205_v40 }
0x2e96   : > { %11210 = vmatpush3.bf16.xpose.msk.msra.mxu1 %vm14338_vm9, %v11205_v40  ;;  %v11697_v40 = vld [vmem:[%s14837_s12] sm:$0xff]  }
0x2e97   : > { %10729 = vmatprep.subr.bf16.mxu1 %v14342_v22 }
0x2eb1   : > { %v10721_v4 = vpop.f32.mrb[82].mxu1 }
0x2eb2   : > { %v7388_v45 = vpop.f32.mrb[83].mxu1 }
0x2eb3   : > { %10726 = vmatprep.mubr.msk.f32.mxu1 %vm2356_vm5, %v7388_v45  ;;  %v11699_v45 = vld [vmem:[%s14837_s12 + $0x10] sm:$0xff]  }
0x2eb4   : > { %10727 = vmatmul.mubr.msk.f32.vlgmr.msra.gmra.mrb[84].mxu1 %vm2356_vm5, %v10721_v4  ;;  %v11698_v4 = vld [vmem:[%s14837_s12 + $0x8] sm:$0xff]  }
0x2eb5   : > { %10730 = vmatpush3.bf16.msra.mxu1 %v14342_v22 }
0x2eb6   : > { %11212 = vmatprep.subr.bf16.mxu1 %v14404_v44 }
0x2f87   : > { %v10728_v18 = vpop.f32.mrb[84].mxu1 }
0x2f88   : > { %v7481_v48 = vadd.f32 %v10728_v18, %v14835_v55  ;;  %v7475_v46 = vpop.f32.mrb[85].mxu1  ;;  %v11700_v18 = vld [vmem:[%s14837_s12 + $0x18] sm:$0xff]   ;;  %v11701_v55 = vld [vmem:[%s14837_s12 + $0x20] sm:$0xff]  }
0x2f89   : > { %v7476_v42 = vadd.f32 %v14836_v50, %v7475_v46  ;;  %v11704_v46 = vld [vmem:[%s14837_s12 + $0x38] sm:$0xff]   ;;  %v11705_v50 = vld [vmem:[%s14837_s12 + $0x80] sm:$0xff]  }
0x2f8a   : > { %v9389_v9 = vmul.f32 -1.442695, %v7481_v48  ;;  %v11702_v48 = vld [vmem:[%s14837_s12 + $0x28] sm:$0xff]  }
0x2f8b   : > { %v9388_v11 = vmul.f32 -1.442695, %v7476_v42  ;;  %v11713_v42 = vld [vmem:[%s14843_s8 + $0x40] sm:$0xff]  }
0x2f8c   : > { %11833 = vpow2.f32 %v9389_v9  ;;  %v11714_v9 = vld [vmem:[%s14843_s8] sm:$0xff]   ;;  %10005 = vmatprep.subr.bf16.mxu0 %v11713_v42 }
0x2f8d   : > { %11835 = vpow2.f32 %v9388_v11  ;;  %v11715_v11 = vld [vmem:[%s14843_s8 + $0x48] sm:$0xff]   ;;  %10006 = vmatpush3.bf16.msra.mxu0 %v11714_v9 }
0x2f8e   : > { %10007 = vmatprep.subr.bf16.mxu0 %v11715_v11  ;;  %v11737_v11 = vld [vmem:[%s13092_s9] sm:$0xff]  }
0x2f96   : > { %v11834_v34 = vpop.eup %11833 }
0x2f97   : > { %v11836_v49 = vpop.eup %11835  ;;  %v7491_v59 = vadd.f32 1.0, %v11834_v34  ;;  %v11716_v34 = vld [vmem:[%s14843_s8 + $0x8] sm:$0xff]  }
0x2f98   : > { %v7490_v29 = vadd.f32 1.0, %v11836_v49  ;;  %v11717_v49 = vld [vmem:[%s14843_s8 + $0x50] sm:$0xff]   ;;  %10008 = vmatpush3.bf16.msra.mxu0 %v11716_v34  ;;  %v11738_v34 = vld [vmem:[%s13092_s9 + $0x8] sm:$0xff]  }
0x2f99   : > { %10009 = vmatprep.subr.bf16.mxu0 %v11717_v49  ;;  %v11739_v49 = vld [vmem:[%s13092_s9 + $0x10] sm:$0xff]  }
0x2f9a   : > { %11837 = vrcp.f32 %v7490_v29  ;;  %v11719_v29 = vld [vmem:[%s14843_s8 + $0x58] sm:$0xff]  }
0x2f9b   : > { %11839 = vrcp.f32 %v7491_v59  ;;  %v11718_v59 = vld [vmem:[%s14843_s8 + $0x10] sm:$0xff]  }
0x2f9c   : > { %10010 = vmatpush3.bf16.msra.mxu0 %v11718_v59 }
0x2f9d   : > { %10011 = vmatprep.subr.bf16.mxu0 %v11719_v29 }
0x2fa4   : > { %v11838_v22 = vpop.eup %11837 }
0x2fa5   : > { %v11840_v54 = vpop.eup %11839  ;;  %10731 = vmatprep.mubr.msk.f32.mxu1 %vm1736_vm1, %v11838_v22  ;;  %v11720_v22 = vld [vmem:[%s14843_s8 + $0x18] sm:$0xff]  }
0x2fa6   : > { %10732 = vmatmul.mubr.msk.f32.vlgmr.msra.gmra.mrb[86].mxu1 %vm1736_vm1, %v11840_v54  ;;  %v11721_v54 = vld [vmem:[%s14843_s8 + $0x60] sm:$0xff]   ;;  %10012 = vmatpush3.bf16.msra.mxu0 %v11720_v22 }
0x2fa7   : > { %11214 = vmatpush3.bf16.msra.mxu1 %v14404_v44  ;;  %10013 = vmatprep.subr.bf16.mxu0 %v11721_v54 }
0x2fa8   : > { %11216 = vmatprep.subr.bf16.mxu1 %v14404_v44 }
0x3079   : > { %v10733_v53 = vpop.f32.mrb[86].mxu1 }
0x307a   : > { %v7536_v1 = vpop.f32.mrb[87].mxu1  ;;  %v7548_v17 = vsel %vm1736_vm1, %v10733_v53, -inf }
0x307b   : > { %7549 = vmax.xlane.f32.xlu1 %v7548_v17  ;;  %v7545_v47 = vsel %vm1736_vm1, %v7536_v1, -inf  ;;  %v11724_v17 = vld [vmem:[%s14843_s8 + $0x28] sm:$0xff]  }
0x307c   : > { %7546 = vmax.xlane.f32.xlu0 %v7545_v47  ;;  %v11725_v47 = vld [vmem:[%s14843_s8 + $0x70] sm:$0xff]  }
0x3108   : > { %v7550_v12 = vpop.xlane.xlu1 %7549 }
0x3109   : > { %v7552_v33 = vsub.f32 %v10733_v53, %v7550_v12  ;;  %v7547_v31 = vpop.xlane.xlu0 %7546  ;;  %v11722_v53 = vld [vmem:[%s14843_s8 + $0x20] sm:$0xff]   ;;  %v11726_v12 = vld [vmem:[%s14843_s8 + $0x30] sm:$0xff]  }
0x310a   : > { %v7551_v61 = vsub.f32 %v7536_v1, %v7547_v31  ;;  %v11723_v1 = vld [vmem:[%s14843_s8 + $0x68] sm:$0xff]   ;;  %10014 = vmatpush3.bf16.msra.mxu0 %v11722_v53 }
0x310b   : > { %v7555_v57 = vmul.f32 1.442695, %v7552_v33  ;;  %10015 = vmatprep.subr.bf16.mxu0 %v11723_v1 }
0x310c   : > { %v7553_v32 = vmul.f32 1.442695, %v7551_v61 }
0x310e   : > { %11841 = vpow2.f32 %v7553_v32  ;;  %10016 = vmatpush3.bf16.msra.mxu0 %v11724_v17 }
0x310f   : > { %11843 = vpow2.f32 %v7555_v57  ;;  %10017 = vmatprep.subr.bf16.mxu0 %v11725_v47 }
0x3112   : > { %10018 = vmatpush3.bf16.msra.mxu0 %v11726_v12 }
0x3118   : > { %v11842_v3 = vpop.eup %11841 }
0x3119   : > { %v7557_v27 = vsel %vm1736_vm1, %v11842_v3, 0.0  ;;  %v11844_v63 = vpop.eup %11843 }
0x311a   : > { %7558 = vadd.xlane.f32.xlu0 %v7557_v27  ;;  %v7560_v25 = vsel %vm1736_vm1, %v11844_v63, 0.0  ;;  %v11706_v27 = vld [vmem:[%s14837_s12 + $0x88] sm:$0xff]  }
0x311e   : > { %7561 = vadd.xlane.f32.xlu0 %v7560_v25  ;;  %v11708_v25 = vld [vmem:[%s14837_s12 + $0x98] sm:$0xff]  }
0x31a7   : > { %v7559_v52 = vpop.xlane.xlu0 %7558 }
0x31a8   : > { %11845 = vrcp.f32 %v7559_v52  ;;  %v11711_v52 = vld [vmem:[%s14837_s12 + $0xb0] sm:$0xff]  }
0x31ab   : > { %v7562_v24 = vpop.xlane.xlu0 %7561 }
0x31ac   : > { %11847 = vrcp.f32 %v7562_v24  ;;  %v11712_v24 = vld [vmem:[%s14837_s12 + $0xb8] sm:$0xff]  }
0x31b2   : > { %v11846_v10 = vpop.eup %11845 }
0x31b3   : > { %v7565_v41 = vmul.f32 %v11846_v10, %v11842_v3  ;;  %v11728_v10 = vld [vmem:[%s14843_s8 + $0x38] sm:$0xff]  }
0x31b5   : > { %v7567_v38 = vmul.f32 %v9566_v8, %v7565_v41  ;;  %v7650_v2 = vmul.f32 %v14839_v36, %v7565_v41  ;;  %v14840_v8 = vunpack.c.h.bf16 %v14371_v39  ;;  %v7733_v21 = vmul.f32 %v14841_v7, %v7565_v41  ;;  %v11691_v39 = vld [vmem:[%s14837_s12 + $0x50] sm:$0xff]   ;;  %v11729_v41 = vld [vmem:[%s14844_s1] sm:$0xff]   ;;  %v11734_v7 = vld [vmem:[%s14844_s1 + $0x28] sm:$0xff]  }
0x31b6   : > { %v11848_v62 = vpop.eup %11847 }
0x31b7   : > { %v7566_v19 = vmul.f32 %v11848_v62, %v11844_v63  ;;  %10738 = vmatprep.mubr.msk.f32.mxu1 %vm1736_vm1, %v7567_v38  ;;  %v11707_v63 = vld [vmem:[%s14837_s12 + $0x90] sm:$0xff]  }
0x31b9   : > { %v7568_v28 = vmul.f32 %v14838_v23, %v7566_v19  ;;  %v7651_v6 = vmul.f32 %v14840_v8, %v7566_v19  ;;  %v7734_v56 = vmul.f32 %v14842_v13, %v7566_v19  ;;  %v11730_v23 = vld [vmem:[%s14844_s1 + $0x8] sm:$0xff]  }
0x31bb   : > { %10739 = vmatmul.mubr.msk.f32.vlgmr.msra.gmra.mrb[88].mxu1 %vm1736_vm1, %v7568_v28 }
0x31bc   : > { %11218 = vmatpush3.bf16.msra.mxu1 %v14404_v44  ;;  %10745 = vmatprep.mubr.msk.f32.mxu1 %vm1736_vm1, %v7650_v2  ;;  %v11731_v2 = vld [vmem:[%s14844_s1 + $0x10] sm:$0xff]  }
0x31bd   : > { %11220 = vmatprep.subr.bf16.mxu1 %v14404_v44 }
0x31bf   : > { %10746 = vmatmul.mubr.msk.f32.vlgmr.msra.gmra.mrb[90].mxu1 %vm1736_vm1, %v7651_v6  ;;  %v11732_v6 = vld [vmem:[%s14844_s1 + $0x18] sm:$0xff]  }
0x31c0   : > { %11222 = vmatpush3.bf16.msra.mxu1 %v14404_v44  ;;  %10752 = vmatprep.mubr.msk.f32.mxu1 %vm1736_vm1, %v7733_v21  ;;  %v11692_v44 = vld [vmem:[%s14837_s12 + $0x58] sm:$0xff]  }
0x31c1   : > { %10755 = vmatprep.subr.bf16.mxu1 %v11689_v5  ;;  %v11736_v21 = vld [vmem:[%s14844_s1 + $0x38] sm:$0xff]  }
0x31c3   : > { %10753 = vmatmul.mubr.msk.f32.vlgmr.msra.gmra.mrb[92].mxu1 %vm1736_vm1, %v7734_v56 }
0x31c4   : > { %10756 = vmatpush3.bf16.msra.mxu1 %v11689_v5  ;;  %10771 = vmatprep.mubr.f32.mxu1 %v14439_v43  ;;  %v11696_v43 = vld [vmem:[%s14837_s12 + $0x78] sm:$0xff]   ;;  %v11733_v5 = vld [vmem:[%s14844_s1 + $0x20] sm:$0xff]  }
0x31c5   : > { %10757 = vmatprep.subr.bf16.mxu1 %v11690_v35 }
0x31c8   : > { %10758 = vmatpush3.bf16.msra.mxu1 %v11690_v35 }
0x31c9   : > { %10759 = vmatprep.subr.bf16.mxu1 %v11691_v39 }
0x31cc   : > { %10760 = vmatpush3.bf16.msra.mxu1 %v11691_v39 }
0x31cd   : > { %10761 = vmatprep.subr.bf16.mxu1 %v11692_v44 }
0x31d0   : > { %10762 = vmatpush3.bf16.msra.mxu1 %v11692_v44 }
0x31d1   : > { %10763 = vmatprep.subr.bf16.mxu1 %v11693_v15 }
0x31d4   : > { %10764 = vmatpush3.bf16.msra.mxu1 %v11693_v15 }
0x31d5   : > { %10765 = vmatprep.subr.bf16.mxu1 %v11694_v51 }
0x31d8   : > { %10766 = vmatpush3.bf16.msra.mxu1 %v11694_v51 }
0x31d9   : > { %10767 = vmatprep.subr.bf16.mxu1 %v11695_v14 }
0x31dc   : > { %10768 = vmatpush3.bf16.msra.mxu1 %v11695_v14 }
0x31dd   : > { %10769 = vmatprep.subr.bf16.mxu1 %v11696_v43 }
0x31e0   : > { %10770 = vmatpush3.bf16.msra.mxu1 %v11696_v43 }
0x31e1   : > { %10777 = vmatprep.subr.bf16.mxu1 %v11697_v40 }
0x31e3   : > { %10772 = vmatmul.mubr.f32.vlgmr.msra.gmra.mrb[94].mxu1 %v14437_v37  ;;  %v11703_v37 = vld [vmem:[%s14837_s12 + $0x30] sm:$0xff]  }
0x31e4   : > { %10778 = vmatpush3.bf16.msra.mxu1 %v11697_v40 }
0x31e5   : > { %10779 = vmatprep.subr.bf16.mxu1 %v11698_v4 }
0x31e8   : > { %10780 = vmatpush3.bf16.msra.mxu1 %v11698_v4 }
0x31e9   : > { %10781 = vmatprep.subr.bf16.mxu1 %v11699_v45 }
0x31ec   : > { %10782 = vmatpush3.bf16.msra.mxu1 %v11699_v45 }
0x31ed   : > { %10783 = vmatprep.subr.bf16.mxu1 %v11700_v18 }
0x31f0   : > { %10784 = vmatpush3.bf16.msra.mxu1 %v11700_v18 }
0x31f1   : > { %10785 = vmatprep.subr.bf16.mxu1 %v11701_v55 }
0x31f4   : > { %10786 = vmatpush3.bf16.msra.mxu1 %v11701_v55 }
0x31f5   : > { %10787 = vmatprep.subr.bf16.mxu1 %v11702_v48 }
0x31f8   : > { %10788 = vmatpush3.bf16.msra.mxu1 %v11702_v48 }
0x31f9   : > { %10789 = vmatprep.subr.bf16.mxu1 %v11703_v37 }
0x31fc   : > { %10790 = vmatpush3.bf16.msra.mxu1 %v11703_v37 }
0x31fd   : > { %10791 = vmatprep.subr.bf16.mxu1 %v11704_v46 }
0x3200   : > { %10792 = vmatpush3.bf16.msra.mxu1 %v11704_v46 }
0x3201   : > { %10799 = vmatprep.subr.bf16.mxu1 %v11705_v50 }
0x328e   : > { %v10740_v33 = vpop.f32.mrb[88].mxu1 }
0x328f   : > { %v7641_v31 = vpop.f32.mrb[89].mxu1 }
0x3292   : > { %v10747_v61 = vpop.f32.mrb[90].mxu1 }
0x3293   : > { %v7724_v57 = vpop.f32.mrb[91].mxu1 }
0x3294   : > { %10774 = vmatprep.mubr.f32.mxu1 %v7724_v57  ;;  %v11740_v57 = vld [vmem:[%s13092_s9 + $0x18] sm:$0xff]  }
0x3295   : > { %10775 = vmatmul.mubr.f32.gmra.mrb[96].mxu1 %v10747_v61 }
0x3296   : > { %v10754_v32 = vpop.f32.mrb[92].mxu1  ;;  %10793 = vmatprep.mubr.f32.mxu1 %v14435_v20  ;;  %v11709_v20 = vld [vmem:[%s14837_s12 + $0xa0] sm:$0xff]  }
0x3297   : > { %v7807_v3 = vpop.f32.mrb[93].mxu1 }
0x3299   : > { %10794 = vmatmul.mubr.f32.vlgmr.msra.gmra.mrb[94].mxu1 %v14433_v0  ;;  %v11710_v0 = vld [vmem:[%s14837_s12 + $0xa8] sm:$0xff]  }
0x329a   : > { %10800 = vmatpush3.bf16.msra.mxu1 %v11705_v50  ;;  %10796 = vmatprep.mubr.f32.mxu1 %v7641_v31 }
0x329b   : > { %10801 = vmatprep.subr.bf16.mxu1 %v11706_v27 }
0x329d   : > { %10797 = vmatmul.mubr.f32.gmra.mrb[96].mxu1 %v10740_v33 }
0x329e   : > { %10802 = vmatpush3.bf16.msra.mxu1 %v11706_v27  ;;  %10815 = vmatprep.mubr.f32.mxu1 %v14443_v30  ;;  %v11727_v30 = vld [vmem:[%s14843_s8 + $0x78] sm:$0xff]   ;;  %v11743_v27 = vld [vmem:[%s13092_s9 + $0x30] sm:$0xff]  }
0x329f   : > { %10803 = vmatprep.subr.bf16.mxu1 %v11707_v63  ;;  %10019 = vmatprep.subr.bf16.mxu0 %v11727_v30 }
0x32a0   : > { %10020 = vmatpush3.bf16.msra.mxu0 %v11728_v10 }
0x32a1   : > { %10821 = vmatprep.subr.bf16.mxu0 %v11729_v41 }
0x32a2   : > { %10804 = vmatpush3.bf16.msra.mxu1 %v11707_v63  ;;  %v11744_v63 = vld [vmem:[%s13092_s9 + $0x38] sm:$0xff]  }
0x32a3   : > { %10805 = vmatprep.subr.bf16.mxu1 %v11708_v25 }
0x32a6   : > { %10806 = vmatpush3.bf16.msra.mxu1 %v11708_v25 }
0x32a7   : > { %10807 = vmatprep.subr.bf16.mxu1 %v11709_v20 }
0x32aa   : > { %10808 = vmatpush3.bf16.msra.mxu1 %v11709_v20 }
0x32ab   : > { %10809 = vmatprep.subr.bf16.mxu1 %v11710_v0 }
0x32ae   : > { %10810 = vmatpush3.bf16.msra.mxu1 %v11710_v0 }
0x32af   : > { %10811 = vmatprep.subr.bf16.mxu1 %v11711_v52 }
0x32b2   : > { %10812 = vmatpush3.bf16.msra.mxu1 %v11711_v52 }
0x32b3   : > { %10813 = vmatprep.subr.bf16.mxu1 %v11712_v24 }
0x32b6   : > { %10814 = vmatpush3.bf16.msra.mxu1 %v11712_v24 }
0x32b7   : > { %10865 = vmatprep.subr.bf16.mxu1 %v11737_v11 }
0x32b9   : > { %10816 = vmatmul.mubr.f32.vlgmr.msra.gmra.mrb[94].mxu1 %v14441_v26 }
0x32ba   : > { %10818 = vmatprep.mubr.f32.mxu1 %v7807_v3  ;;  %10866 = vmatpush3.bf16.msra.mxu1 %v11737_v11  ;;  %v11742_v3 = vld [vmem:[%s13092_s9 + $0x28] sm:$0xff]  }
0x32bb   : > { %10867 = vmatprep.subr.bf16.mxu1 %v11738_v34 }
0x32bd   : > { %10819 = vmatmul.mubr.f32.gmra.mrb[96].mxu1 %v10754_v32  ;;  %v11741_v32 = vld [vmem:[%s13092_s9 + $0x20] sm:$0xff]  }
0x32be   : > { %10868 = vmatpush3.bf16.msra.mxu1 %v11738_v34 }
0x32bf   : > { %10869 = vmatprep.subr.bf16.mxu1 %v11739_v49 }
0x32c2   : > { %10870 = vmatpush3.bf16.msra.mxu1 %v11739_v49 }
0x32c3   : > { %10871 = vmatprep.subr.bf16.mxu1 %v11740_v57 }
0x32c6   : > { %10872 = vmatpush3.bf16.msra.mxu1 %v11740_v57 }
0x32c7   : > { %10873 = vmatprep.subr.bf16.mxu1 %v11741_v32 }
0x32ca   : > { %10874 = vmatpush3.bf16.msra.mxu1 %v11741_v32 }
0x32cb   : > { %10875 = vmatprep.subr.bf16.mxu1 %v11742_v3 }
0x32ce   : > { %10876 = vmatpush3.bf16.msra.mxu1 %v11742_v3 }
0x32cf   : > { %10877 = vmatprep.subr.bf16.mxu1 %v11743_v27 }
0x32d2   : > { %10878 = vmatpush3.bf16.msra.mxu1 %v11743_v27 }
0x32d3   : > { %10879 = vmatprep.subr.bf16.mxu1 %v11744_v63 }
0x32d6   : > { %10880 = vmatpush3.bf16.msra.mxu1 %v11744_v63 }
0x338c   : > { %v10817_v38 = vpop.f32.mrb[94].mxu1 }
0x338d   : > { %v8150_v62 = vpop.f32.mrb[95].mxu1  ;;  %v8174_v26 = vmax.f32 %v10817_v38, 0.0 }
0x338e   : > { %v8173_v19 = vmax.f32 %v8150_v62, 0.0  ;;  %v9479_v62 = vld [vmem:[%s14845_s10] ss:$0 sm:$0xff] }
0x3390   : > { %v10820_v28 = vpop.f32.mrb[96].mxu1  ;;  %8345 = vmatmul.mubr.f32.vlgmr.msra.gmra.mrb[94].mxu0 %v8173_v19 }
0x3391   : > { %v8160_v36 = vpop.f32.mrb[97].mxu1  ;;  %8349 = vmatprep.mubr.f32.mxu0 %v14078_v16  ;;  %10822 = vmatpush3.bf16.msra.mxu0 %v11729_v41  ;;  %v8176_v16 = vmax.f32 %v10820_v28, 0.0 }
0x3392   : > { %10823 = vmatprep.subr.bf16.mxu0 %v11730_v23  ;;  %v8175_v8 = vmax.f32 %v8160_v36, 0.0  ;;  %v9480_v36 = vld [vmem:[%s13087_s27] ss:$0 sm:$0xff] }
0x3394   : > { %8350 = vmatmul.mubr.f32.gmra.mrb[96].mxu0 %v8174_v26 }
0x3395   : > { %8354 = vmatprep.mubr.f32.mxu0 %v14091_v60  ;;  %10824 = vmatpush3.bf16.msra.mxu0 %v11730_v23  ;;  %v11735_v60 = vld [vmem:[%s14844_s1 + $0x30] sm:$0xff]  }
0x3396   : > { %10825 = vmatprep.subr.bf16.mxu0 %v11731_v2 }
0x3398   : > { %8355 = vmatmul.mubr.f32.gmra.mrb[98].mxu0 %v8175_v8 }
0x3399   : > { %8359 = vmatprep.mubr.f32.mxu0 %v14088_v58  ;;  %10826 = vmatpush3.bf16.msra.mxu0 %v11731_v2  ;;  %v9454_v58 = vld [vmem:[#allocation46] ss:$0 sm:$0xff] }
0x339a   : > { %10827 = vmatprep.subr.bf16.mxu0 %v11732_v6 }
0x339c   : > { %8360 = vmatmul.mubr.f32.gmra.mrb[100].mxu0 %v8176_v16 }
0x339d   : > { %10828 = vmatpush3.bf16.msra.mxu0 %v11732_v6 }
0x339e   : > { %10829 = vmatprep.subr.bf16.mxu0 %v11733_v5 }
0x33a1   : > { %10830 = vmatpush3.bf16.msra.mxu0 %v11733_v5 }
0x33a2   : > { %10831 = vmatprep.subr.bf16.mxu0 %v11734_v7 }
0x33a5   : > { %10832 = vmatpush3.bf16.msra.mxu0 %v11734_v7 }
0x33a6   : > { %10833 = vmatprep.subr.bf16.mxu0 %v11735_v60 }
0x33a9   : > { %10834 = vmatpush3.bf16.msra.mxu0 %v11735_v60 }
0x33aa   : > { %10835 = vmatprep.subr.bf16.mxu0 %v11736_v21 }
0x33ad   : > { %10836 = vmatpush3.bf16.msra.mxu0 %v11736_v21 }
0x33ae   : > { %10843 = vmatprep.subr.bf16.mxu0 %v11729_v41 }
0x3463   : > { %v10021_v13 = vpop.f32.mrb[94].mxu0 }
0x3464   : > { %v10022_v56 = vpop.f32.mrb[95].mxu0 }
0x3465   : > { %v10023_v35 = vadd.f32 %v10022_v56, %v10021_v13 }
0x3467   : > { %v8347_v39 = vadd.f32 %v10023_v35, %v9454_v58  ;;  %v10024_v44 = vpop.f32.mrb[96].mxu0  ;;  %v9481_v35 = vld [vmem:[#allocation48] ss:$0 sm:$0xff] }
0x3468   : > { %v10025_v15 = vpop.f32.mrb[97].mxu0 }
0x3469   : > { %v8365_v51 = vmax.f32 %v8347_v39, 0.0  ;;  %v10026_v14 = vadd.f32 %v10025_v15, %v10024_v44 }
0x346b   : > { %v8352_v43 = vadd.f32 %v10026_v14, %v9454_v58  ;;  %v10027_v40 = vpop.f32.mrb[98].mxu0  ;;  %10837 = vmatprep.mubr.f32.mxu0 %v8365_v51 }
0x346c   : > { %v10028_v4 = vpop.f32.mrb[99].mxu0 }
0x346d   : > { %v8366_v45 = vmax.f32 %v8352_v43, 0.0  ;;  %v10029_v18 = vadd.f32 %v10028_v4, %v10027_v40 }
0x346f   : > { %v8357_v55 = vadd.f32 %v10029_v18, %v9454_v58  ;;  %v10030_v48 = vpop.f32.mrb[100].mxu0  ;;  %10838 = vmatmul.mubr.f32.vlgmr.msra.gmra.mrb[102].mxu0 %v8366_v45 }
0x3470   : > { %v10031_v37 = vpop.f32.mrb[101].mxu0  ;;  %10844 = vmatpush3.bf16.msra.mxu0 %v11729_v41 }
0x3471   : > { %v8367_v46 = vmax.f32 %v8357_v55, 0.0  ;;  %v10032_v50 = vadd.f32 %v10031_v37, %v10030_v48  ;;  %10845 = vmatprep.subr.bf16.mxu0 %v11730_v23 }
0x3473   : > { %v8362_v42 = vadd.f32 %v10032_v50, %v9454_v58  ;;  %10840 = vmatprep.mubr.f32.mxu0 %v8367_v46 }
0x3474   : > { %10846 = vmatpush3.bf16.msra.mxu0 %v11730_v23 }
0x3475   : > { %v8368_v9 = vmax.f32 %v8362_v42, 0.0  ;;  %10847 = vmatprep.subr.bf16.mxu0 %v11731_v2 }
0x3477   : > { %10841 = vmatmul.mubr.f32.gmra.mrb[104].mxu0 %v8368_v9 }
0x3478   : > { %10848 = vmatpush3.bf16.msra.mxu0 %v11731_v2 }
0x3479   : > { %10849 = vmatprep.subr.bf16.mxu0 %v11732_v6 }
0x347c   : > { %10850 = vmatpush3.bf16.msra.mxu0 %v11732_v6 }
0x347d   : > { %10851 = vmatprep.subr.bf16.mxu0 %v11733_v5 }
0x3480   : > { %10852 = vmatpush3.bf16.msra.mxu0 %v11733_v5 }
0x3481   : > { %10853 = vmatprep.subr.bf16.mxu0 %v11734_v7 }
0x3484   : > { %10854 = vmatpush3.bf16.msra.mxu0 %v11734_v7 }
0x3485   : > { %10855 = vmatprep.subr.bf16.mxu0 %v11735_v60 }
0x3488   : > { %10856 = vmatpush3.bf16.msra.mxu0 %v11735_v60 }
0x3489   : > { %10857 = vmatprep.subr.bf16.mxu0 %v11736_v21 }
0x348c   : > { %10858 = vmatpush3.bf16.msra.mxu0 %v11736_v21 }
0x3542   : > { %v10839_v59 = vpop.f32.mrb[102].mxu0 }
0x3543   : > { %v8487_v29 = vsub.f32 %v8366_v45, %v10839_v59  ;;  %v8467_v22 = vpop.f32.mrb[103].mxu0 }
0x3544   : > { %v8486_v54 = vsub.f32 %v8365_v51, %v8467_v22 }
0x3545   : > { %v8491_v1 = vmul.f32 %v8487_v29, %v8487_v29 }
0x3546   : > { %v8490_v53 = vmul.f32 %v8486_v54, %v8486_v54 }
0x3548   : > { %10859 = vmatprep.mubr.f32.mxu0 %v8490_v53 }
0x3549   : > { %10860 = vmatmul.mubr.f32.vlgmr.msra.gmra.mrb[106].mxu0 %v8491_v1 }
0x354a   : > { %v10842_v17 = vpop.f32.mrb[104].mxu0 }
0x354b   : > { %v8489_v47 = vsub.f32 %v8368_v9, %v10842_v17  ;;  %v8477_v12 = vpop.f32.mrb[105].mxu0 }
0x354c   : > { %v8488_v33 = vsub.f32 %v8367_v46, %v8477_v12 }
0x354d   : > { %v8493_v61 = vmul.f32 %v8489_v47, %v8489_v47 }
0x354e   : > { %v8492_v31 = vmul.f32 %v8488_v33, %v8488_v33 }
0x3550   : > { %10862 = vmatprep.mubr.f32.mxu0 %v8492_v31 }
0x3551   : > { %10863 = vmatmul.mubr.f32.gmra.mrb[108].mxu0 %v8493_v61 }
0x361c   : > { %v10861_v25 = vpop.f32.mrb[106].mxu0 }
0x361d   : > { %v8534_v20 = vadd.f32 1e-05, %v10861_v25  ;;  %v8528_v0 = vpop.f32.mrb[107].mxu0 }
0x361e   : > { %v8529_v52 = vadd.f32 1e-05, %v8528_v0 }
0x361f   : > { %11849 = vrsqrt.f32 %v8534_v20 }
0x3620   : > { %11851 = vrsqrt.f32 %v8529_v52 }
0x3624   : > { %v10864_v24 = vpop.f32.mrb[108].mxu0 }
0x3625   : > { %v8544_v30 = vadd.f32 1e-05, %v10864_v24  ;;  %v8538_v10 = vpop.f32.mrb[109].mxu0 }
0x3626   : > { %v8539_v41 = vadd.f32 1e-05, %v8538_v10 }
0x3627   : > { %11853 = vrsqrt.f32 %v8544_v30 }
0x3628   : > { %11855 = vrsqrt.f32 %v8539_v41 }
0x3629   : > { %v11850_v38 = vpop.eup %11849 }
0x362a   : > { %v11852_v19 = vpop.eup %11851  ;;  %v8552_v23 = vmul.f32 %v11850_v38, %v8487_v29 }
0x362b   : > { %v8551_v28 = vmul.f32 %v11852_v19, %v8486_v54 }
0x362c   : > { %v8563_v26 = vmul.f32 %v9479_v62, %v8552_v23 }
0x362d   : > { %v8562_v2 = vmul.f32 %v9479_v62, %v8551_v28 }
0x362e   : > { %v8574_v6 = vadd.f32 %v9480_v36, %v8563_v26 }
0x362f   : > { %v8573_v8 = vadd.f32 %v9480_v36, %v8562_v2 }
0x3631   : > { %v11854_v16 = vpop.eup %11853  ;;  %10881 = vmatprep.mubr.f32.mxu1 %v8573_v8 }
0x3632   : > { %v11856_v5 = vpop.eup %11855  ;;  %10882 = vmatmul.mubr.f32.vlgmr.msra.gmra.mrb[98].mxu1 %v8574_v6  ;;  %v8554_v7 = vmul.f32 %v11854_v16, %v8489_v47 }
0x3633   : > { %v8553_v60 = vmul.f32 %v11856_v5, %v8488_v33 }
0x3634   : > { %v8565_v21 = vmul.f32 %v9479_v62, %v8554_v7 }
0x3635   : > { %v8564_v13 = vmul.f32 %v9479_v62, %v8553_v60 }
0x3636   : > { %v8576_v56 = vadd.f32 %v9480_v36, %v8565_v21 }
0x3637   : > { %v8575_v58 = vadd.f32 %v9480_v36, %v8564_v13 }
0x3639   : > { %10884 = vmatprep.mubr.f32.mxu1 %v8575_v58 }
0x363a   : > { %10885 = vmatmul.mubr.f32.gmra.mrb[100].mxu1 %v8576_v56 }
0x3705   : > { %v10883_v39 = vpop.f32.mrb[98].mxu1 }
0x3706   : > { %v8688_v44 = vadd.f32 %v10883_v39, %v9481_v35  ;;  %v8682_v15 = vpop.f32.mrb[99].mxu1 }
0x3707   : > { %v8683_v51 = vadd.f32 %v9481_v35, %v8682_v15 }
0x3708   : > { %8702 = vst.msk [vmem:[%s1723_s15 + $0x8] sm:$0xff] %vm2356_vm5, %v8688_v44 }
0x3709   : > { %8701 = vst.msk [vmem:[%s1723_s15] sm:$0xff] %vm2356_vm5, %v8683_v51 }
0x370d   : > { %v10886_v14 = vpop.f32.mrb[100].mxu1 }
0x370e   : > { %v8698_v43 = vadd.f32 %v10886_v14, %v9481_v35  ;;  %v8692_v40 = vpop.f32.mrb[101].mxu1 }
0x370f   : > { %v8693_v4 = vadd.f32 %v9481_v35, %v8692_v40 }
0x3710   : > { %9491 = vst.msk [vmem:[%s1723_s15 + $0x18] sm:$0xff] %vm2356_vm5, %v8698_v43 }
0x3711   : > { %9490 = vst.msk [vmem:[%s1723_s15 + $0x10] sm:$0xff] %vm2356_vm5, %v8693_v4 }
0x3712 PF: > { %s113_s22 = sadd.s32 1, %s12795_s22  }
0x3713   : > { %p110_p7 = scmp.ge.s32.totalorder %s113_s22, 4  }
0x3715   :  { %112 = sbr.rel (!%p110_p7) target bundleno = 96 (0x60), region = 400 }
0x371c   :  { %8730 = vsyncpa [#allocation3], 1 }
0x371d   :  { %8732 = vsyncpa [#allocation3 + $0x1], 1 }
0x371e   :  { %8733 = vsyncpa [#allocation5], 1 }
0x371f   :  { %8734 = vsyncpa [#allocation8], 1 }
0x3720   :  { %8735 = vsyncpa [#allocation11], 1 }
0x3721   :  { %8736 = vsyncpa [#allocation14], 1 }
0x3722   :  { %8737 = vsyncpa [#allocation17], 1 }
0x3723   :  { %8738 = vsyncpa [#allocation20], 1 }
0x3724   :  { %8739 = vsyncpa [#allocation23], 1 }
0x3725   :  { %8740 = vsyncpa [#allocation26], 1 }
0x3726   :  { %8741 = vsyncpa [#allocation29], 1 }
0x3727   :  { %8742 = vsyncpa [#allocation32], 1 }
0x3728   :  { %8743 = vsyncpa [#allocation35], 1 }
0x3729   :  { %8744 = vsyncpa [#allocation38], 1 }
0x372a   :  { %8745 = vsyncpa [#allocation41], 1 }
0x372b   :  { %8746 = vsyncpa [#allocation44], 1 }
0x372c   :  { %8747 = vsyncpa [#allocation47], 1 }

</bundles_post_ra>
